<compile_context>
chip_gen: v6e
topology: v6e:2x2x1
jax: 0.10.0
libtpu: 0.0.40
codegen_flags: <defaults>
</compile_context>

<pallas_src>
import jax
import jax.numpy as jnp
import numpy as np
from jax.experimental import pallas as pl
from jax.experimental.pallas import tpu as pltpu

INPUT_SIZE = 3 * 543        # 1629
INPUT_PAD = 13 * 128        # 1664, lane-aligned contraction dim
HIDDEN = 1024
ENCODING_DIM = 128
MAX_TILE_B = 256            # batch tile; bounds VMEM on all generations


def _encoder_kernel(x_ref, w1_ref, s1_ref, b1_ref, w2_ref, s2_ref, b2_ref,
                    o_ref, xpad_ref):
    # ---- fused pad + f32->bf16 cast of the activation tile (in VMEM) ------
    # Zero the whole scratch first (covers lane-padding columns 1629:1664;
    # their W1 rows are zero, but uninitialized VMEM could hold NaNs), then
    # overwrite the valid 1629 columns with the cast input tile.
    xpad_ref[...] = jnp.zeros(xpad_ref.shape, xpad_ref.dtype)
    xpad_ref[:, :INPUT_SIZE] = x_ref[...].astype(jnp.bfloat16)

    # ---- first linear: int8 weights dequantized on the VPU, bf16 MXU matmul
    # int8 values are exactly representable in bf16; per-channel scale is
    # applied in the f32 epilogue (dot(x, q) * s == dot(x, q * s)).
    w1 = w1_ref[...].astype(jnp.float32).astype(jnp.bfloat16)
    h = jnp.dot(xpad_ref[...], w1, preferred_element_type=jnp.float32)
    h = jnp.maximum(h * s1_ref[...] + b1_ref[...], 0.0)

    # ---- second linear -----------------------------------------------------
    w2 = w2_ref[...].astype(jnp.float32).astype(jnp.bfloat16)
    o = jnp.dot(h.astype(jnp.bfloat16), w2, preferred_element_type=jnp.float32)
    o_ref[...] = o * s2_ref[...] + b2_ref[...]


def encoder_forward(x, w1_q, w1_scale, b1, w2_q, w2_scale, b2):
    """x: (B, 1629) f32.  w1_q: (1664, 1024) int8, w1_scale/b1: (1, 1024) f32,
    w2_q: (1024, 128) int8, w2_scale/b2: (1, 128) f32.  Returns (B, 128) f32."""
    B, F = x.shape
    assert F == INPUT_SIZE
    assert w1_q.shape == (INPUT_PAD, HIDDEN)
    assert w2_q.shape == (HIDDEN, ENCODING_DIM)

    # Small batches: one whole-array block (block == array dims, always legal).
    # Large batches: 256-row tiles, weights stay resident via constant index
    # maps, last (edge) block is masked by Pallas on writeback.
    tile_b = B if B <= MAX_TILE_B else MAX_TILE_B
    grid = (pl.cdiv(B, tile_b),)

    flops = 2 * B * (INPUT_PAD * HIDDEN + HIDDEN * ENCODING_DIM)
    bytes_accessed = (
        B * INPUT_SIZE * 4                      # x (f32 in)
        + w1_q.size + w2_q.size                 # int8 weights
        + (w1_scale.size + b1.size + w2_scale.size + b2.size) * 4
        + B * ENCODING_DIM * 4)                 # output

    return pl.pallas_call(
        _encoder_kernel,
        out_shape=jax.ShapeDtypeStruct((B, ENCODING_DIM), jnp.float32),
        grid=grid,
        in_specs=[
            pl.BlockSpec((tile_b, INPUT_SIZE), lambda i: (i, 0)),     # x (f32)
            pl.BlockSpec((INPUT_PAD, HIDDEN), lambda i: (0, 0)),      # W1 int8
            pl.BlockSpec((1, HIDDEN), lambda i: (0, 0)),              # s1
            pl.BlockSpec((1, HIDDEN), lambda i: (0, 0)),              # b1
            pl.BlockSpec((HIDDEN, ENCODING_DIM), lambda i: (0, 0)),   # W2 int8
            pl.BlockSpec((1, ENCODING_DIM), lambda i: (0, 0)),        # s2
            pl.BlockSpec((1, ENCODING_DIM), lambda i: (0, 0)),        # b2
        ],
        out_specs=pl.BlockSpec((tile_b, ENCODING_DIM), lambda i: (i, 0)),
        scratch_shapes=[pltpu.VMEM((tile_b, INPUT_PAD), jnp.bfloat16)],
        compiler_params=pltpu.CompilerParams(
            dimension_semantics=("parallel",),
            vmem_limit_bytes=32 * 1024 * 1024),
        cost_estimate=pl.CostEstimate(flops=int(flops), transcendentals=0,
                                      bytes_accessed=int(bytes_accessed)),
    )(x, w1_q, w1_scale, b1, w2_q, w2_scale, b2)


def _quantize_per_channel(w):
    """Symmetric per-output-channel int8 quantization.  w: (in, out) f32."""
    amax = jnp.max(jnp.abs(w), axis=0, keepdims=True)          # (1, out)
    scale = jnp.maximum(amax, 1e-12) / 127.0
    q = jnp.clip(jnp.round(w / scale), -127.0, 127.0).astype(jnp.int8)
    return q, scale


def init_params(key):
    """nn.Linear-style init (uniform(-1/sqrt(fan_in), +)); W1 rows zero-padded
    to 1664 so the lane-aligned in-kernel contraction is exact; weights are
    int8-quantized with per-output-channel scales."""
    k1, k2, k3, k4 = jax.random.split(key, 4)
    lim1 = 1.0 / np.sqrt(INPUT_SIZE)
    lim2 = 1.0 / np.sqrt(HIDDEN)
    w1 = jax.random.uniform(k1, (INPUT_SIZE, HIDDEN), jnp.float32, -lim1, lim1)
    b1 = jax.random.uniform(k2, (1, HIDDEN), jnp.float32, -lim1, lim1)
    w2 = jax.random.uniform(k3, (HIDDEN, ENCODING_DIM), jnp.float32, -lim2, lim2)
    b2 = jax.random.uniform(k4, (1, ENCODING_DIM), jnp.float32, -lim2, lim2)
    w1_pad = jnp.zeros((INPUT_PAD, HIDDEN), jnp.float32).at[:INPUT_SIZE].set(w1)
    w1_q, w1_scale = _quantize_per_channel(w1_pad)
    w2_q, w2_scale = _quantize_per_channel(w2)
    return w1_q, w1_scale, b1, w2_q, w2_scale, b2


if __name__ == "__main__":
    key = jax.random.PRNGKey(0)
    kx, kp = jax.random.split(key)

    B = 2  # small batch
    x = jax.random.normal(kx, (B, INPUT_SIZE), jnp.float32)
    w1_q, w1_scale, b1, w2_q, w2_scale, b2 = init_params(kp)

    out = encoder_forward(x, w1_q, w1_scale, b1, w2_q, w2_scale, b2)
    out = jax.block_until_ready(out)
    assert out.shape == (B, ENCODING_DIM)
    assert bool(jnp.all(jnp.isfinite(out)))

    # Reference in plain JAX using the *identical* dequantized int8 weights and
    # the same bf16 rounding of matmul operands; only accumulation order and
    # scale-application rounding differ.
    w1_deq = w1_q.astype(jnp.float32) * w1_scale        # (1664, 1024)
    w2_deq = w2_q.astype(jnp.float32) * w2_scale        # (1024, 128)
    x_bf = x.astype(jnp.bfloat16).astype(jnp.float32)
    h_ref = jnp.maximum(x_bf @ w1_deq[:INPUT_SIZE] + b1, 0.0)
    ref = h_ref.astype(jnp.bfloat16).astype(jnp.float32) @ w2_deq + b2
    np.testing.assert_allclose(np.asarray(out), np.asarray(ref),
                               rtol=1e-2, atol=1e-2)

    print("KERNEL_OK")
</pallas_src>

<mosaic_0001>
module attributes {stable_mosaic.version = 11 : i64} {
  func.func @_encoder_kernel(%arg0: i32, %arg1: memref<2x1629xf32, #tpu.memory_space<vmem>>, %arg2: memref<1664x1024xi8, #tpu.memory_space<vmem>>, %arg3: memref<1x1024xf32, #tpu.memory_space<vmem>>, %arg4: memref<1x1024xf32, #tpu.memory_space<vmem>>, %arg5: memref<1024x128xi8, #tpu.memory_space<vmem>>, %arg6: memref<1x128xf32, #tpu.memory_space<vmem>>, %arg7: memref<1x128xf32, #tpu.memory_space<vmem>>, %arg8: memref<2x128xf32, #tpu.memory_space<vmem>>, %arg9: memref<2x1664xbf16, #tpu.memory_space<vmem>>) attributes {dimension_semantics = [#tpu.dimension_semantics<parallel>], iteration_bounds = array<i64: 1>, scalar_prefetch = 0 : i64, scratch_operands = 1 : i64, tpu.core_type = #tpu.core_type<tc>, window_params = [{transform_indices = @transform_0, window_bounds = array<i64: 2, 1629>}, {pipeline_mode = #tpu.pipeline_mode<synchronous>, transform_indices = @transform_1, window_bounds = array<i64: 1664, 1024>}, {pipeline_mode = #tpu.pipeline_mode<synchronous>, transform_indices = @transform_2, window_bounds = array<i64: 1, 1024>}, {pipeline_mode = #tpu.pipeline_mode<synchronous>, transform_indices = @transform_3, window_bounds = array<i64: 1, 1024>}, {pipeline_mode = #tpu.pipeline_mode<synchronous>, transform_indices = @transform_4, window_bounds = array<i64: 1024, 128>}, {pipeline_mode = #tpu.pipeline_mode<synchronous>, transform_indices = @transform_5, window_bounds = array<i64: 1, 128>}, {pipeline_mode = #tpu.pipeline_mode<synchronous>, transform_indices = @transform_6, window_bounds = array<i64: 1, 128>}, {transform_indices = @transform_7, window_bounds = array<i64: 2, 128>}]} {
    %cst = arith.constant 0.000000e+00 : bf16
    %0 = vector.broadcast %cst : bf16 to vector<2x1664xbf16>
    %c0 = arith.constant 0 : index
    %c0_0 = arith.constant 0 : index
    %1 = vector.load %arg9[%c0, %c0_0] : memref<2x1664xbf16, #tpu.memory_space<vmem>>, vector<2x1664xbf16>
    tpu.vector_store %arg9[%c0, %c0_0], %0 {strides = array<i32>} : memref<2x1664xbf16, #tpu.memory_space<vmem>>, vector<2x1664xbf16>,
    %c0_1 = arith.constant 0 : index
    %c0_2 = arith.constant 0 : index
    %2 = vector.load %arg1[%c0_1, %c0_2] : memref<2x1629xf32, #tpu.memory_space<vmem>>, vector<2x1629xf32>
    %3 = arith.truncf %2 : vector<2x1629xf32> to vector<2x1629xbf16>
    %c0_3 = arith.constant 0 : index
    %c0_4 = arith.constant 0 : index
    %4 = vector.load %arg9[%c0_3, %c0_4] : memref<2x1664xbf16, #tpu.memory_space<vmem>>, vector<2x1629xbf16>
    tpu.vector_store %arg9[%c0_3, %c0_4], %3 {strides = array<i32>} : memref<2x1664xbf16, #tpu.memory_space<vmem>>, vector<2x1629xbf16>,
    %c0_5 = arith.constant 0 : index
    %c0_6 = arith.constant 0 : index
    %5 = vector.load %arg2[%c0_5, %c0_6] : memref<1664x1024xi8, #tpu.memory_space<vmem>>, vector<1664x1024xi8>
    %6 = arith.sitofp %5 : vector<1664x1024xi8> to vector<1664x1024xf32>
    %7 = arith.truncf %6 : vector<1664x1024xf32> to vector<1664x1024xbf16>
    %c0_7 = arith.constant 0 : index
    %c0_8 = arith.constant 0 : index
    %8 = vector.load %arg9[%c0_7, %c0_8] : memref<2x1664xbf16, #tpu.memory_space<vmem>>, vector<2x1664xbf16>
    %cst_9 = arith.constant dense<0.000000e+00> : vector<2x1024xf32>
    %9 = tpu.matmul %8, %7, %cst_9 {dimension_numbers = #tpu.dot_dimension_numbers<[1], [0], [0], [1], [0, 0, 1, 1], [], []>} : vector<2x1664xbf16>, vector<1664x1024xbf16>, vector<2x1024xf32> -> vector<2x1024xf32>
    %c0_10 = arith.constant 0 : index
    %c0_11 = arith.constant 0 : index
    %10 = vector.load %arg3[%c0_10, %c0_11] : memref<1x1024xf32, #tpu.memory_space<vmem>>, vector<1x1024xf32>
    %11 = vector.broadcast %10 : vector<1x1024xf32> to vector<2x1024xf32>
    %12 = arith.mulf %9, %11 : vector<2x1024xf32>
    %c0_12 = arith.constant 0 : index
    %c0_13 = arith.constant 0 : index
    %13 = vector.load %arg4[%c0_12, %c0_13] : memref<1x1024xf32, #tpu.memory_space<vmem>>, vector<1x1024xf32>
    %14 = vector.broadcast %13 : vector<1x1024xf32> to vector<2x1024xf32>
    %15 = arith.addf %12, %14 : vector<2x1024xf32>
    %cst_14 = arith.constant 0.000000e+00 : f32
    %16 = vector.broadcast %cst_14 : f32 to vector<2x1024xf32>
    %17 = arith.maximumf %15, %16 : vector<2x1024xf32>
    %c0_15 = arith.constant 0 : index
    %c0_16 = arith.constant 0 : index
    %18 = vector.load %arg5[%c0_15, %c0_16] : memref<1024x128xi8, #tpu.memory_space<vmem>>, vector<1024x128xi8>
    %19 = arith.sitofp %18 : vector<1024x128xi8> to vector<1024x128xf32>
    %20 = arith.truncf %19 : vector<1024x128xf32> to vector<1024x128xbf16>
    %21 = arith.truncf %17 : vector<2x1024xf32> to vector<2x1024xbf16>
    %cst_17 = arith.constant dense<0.000000e+00> : vector<2x128xf32>
    %22 = tpu.matmul %21, %20, %cst_17 {dimension_numbers = #tpu.dot_dimension_numbers<[1], [0], [0], [1], [0, 0, 1, 1], [], []>} : vector<2x1024xbf16>, vector<1024x128xbf16>, vector<2x128xf32> -> vector<2x128xf32>
    %c0_18 = arith.constant 0 : index
    %c0_19 = arith.constant 0 : index
    %23 = vector.load %arg6[%c0_18, %c0_19] : memref<1x128xf32, #tpu.memory_space<vmem>>, vector<1x128xf32>
    %24 = vector.broadcast %23 : vector<1x128xf32> to vector<2x128xf32>
    %25 = arith.mulf %22, %24 : vector<2x128xf32>
    %c0_20 = arith.constant 0 : index
    %c0_21 = arith.constant 0 : index
    %26 = vector.load %arg7[%c0_20, %c0_21] : memref<1x128xf32, #tpu.memory_space<vmem>>, vector<1x128xf32>
    %27 = vector.broadcast %26 : vector<1x128xf32> to vector<2x128xf32>
    %28 = arith.addf %25, %27 : vector<2x128xf32>
    %c0_22 = arith.constant 0 : index
    %c0_23 = arith.constant 0 : index
    %29 = vector.load %arg8[%c0_22, %c0_23] : memref<2x128xf32, #tpu.memory_space<vmem>>, vector<2x128xf32>
    tpu.vector_store %arg8[%c0_22, %c0_23], %28 {strides = array<i32>} : memref<2x128xf32, #tpu.memory_space<vmem>>, vector<2x128xf32>,
    return
  }
  func.func @transform_0(%arg0: i32) -> (i32, i32) {
    %c0_i32 = arith.constant 0 : i32
    %c0_i32_0 = arith.constant 0 : i32
    return %arg0, %c0_i32 : i32, i32
  }
  func.func @transform_1(%arg0: i32) -> (i32, i32) {
    %c0_i32 = arith.constant 0 : i32
    %c0_i32_0 = arith.constant 0 : i32
    %c0_i32_1 = arith.constant 0 : i32
    return %c0_i32, %c0_i32_0 : i32, i32
  }
  func.func @transform_2(%arg0: i32) -> (i32, i32) {
    %c0_i32 = arith.constant 0 : i32
    %c0_i32_0 = arith.constant 0 : i32
    %c0_i32_1 = arith.constant 0 : i32
    return %c0_i32, %c0_i32_0 : i32, i32
  }
  func.func @transform_3(%arg0: i32) -> (i32, i32) {
    %c0_i32 = arith.constant 0 : i32
    %c0_i32_0 = arith.constant 0 : i32
    %c0_i32_1 = arith.constant 0 : i32
    return %c0_i32, %c0_i32_0 : i32, i32
  }
  func.func @transform_4(%arg0: i32) -> (i32, i32) {
    %c0_i32 = arith.constant 0 : i32
    %c0_i32_0 = arith.constant 0 : i32
    %c0_i32_1 = arith.constant 0 : i32
    return %c0_i32, %c0_i32_0 : i32, i32
  }
  func.func @transform_5(%arg0: i32) -> (i32, i32) {
    %c0_i32 = arith.constant 0 : i32
    %c0_i32_0 = arith.constant 0 : i32
    %c0_i32_1 = arith.constant 0 : i32
    return %c0_i32, %c0_i32_0 : i32, i32
  }
  func.func @transform_6(%arg0: i32) -> (i32, i32) {
    %c0_i32 = arith.constant 0 : i32
    %c0_i32_0 = arith.constant 0 : i32
    %c0_i32_1 = arith.constant 0 : i32
    return %c0_i32, %c0_i32_0 : i32, i32
  }
  func.func @transform_7(%arg0: i32) -> (i32, i32) {
    %c0_i32 = arith.constant 0 : i32
    %c0_i32_0 = arith.constant 0 : i32
    return %arg0, %c0_i32 : i32, i32
  }
}

</mosaic_0001>

<bundles_post_ra>
// kernel: tpu_custom_call.1
= control target key start
LH: loop header
LB: loop body
LE: loop exit
PB: predicated region body
PF: predicated region fallthrough
CT: control target
= control target key end

     0   :  { %12 = vsyncpa [#allocation4], 0  ;;  %s3883_s0 = inlined_call_operand.hbm [shape: f32[2,1629], index: 0, kind: input, shape index: {}]   ;;  %s3884_s1 = inlined_call_operand.hbm [shape: s8[1664,1024], index: 1, kind: input, shape index: {}]   ;;  %s3885_s2 = inlined_call_operand.hbm [shape: f32[1,1024], index: 2, kind: input, shape index: {}]   ;;  %s3886_s3 = inlined_call_operand.hbm [shape: f32[1,1024], index: 3, kind: input, shape index: {}]   ;;  %s3887_s4 = inlined_call_operand.hbm [shape: s8[1024,128], index: 4, kind: input, shape index: {}]   ;;  %s3888_s5 = inlined_call_operand.hbm [shape: f32[1,128], index: 5, kind: input, shape index: {}]   ;;  %s3889_s6 = inlined_call_operand.hbm [shape: f32[1,128], index: 6, kind: input, shape index: {}]   ;;  %s3890_s7 = inlined_call_operand.hbm [shape: f32[2,128], index: 7, kind: output, shape index: {}]  }
   0x1   :  { %13 = vsyncpa [#allocation7], 0 }
   0x2   :  { %14 = vsyncpa [#allocation10], 0 }
   0x3   :  { %15 = vsyncpa [#allocation13], 0 }
   0x4   :  { %16 = vsyncpa [#allocation5], 0  ;;  %s3516_s24 = smov [#allocation6]  }
   0x5   :  { %s32_s25 = sshll.u32 %s3516_s24, 4  ;;  %s33_s25 = int_to_ptr.vmem [resolvable:$true] %s32_s25 }
   0x6   :  { %s3354_s26 = scalar_lea.vmem %s33_s25, 53248  ;;  %p3359_p1 = scmp.lt.s32.totalorder %s33_s25, %s33_s25 }
   0x7   :  { %p3355_p0 = scmp.ne.s32.totalorder %s33_s25, %s3354_s26  ;;  %p3360_p2 = scmp.lt.s32.totalorder %s3354_s26, %s3354_s26 }
   0x9   :  { %p3361_p3 = por %p3360_p2, %p3359_p1 }
   0xb   :  { %p3362_p4 = pnand %p3361_p3, %p3355_p0 }
   0xd   :  { %3365 = shalt.err (!%p3362_p4)
}
   0xe   :  { %s3517_s27 = smov 1024   ;;  %s3518_s28 = smov 64  }
   0xf   :  { %38 = dma.hbm_to_vmem [thread:$0]  %s3884_s1, 53248, %s33_s25, [#allocation7], %s3517_s27, %s3517_s27, %s3518_s28  }
  0x10   :  { %s3519_s8 = smov [#allocation9]   ;;  %s3520_s10 = smov [#allocation12]  }
  0x11   :  { %s55_s9 = sshll.u32 %s3519_s8, 4  ;;  %s77_s11 = sshll.u32 %s3520_s10, 4  ;;  %s56_s9 = int_to_ptr.vmem [resolvable:$true] %s55_s9  ;;  %s78_s11 = int_to_ptr.vmem [resolvable:$true] %s77_s11 }
  0x12   :  { %s3374_s12 = scalar_lea.vmem %s56_s9, 128  ;;  %p3379_p6 = scmp.lt.s32.totalorder %s56_s9, %s56_s9 }
  0x13   :  { %p3375_p5 = scmp.ne.s32.totalorder %s56_s9, %s3374_s12  ;;  %p3380_p7 = scmp.lt.s32.totalorder %s3374_s12, %s3374_s12 }
  0x15   :  { %p3381_p8 = por %p3380_p7, %p3379_p6 }
  0x17   :  { %p3382_p9 = pnand %p3381_p8, %p3375_p5 }
  0x19   :  { %3385 = shalt.err (!%p3382_p9)
}
  0x1a   :  { %58 = dma.hbm_to_vmem [thread:$0]  %s3886_s3, 128, %s56_s9, [#allocation10]  }
  0x1b   :  { %s3394_s15 = scalar_lea.vmem %s78_s11, 16  ;;  %s3398_s1 = scalar_lea.vmem %s78_s11, 32 }
  0x1c   :  { %p3395_p10 = scmp.ne.s32.totalorder %s78_s11, %s3394_s15  ;;  %p3399_p11 = scmp.lt.s32.totalorder %s78_s11, %s78_s11 }
  0x1d   :  { %p3400_p12 = scmp.lt.s32.totalorder %s3398_s1, %s3394_s15 }
  0x1f   :  { %p3401_p13 = por %p3400_p12, %p3399_p11 }
  0x21   :  { %p3402_p0 = pnand %p3401_p13, %p3395_p10 }
  0x23   :  { %3405 = shalt.err (!%p3402_p0)
}
  0x24   :  { %80 = dma.hbm_to_vmem [thread:$0]  %s3888_s5, 16, %s78_s11, [#allocation13]  }
  0x25   :  { %s3521_s18 = smov [#allocation3]   ;;  %s3522_s20 = smov [#allocation8]  }
  0x26   :  { %s23_s19 = sshll.u32 %s3521_s18, 4  ;;  %s45_s21 = sshll.u32 %s3522_s20, 4  ;;  %s24_s19 = int_to_ptr.vmem [resolvable:$true] %s23_s19  ;;  %s46_s21 = int_to_ptr.vmem [resolvable:$true] %s45_s21 }
  0x27   :  { %s3414_s22 = scalar_lea.vmem %s24_s19, 416  ;;  %p3419_p2 = scmp.lt.s32.totalorder %s24_s19, %s24_s19 }
  0x28   :  { %p3415_p1 = scmp.ne.s32.totalorder %s24_s19, %s3414_s22  ;;  %p3420_p3 = scmp.lt.s32.totalorder %s3414_s22, %s3414_s22 }
  0x2a   :  { %p3421_p4 = por %p3420_p3, %p3419_p2 }
  0x2c   :  { %p3422_p5 = pnand %p3421_p4, %p3415_p1 }
  0x2e   :  { %3425 = shalt.err (!%p3422_p5)
}
  0x2f   :  { %26 = dma.hbm_to_vmem [thread:$0]  %s3883_s0, 416, %s24_s19, [#allocation4]  }
  0x30   :  { %s3434_s24 = scalar_lea.vmem %s46_s21, 128  ;;  %p3439_p7 = scmp.lt.s32.totalorder %s46_s21, %s46_s21 }
  0x31   :  { %p3435_p6 = scmp.ne.s32.totalorder %s46_s21, %s3434_s24  ;;  %p3440_p8 = scmp.lt.s32.totalorder %s3434_s24, %s3434_s24 }
  0x33   :  { %p3441_p9 = por %p3440_p8, %p3439_p7 }
  0x35   :  { %p3442_p10 = pnand %p3441_p9, %p3435_p6 }
  0x37   :  { %3445 = shalt.err (!%p3442_p10)
}
  0x38   :  { %48 = dma.hbm_to_vmem [thread:$0]  %s3885_s2, 128, %s46_s21, [#allocation7]  }
  0x39   :  { %s3523_s26 = smov [#allocation11]  }
  0x3a   :  { %s64_s27 = sshll.u32 %s3523_s26, 4  ;;  %s65_s27 = int_to_ptr.vmem [resolvable:$true] %s64_s27 }
  0x3b   :  { %s3454_s28 = scalar_lea.vmem %s65_s27, 4096  ;;  %p3459_p12 = scmp.lt.s32.totalorder %s65_s27, %s65_s27 }
  0x3c   :  { %p3455_p11 = scmp.ne.s32.totalorder %s65_s27, %s3454_s28  ;;  %p3460_p13 = scmp.lt.s32.totalorder %s3454_s28, %s3454_s28 }
  0x3e   :  { %p3461_p0 = por %p3460_p13, %p3459_p12 }
  0x40   :  { %p3462_p1 = pnand %p3461_p0, %p3455_p11 }
  0x42   :  { %3465 = shalt.err (!%p3462_p1)
}
  0x43   :  { %s3524_s0 = smov 128   ;;  %s3525_s29 = smov 8  }
  0x44   :  { %70 = dma.hbm_to_vmem [thread:$0]  %s3887_s4, 4096, %s65_s27, [#allocation10], %s3524_s0, %s3524_s0, %s3525_s29  }
  0x45   :  { %s3526_s9 = smov [#allocation14]  }
  0x46   :  { %s87_s10 = sshll.u32 %s3526_s9, 4  ;;  %s88_s10 = int_to_ptr.vmem [resolvable:$true] %s87_s10 }
  0x47   :  { %s3474_s2 = scalar_lea.vmem %s88_s10, 16  ;;  %s3478_s11 = scalar_lea.vmem %s88_s10, 32 }
  0x48   :  { %p3475_p2 = scmp.ne.s32.totalorder %s88_s10, %s3474_s2  ;;  %p3479_p3 = scmp.lt.s32.totalorder %s88_s10, %s88_s10 }
  0x49   :  { %p3480_p4 = scmp.lt.s32.totalorder %s3478_s11, %s3474_s2 }
  0x4b   :  { %p3481_p5 = por %p3480_p4, %p3479_p3 }
  0x4d   :  { %p3482_p6 = pnand %p3481_p5, %p3475_p2 }
  0x4f   :  { %3485 = shalt.err (!%p3482_p6)
}
  0x50   :  { %90 = dma.hbm_to_vmem [thread:$0]  %s3889_s6, 16, %s88_s10, [#allocation13]  }
  0x51   :  { %3506 = dma.done.wait [#allocation4], 416  }
  0x52   :  { %3507 = vsyncadd [#allocation4], 4294966880 }
  0x53   :  { %3508 = dma.done.wait [#allocation7], 53376  }
  0x54   :  { %3509 = vsyncadd [#allocation7], 4294913920 }
  0x55   :  { %3510 = dma.done.wait [#allocation10], 4224  }
  0x56   :  { %3511 = vsyncadd [#allocation10], 4294963072 }
  0x57   :  { %3512 = dma.done.wait [#allocation13], 32  }
  0x58   :  { %3513 = vsyncadd [#allocation13], 4294967264  ;;  %v3527_v0 = vmov 0   ;;  %v346_v1 = vld [vmem:[#allocation6 + $0xc8] sm:$0xff]  ;;  %v345_v3 = vld [vmem:[#allocation6 + $0xc0] sm:$0xff]  ;;  %v127_v21 = vlaneseq  ;;  %vm311_vm0 = vcmask 1040384  }
  0x59   :  { %114 = vst [vmem:[#allocation2 + $0x8] sm:$0x1f] %v3527_v0  ;;  %v410_v2 = vld [vmem:[#allocation6 + $0x2c8] sm:$0xff]  ;;  %v786_v4 = vunpack.c.l.s8.bf16 %v346_v1  ;;  %v794_v5 = vunpack.c.h.s8.bf16 %v346_v1  ;;  %v409_v8 = vld [vmem:[#allocation6 + $0x2c0] sm:$0xff]  ;;  %v793_v9 = vunpack.c.h.s8.bf16 %v345_v3  ;;  %v785_v13 = vunpack.c.l.s8.bf16 %v345_v3  ;;  %s3530_s4 = smov [#allocation15]  }
  0x5a   :  { %v914_v6 = vunpack.c.l.s8.bf16 %v410_v2  ;;  %v922_v7 = vunpack.c.h.s8.bf16 %v410_v2  ;;  %v921_v10 = vunpack.c.h.s8.bf16 %v409_v8  ;;  %v338_v11 = vld [vmem:[#allocation6 + $0x88] sm:$0xff]  ;;  %v913_v14 = vunpack.c.l.s8.bf16 %v409_v8  ;;  %v337_v17 = vld [vmem:[#allocation6 + $0x80] sm:$0xff]  ;;  %s3217_s6 = sshll.u32 %s3530_s4, 4  ;;  %s3218_s6 = int_to_ptr.vmem [resolvable:$true] %s3217_s6 }
  0x5b   :  { %v402_v12 = vld [vmem:[#allocation6 + $0x288] sm:$0xff]  ;;  %1674 = vmatprep.subr.bf16.mxu0 %v794_v5  ;;  %v778_v15 = vunpack.c.h.s8.bf16 %v338_v11  ;;  %v401_v18 = vld [vmem:[#allocation6 + $0x280] sm:$0xff]  ;;  %v3528_v19 = vmov 1983009808   ;;  %v777_v22 = vunpack.c.h.s8.bf16 %v337_v17  ;;  %v770_v24 = vunpack.c.l.s8.bf16 %v338_v11  ;;  %s3486_s14 = scalar_lea.vmem %s3218_s6, 32  ;;  %p3491_p8 = scmp.lt.s32.totalorder %s3218_s6, %s3218_s6 }
  0x5c   :  { %1715 = vmatprep.subr.bf16.mxu1 %v922_v7  ;;  %1675 = vmatpush1.bf16.msra.mxu0 %v793_v9  ;;  %v906_v16 = vunpack.c.h.s8.bf16 %v402_v12  ;;  %v125_v20 = vunpack.c.l.s4 %v3528_v19  ;;  %v905_v23 = vunpack.c.h.s8.bf16 %v401_v18  ;;  %v898_v25 = vunpack.c.l.s8.bf16 %v402_v12  ;;  %v330_v28 = vld [vmem:[#allocation6 + $0x48] sm:$0xff]  ;;  %v329_v36 = vld [vmem:[#allocation6 + $0x40] sm:$0xff]  ;;  %p3487_p7 = scmp.ne.s32.totalorder %s3218_s6, %s3486_s14  ;;  %p3492_p9 = scmp.lt.s32.totalorder %s3486_s14, %s3486_s14 }
  0x5d   :  { %1716 = vmatpush1.bf16.msra.mxu1 %v921_v10  ;;  %1676 = vmatprep.subr.bf16.mxu0 %v786_v4  ;;  %v3593_v27 = vshrl.u32 %v127_v21, 7  ;;  %v394_v29 = vld [vmem:[#allocation6 + $0x248] sm:$0xff]  ;;  %v3529_v30 = vmov 1966171168   ;;  %v769_v32 = vunpack.c.l.s8.bf16 %v337_v17  ;;  %v897_v33 = vunpack.c.l.s8.bf16 %v401_v18  ;;  %v393_v37 = vld [vmem:[#allocation6 + $0x240] sm:$0xff] }
  0x5e   :  { %1717 = vmatprep.subr.bf16.mxu1 %v914_v6  ;;  %v126_v26 = vunpack.c.0.s8 %v125_v20  ;;  %v225_v31 = vunpack.c.l.s4 %v3529_v30  ;;  %v762_v34 = vunpack.c.h.s8.bf16 %v330_v28  ;;  %v890_v35 = vunpack.c.h.s8.bf16 %v394_v29  ;;  %v115_v39 = vld [vmem:[#allocation3] sm:$0xff]  ;;  %v116_v40 = vld [vmem:[#allocation3 + $0x8] sm:$0xff]  ;;  %p3493_p10 = por %p3492_p9, %p3491_p8 }
  0x5f   :  { %v761_v42 = vunpack.c.h.s8.bf16 %v329_v36  ;;  %v889_v43 = vunpack.c.h.s8.bf16 %v393_v37  ;;  %v754_v44 = vunpack.c.l.s8.bf16 %v330_v28  ;;  %v882_v45 = vunpack.c.l.s8.bf16 %v394_v29  ;;  %v322_v46 = vld [vmem:[#allocation6 + $0x8] sm:$0xff]  ;;  %v321_v61 = vld [vmem:[#allocation6] sm:$0xff] }
  0x60   :  { %1677 = vmatpush1.bf16.msra.mxu0 %v785_v13  ;;  %v3596_v38 = vsub.s32 %v126_v26, %v3593_v27  ;;  %v226_v41 = vunpack.c.0.s8 %v225_v31  ;;  %v123_v47 = vcombine.high %v115_v39, %v115_v39  ;;  %v140_v49 = vcombine.high %v116_v40, %v116_v40  ;;  %v386_v50 = vld [vmem:[#allocation6 + $0x208] sm:$0xff]  ;;  %v385_v62 = vld [vmem:[#allocation6 + $0x200] sm:$0xff]  ;;  %p3494_p11 = pnand %p3493_p10, %p3487_p7 }
  0x61   :  { %1718 = vmatpush1.bf16.msra.mxu1 %v913_v14  ;;  %1678 = vmatprep.subr.bf16.mxu0 %v778_v15  ;;  %v753_v56 = vunpack.c.l.s8.bf16 %v329_v36  ;;  %v881_v57 = vunpack.c.l.s8.bf16 %v393_v37  ;;  %v746_v58 = vunpack.c.h.s8.bf16 %v322_v46  ;;  %v874_v60 = vunpack.c.h.s8.bf16 %v386_v50  ;;  %v378_v14 = vld [vmem:[#allocation6 + $0x1c8] sm:$0xff] }
  0x62   :  { %1719 = vmatprep.subr.bf16.mxu1 %v906_v16  ;;  %v130_v48 = vrot.slane %v115_v39, %v3596_v38  ;;  %v147_v51 = vrot.slane %v116_v40, %v3596_v38  ;;  %v137_v52 = vrot.slane %v123_v47, %v3596_v38  ;;  %v154_v54 = vrot.slane %v140_v49, %v3596_v38  ;;  %v442_v15 = vld [vmem:[#allocation6 + $0x3c8] sm:$0xff] }
  0x63   :  { %v3603_v55 = vsub.s32 %v226_v41, %v3593_v27  ;;  %v745_v7 = vunpack.c.h.s8.bf16 %v321_v61  ;;  %v873_v8 = vunpack.c.h.s8.bf16 %v385_v62  ;;  %v738_v10 = vunpack.c.l.s8.bf16 %v322_v46  ;;  %v369_v41 = vld [vmem:[#allocation6 + $0x180] sm:$0xff]  ;;  %v362_v49 = vld [vmem:[#allocation6 + $0x148] sm:$0xff] }
  0x64   :  { %1679 = vmatpush1.bf16.msra.mxu0 %v777_v22  ;;  %v138_v53 = vcombine.high %v130_v48, %v130_v48  ;;  %v155_v59 = vcombine.high %v147_v51, %v147_v51  ;;  %v139_v63 = vcombine.high %v137_v52, %v137_v52  ;;  %v156_v1 = vcombine.high %v154_v54, %v154_v54  ;;  %v377_v22 = vld [vmem:[#allocation6 + $0x1c0] sm:$0xff] }
  0x65   :  { %1720 = vmatpush1.bf16.msra.mxu1 %v905_v23  ;;  %1680 = vmatprep.subr.bf16.mxu0 %v770_v24  ;;  %v866_v11 = vunpack.c.l.s8.bf16 %v386_v50  ;;  %v737_v18 = vunpack.c.l.s8.bf16 %v321_v61  ;;  %v865_v19 = vunpack.c.l.s8.bf16 %v385_v62  ;;  %v858_v20 = vunpack.c.h.s8.bf16 %v378_v14  ;;  %v441_v23 = vld [vmem:[#allocation6 + $0x3c0] sm:$0xff]  ;;  %v426_v50 = vld [vmem:[#allocation6 + $0x348] sm:$0xff] }
  0x66   :  { %1721 = vmatprep.subr.bf16.mxu1 %v898_v25  ;;  %v3230_v2 = vpack.c.bf16 %v138_v53, %v130_v48  ;;  %v3232_v3 = vpack.c.bf16 %v155_v59, %v147_v51  ;;  %v3231_v4 = vpack.c.bf16 %v139_v63, %v137_v52  ;;  %v3233_v5 = vpack.c.bf16 %v156_v1, %v154_v54  ;;  %v354_v62 = vld [vmem:[#allocation6 + $0x108] sm:$0xff] }
  0x67   :  { %v986_v21 = vunpack.c.h.s8.bf16 %v442_v15  ;;  %v857_v28 = vunpack.c.h.s8.bf16 %v377_v22  ;;  %v985_v29 = vunpack.c.h.s8.bf16 %v441_v23  ;;  %v850_v30 = vunpack.c.l.s8.bf16 %v378_v14  ;;  %v418_v63 = vld [vmem:[#allocation6 + $0x308] sm:$0xff] }
  0x68   :  { %1681 = vmatpush1.bf16.msra.mxu0 %v769_v32  ;;  %v230_v6 = vrot.slane %v3230_v2, %v3603_v55  ;;  %v244_v9 = vrot.slane %v3232_v3, %v3603_v55  ;;  %v237_v12 = vrot.slane %v3231_v4, %v3603_v55  ;;  %v251_v13 = vrot.slane %v3233_v5, %v3603_v55 }
  0x69   :  { %1722 = vmatpush1.bf16.msra.mxu1 %v897_v33  ;;  %1682 = vmatprep.subr.bf16.mxu0 %v762_v34  ;;  %v978_v31 = vunpack.c.l.s8.bf16 %v442_v15  ;;  %v370_v33 = vld [vmem:[#allocation6 + $0x188] sm:$0xff]  ;;  %v849_v36 = vunpack.c.l.s8.bf16 %v377_v22  ;;  %v977_v37 = vunpack.c.l.s8.bf16 %v441_v23  ;;  %v833_v51 = vunpack.c.l.s8.bf16 %v369_v41 }
  0x6a   :  { %1723 = vmatprep.subr.bf16.mxu1 %v890_v35  ;;  %v252_v16 = vcombine.low %v230_v6, %v237_v12  ;;  %v253_v17 = vcombine.low %v244_v9, %v251_v13  ;;  %v434_v34 = vld [vmem:[#allocation6 + $0x388] sm:$0xff]  ;;  %v842_v39 = vunpack.c.h.s8.bf16 %v370_v33  ;;  %v834_v47 = vunpack.c.l.s8.bf16 %v370_v33  ;;  %v353_v6 = vld [vmem:[#allocation6 + $0x100] sm:$0xff] }
  0x6b   :  { %v970_v40 = vunpack.c.h.s8.bf16 %v434_v34  ;;  %v962_v48 = vunpack.c.l.s8.bf16 %v434_v34  ;;  %v826_v53 = vunpack.c.h.s8.bf16 %v362_v49  ;;  %v954_v54 = vunpack.c.h.s8.bf16 %v426_v50 }
  0x6c   :  { %1683 = vmatpush1.bf16.msra.mxu0 %v761_v42  ;;  %v260_v24 = vrot.slane %v252_v16, %v3603_v55  ;;  %v3611_v25 = vrot.slane %v253_v17, %v3603_v55  ;;  %v433_v42 = vld [vmem:[#allocation6 + $0x380] sm:$0xff]  ;;  %v946_v61 = vunpack.c.l.s8.bf16 %v426_v50  ;;  %v810_v4 = vunpack.c.h.s8.bf16 %v354_v62  ;;  %v474_v17 = vld [vmem:[#allocation6 + $0x4c8] sm:$0xff] }
  0x6d   :  { %1724 = vmatpush1.bf16.msra.mxu1 %v889_v43  ;;  %1684 = vmatprep.subr.bf16.mxu0 %v754_v44  ;;  %v969_v46 = vunpack.c.h.s8.bf16 %v433_v42  ;;  %v961_v52 = vunpack.c.l.s8.bf16 %v433_v42  ;;  %v938_v5 = vunpack.c.h.s8.bf16 %v418_v63  ;;  %v802_v15 = vunpack.c.l.s8.bf16 %v354_v62 }
  0x6e   :  { %1725 = vmatprep.subr.bf16.mxu1 %v882_v45  ;;  %v268_v26 = vcombine.low %v260_v24, %v3611_v25  ;;  %v841_v45 = vunpack.c.h.s8.bf16 %v369_v41  ;;  %v3345_v1 = vcombine.low %v3611_v25, %v3611_v25  ;;  %v930_v16 = vunpack.c.l.s8.bf16 %v418_v63 }
  0x6f   :  { %vm312_vm1 = vcmask 1041409   ;;  %v801_v23 = vunpack.c.l.s8.bf16 %v353_v6  ;;  %vm314_vm3 = vcmask 1042434   ;;  %vm316_vm5 = vcmask 1043459  }
  0x70   :  { %1685 = vmatpush1.bf16.msra.mxu0 %v753_v56  ;;  %v3615_v32 = vrot.slane %v268_v26, %v3603_v55  ;;  %v361_v56 = vld [vmem:[#allocation6 + $0x140] sm:$0xff]  ;;  %v3631_v9 = vrot.slane %v3345_v1, %v3603_v55  ;;  %vm313_vm2 = vmor %vm312_vm1, %vm311_vm0  ;;  %v1042_v42 = vunpack.c.l.s8.bf16 %v474_v17  ;;  %vm318_vm7 = vcmask 757764  }
  0x71   :  { %1726 = vmatpush1.bf16.msra.mxu1 %v881_v57  ;;  %1686 = vmatprep.subr.bf16.mxu0 %v746_v58  ;;  %v425_v57 = vld [vmem:[#allocation6 + $0x340] sm:$0xff]  ;;  %v825_v58 = vunpack.c.h.s8.bf16 %v361_v56  ;;  %v817_v2 = vunpack.c.l.s8.bf16 %v361_v56  ;;  %vm3651_vm4 = vmor %vm314_vm3, %vm313_vm2 }
  0x72   :  { %1727 = vmatprep.subr.bf16.mxu1 %v874_v60  ;;  %v1588_v35 = vcombine.high %v3615_v32, %v3615_v32  ;;  %v953_v59 = vunpack.c.h.s8.bf16 %v425_v57  ;;  %v818_v60 = vunpack.c.l.s8.bf16 %v362_v49  ;;  %v945_v3 = vunpack.c.l.s8.bf16 %v425_v57  ;;  %vm3664_vm6 = vmor %vm316_vm5, %vm3651_vm4 }
  0x73   :  { %v3639_v24 = vrot.slane %v3615_v32, %v3603_v55  ;;  %vm319_vm8 = vmor %vm318_vm7, %vm3664_vm6 }
  0x74   :  { %1687 = vmatpush1.bf16.msra.mxu0 %v745_v7  ;;  %v3620_v43 = vrot.slane %v1588_v35, %v3603_v55  ;;  %v417_v7 = vld [vmem:[#allocation6 + $0x300] sm:$0xff] }
  0x75   :  { %1728 = vmatpush1.bf16.msra.mxu1 %v873_v8  ;;  %1688 = vmatprep.subr.bf16.mxu0 %v738_v10  ;;  %v117_v8 = vld [vmem:[#allocation3 + $0x10] sm:$0xff]  ;;  %v3229_v10 = vld.sshfl [vmem:[#allocation3 + $0x18] sm:$0x3 pattern:$0x76325410]  ;;  %v937_v12 = vunpack.c.h.s8.bf16 %v417_v7  ;;  %v929_v25 = vunpack.c.l.s8.bf16 %v417_v7 }
  0x76   :  { %1729 = vmatprep.subr.bf16.mxu1 %v866_v11  ;;  %1706 = vmatprep.mubr.bf16.mxu0 %v3620_v43  ;;  %v3625_v44 = vcombine.high %v3620_v43, %v3620_v43  ;;  %v809_v11 = vunpack.c.h.s8.bf16 %v353_v6  ;;  %v157_v13 = vcombine.high %v117_v8, %v117_v8  ;;  %v164_v14 = vrot.slane %v117_v8, %v3596_v38  ;;  %v457_v8 = vld [vmem:[#allocation6 + $0x440] sm:$0xff] }
  0x77   :  { %v206_v22 = vpack.c.bf16 %v3229_v10, %v3229_v10  ;;  %v521_v10 = vld [vmem:[#allocation6 + $0x640] sm:$0xff] }
  0x78   :  { %1689 = vmatpush1.bf16.msra.mxu0 %v737_v18  ;;  %1747 = vmatprep.mubr.bf16.mxu1 %v3625_v44  ;;  %v538_v18 = vld [vmem:[#allocation6 + $0x6c8] sm:$0xff] }
  0x79   :  { %1730 = vmatpush1.bf16.msra.mxu1 %v865_v19  ;;  %1690 = vmatprep.subr.bf16.mxu0 %v858_v20  ;;  %v1589_v19 = vcombine.high %v3631_v9, %v3631_v9  ;;  %v171_v20 = vrot.slane %v157_v13, %v3596_v38  ;;  %v473_v38 = vld [vmem:[#allocation6 + $0x4c0] sm:$0xff]  ;;  %v291_v35 = vrot.slane %v206_v22, %v3603_v55 }
  0x7a   :  { %1731 = vmatprep.subr.bf16.mxu1 %v986_v21  ;;  %v172_v21 = vcombine.high %v164_v14, %v164_v14  ;;  %v513_v22 = vld [vmem:[#allocation6 + $0x600] sm:$0xff] }
  0x7b   :  { %v173_v26 = vcombine.high %v171_v20, %v171_v20  ;;  %v3643_v33 = vrot.slane %v1589_v19, %v3603_v55  ;;  %v306_v50 = vrot.slane %v291_v35, %v3603_v55  ;;  %v505_v35 = vld [vmem:[#allocation6 + $0x5c0] sm:$0xff] }
  0x7c   :  { %1691 = vmatpush2.bf16.msra.mxu0 %v857_v28  ;;  %v3234_v28 = vpack.c.bf16 %v172_v21, %v164_v14  ;;  %v449_v21 = vld [vmem:[#allocation6 + $0x400] sm:$0xff] }
  0x7d   :  { %1732 = vmatpush2.bf16.msra.mxu1 %v985_v29  ;;  %1692 = vmatprep.subr.bf16.mxu0 %v850_v30  ;;  %v1050_v29 = vunpack.c.h.s8.bf16 %v474_v17  ;;  %v1178_v30 = vunpack.c.h.s8.bf16 %v538_v18  ;;  %v3235_v34 = vpack.c.bf16 %v173_v26, %v171_v20  ;;  %v1009_v17 = vunpack.c.l.s8.bf16 %v457_v8 }
  0x7e   :  { %1733 = vmatprep.subr.bf16.mxu1 %v978_v31  ;;  %v537_v31 = vld [vmem:[#allocation6 + $0x6c0] sm:$0xff]  ;;  %v277_v32 = vrot.slane %v3234_v28, %v3603_v55 }
  0x7f   :  { %v284_v41 = vrot.slane %v3235_v34, %v3603_v55 }
  0x80   :  { %1693 = vmatpush2.bf16.msra.mxu0 %v849_v36  ;;  %v3649_v36 = vcombine.high %v3639_v24, %v3639_v24 }
  0x81   :  { %1734 = vmatpush2.bf16.msra.mxu1 %v977_v37  ;;  %1694 = vmatprep.subr.bf16.mxu0 %v842_v39  ;;  %v1049_v39 = vunpack.c.h.s8.bf16 %v473_v38  ;;  %v292_v49 = vcombine.low %v277_v32, %v284_v41  ;;  %v569_v37 = vld [vmem:[#allocation6 + $0x7c0] sm:$0xff] }
  0x82   :  { %1735 = vmatprep.subr.bf16.mxu1 %v970_v40  ;;  %v1177_v40 = vunpack.c.h.s8.bf16 %v537_v31 }
  0x84   :  { %1695 = vmatpush2.bf16.msra.mxu0 %v841_v45  ;;  %v1170_v45 = vunpack.c.l.s8.bf16 %v538_v18  ;;  %v1137_v18 = vunpack.c.l.s8.bf16 %v521_v10 }
  0x85   :  { %1736 = vmatpush2.bf16.msra.mxu1 %v969_v46  ;;  %1696 = vmatprep.subr.bf16.mxu0 %v834_v47  ;;  %v466_v46 = vld [vmem:[#allocation6 + $0x488] sm:$0xff] }
  0x86   :  { %1737 = vmatprep.subr.bf16.mxu1 %v962_v48  ;;  %v530_v47 = vld [vmem:[#allocation6 + $0x688] sm:$0xff]  ;;  %v3658_v48 = vcombine.high %v3643_v33, %v3643_v33  ;;  %v1034_v56 = vunpack.c.h.s8.bf16 %v466_v46  ;;  %v1026_v63 = vunpack.c.l.s8.bf16 %v466_v46 }
  0x87   :  { %v1162_v57 = vunpack.c.h.s8.bf16 %v530_v47  ;;  %v1154_v1 = vunpack.c.l.s8.bf16 %v530_v47  ;;  %v562_v46 = vld [vmem:[#allocation6 + $0x788] sm:$0xff]  ;;  %v1105_v47 = vunpack.c.l.s8.bf16 %v505_v35 }
  0x88   :  { %1697 = vmatpush2.bf16.msra.mxu0 %v833_v51  ;;  %v1226_v51 = vunpack.c.h.s8.bf16 %v562_v46 }
  0x89   :  { %1738 = vmatpush2.bf16.msra.mxu1 %v961_v52  ;;  %1698 = vmatprep.subr.bf16.mxu0 %v826_v53  ;;  %v1041_v52 = vunpack.c.l.s8.bf16 %v473_v38  ;;  %v1169_v53 = vunpack.c.l.s8.bf16 %v537_v31  ;;  %v993_v38 = vunpack.c.l.s8.bf16 %v449_v21  ;;  %v1121_v31 = vunpack.c.l.s8.bf16 %v513_v22 }
  0x8a   :  { %1739 = vmatprep.subr.bf16.mxu1 %v954_v54  ;;  %v299_v54 = vrot.slane %v292_v49, %v3603_v55  ;;  %v1233_v49 = vunpack.c.l.s8.bf16 %v569_v37 }
  0x8c   :  { %1699 = vmatpush2.bf16.msra.mxu0 %v825_v58  ;;  %v465_v58 = vld [vmem:[#allocation6 + $0x480] sm:$0xff] }
  0x8d   :  { %1740 = vmatpush2.bf16.msra.mxu1 %v953_v59  ;;  %1700 = vmatprep.subr.bf16.mxu0 %v818_v60  ;;  %v529_v59 = vld [vmem:[#allocation6 + $0x680] sm:$0xff]  ;;  %v307_v60 = vcombine.low %v299_v54, %v306_v50 }
  0x8e   :  { %1741 = vmatprep.subr.bf16.mxu1 %v946_v61  ;;  %v1033_v61 = vunpack.c.h.s8.bf16 %v465_v58  ;;  %v1161_v62 = vunpack.c.h.s8.bf16 %v529_v59 }
  0x8f   :  { %320 = vst.msk [vmem:[#allocation2 + $0x8] sm:$0x1f] %vm319_vm8, %v307_v60  ;;  %v554_v60 = vld [vmem:[#allocation6 + $0x748] sm:$0xff] }
  0x90   :  { %1701 = vmatpush2.bf16.msra.mxu0 %v817_v2  ;;  %v458_v2 = vld [vmem:[#allocation6 + $0x448] sm:$0xff] }
  0x91   :  { %1742 = vmatpush2.bf16.msra.mxu1 %v945_v3  ;;  %1702 = vmatprep.subr.bf16.mxu0 %v810_v4  ;;  %v522_v3 = vld [vmem:[#allocation6 + $0x648] sm:$0xff]  ;;  %v1025_v4 = vunpack.c.l.s8.bf16 %v465_v58  ;;  %v1018_v6 = vunpack.c.h.s8.bf16 %v458_v2  ;;  %v1010_v13 = vunpack.c.l.s8.bf16 %v458_v2  ;;  %v1218_v58 = vunpack.c.l.s8.bf16 %v562_v46  ;;  %v489_v2 = vld [vmem:[#allocation6 + $0x540] sm:$0xff] }
  0x92   :  { %1743 = vmatprep.subr.bf16.mxu1 %v938_v5  ;;  %v1153_v5 = vunpack.c.l.s8.bf16 %v529_v59  ;;  %v1146_v7 = vunpack.c.h.s8.bf16 %v522_v3  ;;  %v1138_v14 = vunpack.c.l.s8.bf16 %v522_v3  ;;  %v490_v59 = vld [vmem:[#allocation6 + $0x548] sm:$0xff]  ;;  %v553_v3 = vld [vmem:[#allocation6 + $0x740] sm:$0xff] }
  0x94   :  { %1703 = vmatpush2.bf16.msra.mxu0 %v809_v11  ;;  %v1017_v11 = vunpack.c.h.s8.bf16 %v457_v8  ;;  %v482_v8 = vld [vmem:[#allocation6 + $0x508] sm:$0xff] }
  0x95   :  { %1744 = vmatpush2.bf16.msra.mxu1 %v937_v12  ;;  %1704 = vmatprep.subr.bf16.mxu0 %v802_v15  ;;  %v1145_v12 = vunpack.c.h.s8.bf16 %v521_v10  ;;  %v450_v15 = vld [vmem:[#allocation6 + $0x408] sm:$0xff] }
  0x96   :  { %1745 = vmatprep.subr.bf16.mxu1 %v930_v16  ;;  %v514_v16 = vld [vmem:[#allocation6 + $0x608] sm:$0xff]  ;;  %v1002_v19 = vunpack.c.h.s8.bf16 %v450_v15  ;;  %v994_v26 = vunpack.c.l.s8.bf16 %v450_v15 }
  0x97   :  { %v1130_v20 = vunpack.c.h.s8.bf16 %v514_v16  ;;  %v1122_v28 = vunpack.c.l.s8.bf16 %v514_v16  ;;  %v546_v10 = vld [vmem:[#allocation6 + $0x708] sm:$0xff]  ;;  %v481_v16 = vld [vmem:[#allocation6 + $0x500] sm:$0xff] }
  0x98   :  { %1705 = vmatpush2.bf16.msra.mxu0 %v801_v23  ;;  %v1001_v23 = vunpack.c.h.s8.bf16 %v449_v21  ;;  %v1194_v15 = vunpack.c.h.s8.bf16 %v546_v10  ;;  %v1058_v21 = vunpack.c.l.s8.bf16 %v482_v8 }
  0x99   :  { %1746 = vmatpush2.bf16.msra.mxu1 %v929_v25  ;;  %1756 = vmatprep.subr.bf16.mxu0 %v1050_v29  ;;  %v1129_v25 = vunpack.c.h.s8.bf16 %v513_v22  ;;  %v506_v29 = vld [vmem:[#allocation6 + $0x5c8] sm:$0xff]  ;;  %v1186_v22 = vunpack.c.l.s8.bf16 %v546_v10 }
  0x9a   :  { %1797 = vmatprep.subr.bf16.mxu1 %v1178_v30  ;;  %v570_v30 = vld [vmem:[#allocation6 + $0x7c8] sm:$0xff]  ;;  %v1114_v34 = vunpack.c.h.s8.bf16 %v506_v29  ;;  %v1106_v41 = vunpack.c.l.s8.bf16 %v506_v29  ;;  %v1057_v29 = vunpack.c.l.s8.bf16 %v481_v16 }
  0x9b   :  { %1707 = vmatmul.mubr.bf16.vlgmr.msra.gmra.mxu0 %v3639_v24  ;;  %v1242_v32 = vunpack.c.h.s8.bf16 %v570_v30  ;;  %v642_v10 = vld [vmem:[#allocation6 + $0xa08] sm:$0xff] }
  0x9c   :  { %1748 = vmatmul.mubr.bf16.vlgmr.msra.gmra.mxu1 %v3649_v36  ;;  %1757 = vmatpush1.bf16.msra.mxu0 %v1049_v39  ;;  %v1113_v39 = vunpack.c.h.s8.bf16 %v505_v35 }
  0x9d   :  { %1798 = vmatpush1.bf16.msra.mxu1 %v1177_v40  ;;  %1758 = vmatprep.subr.bf16.mxu0 %v1042_v42  ;;  %v1241_v40 = vunpack.c.h.s8.bf16 %v569_v37  ;;  %v1234_v42 = vunpack.c.l.s8.bf16 %v570_v30 }
  0x9e   :  { %1799 = vmatprep.subr.bf16.mxu1 %v1170_v45  ;;  %1788 = vmatprep.mubr.bf16.mxu0 %v3643_v33  ;;  %v498_v45 = vld [vmem:[#allocation6 + $0x588] sm:$0xff] }
  0x9f   :  { %1829 = vmatprep.mubr.bf16.mxu1 %v3658_v48  ;;  %v1098_v50 = vunpack.c.h.s8.bf16 %v498_v45 }
  0xa0   :  { %1759 = vmatpush1.bf16.msra.mxu0 %v1041_v52  ;;  %v497_v52 = vld [vmem:[#allocation6 + $0x580] sm:$0xff] }
  0xa1   :  { %1800 = vmatpush1.bf16.msra.mxu1 %v1169_v53  ;;  %1760 = vmatprep.subr.bf16.mxu0 %v1034_v56  ;;  %v561_v53 = vld [vmem:[#allocation6 + $0x780] sm:$0xff]  ;;  %v1097_v54 = vunpack.c.h.s8.bf16 %v497_v52 }
  0xa2   :  { %1801 = vmatprep.subr.bf16.mxu1 %v1162_v57  ;;  %v1225_v56 = vunpack.c.h.s8.bf16 %v561_v53  ;;  %v1090_v57 = vunpack.c.l.s8.bf16 %v498_v45  ;;  %v658_v45 = vld [vmem:[#allocation6 + $0xa88] sm:$0xff] }
  0xa4   :  { %1761 = vmatpush1.bf16.msra.mxu0 %v1033_v61  ;;  %v1089_v61 = vunpack.c.l.s8.bf16 %v497_v52  ;;  %v593_v52 = vld [vmem:[#allocation6 + $0x880] sm:$0xff] }
  0xa5   :  { %1802 = vmatpush1.bf16.msra.mxu1 %v1161_v62  ;;  %1762 = vmatprep.subr.bf16.mxu0 %v1026_v63  ;;  %v1217_v62 = vunpack.c.l.s8.bf16 %v561_v53  ;;  %v1082_v63 = vunpack.c.h.s8.bf16 %v490_v59  ;;  %v657_v53 = vld [vmem:[#allocation6 + $0xa80] sm:$0xff] }
  0xa6   :  { %1803 = vmatprep.subr.bf16.mxu1 %v1154_v1  ;;  %v1210_v1 = vunpack.c.h.s8.bf16 %v554_v60 }
  0xa8   :  { %1763 = vmatpush1.bf16.msra.mxu0 %v1025_v4  ;;  %v1081_v4 = vunpack.c.h.s8.bf16 %v489_v2 }
  0xa9   :  { %1804 = vmatpush1.bf16.msra.mxu1 %v1153_v5  ;;  %1764 = vmatprep.subr.bf16.mxu0 %v1018_v6  ;;  %v1209_v5 = vunpack.c.h.s8.bf16 %v553_v3  ;;  %v1074_v6 = vunpack.c.l.s8.bf16 %v490_v59  ;;  %v586_v59 = vld [vmem:[#allocation6 + $0x848] sm:$0xff] }
  0xaa   :  { %1805 = vmatprep.subr.bf16.mxu1 %v1146_v7  ;;  %v1202_v7 = vunpack.c.l.s8.bf16 %v554_v60  ;;  %v650_v60 = vld [vmem:[#allocation6 + $0xa48] sm:$0xff] }
  0xac   :  { %1765 = vmatpush1.bf16.msra.mxu0 %v1017_v11  ;;  %v3675_v11 = vld [vmem:[#allocation2 + $0x8] sm:$0x1f] }
  0xad   :  { %1806 = vmatpush1.bf16.msra.mxu1 %v1145_v12  ;;  %1766 = vmatprep.subr.bf16.mxu0 %v1010_v13  ;;  %v1073_v12 = vunpack.c.l.s8.bf16 %v489_v2  ;;  %v1201_v13 = vunpack.c.l.s8.bf16 %v553_v3  ;;  %v585_v2 = vld [vmem:[#allocation6 + $0x840] sm:$0xff] }
  0xae   :  { %1807 = vmatprep.subr.bf16.mxu1 %v1138_v14  ;;  %v1066_v14 = vunpack.c.h.s8.bf16 %v482_v8  ;;  %v649_v3 = vld [vmem:[#allocation6 + $0xa40] sm:$0xff]  ;;  %v578_v8 = vld [vmem:[#allocation6 + $0x808] sm:$0xff] }
  0xb0   :  { %1767 = vmatpush1.bf16.msra.mxu0 %v1009_v17  ;;  %v545_v17 = vld [vmem:[#allocation6 + $0x700] sm:$0xff] }
  0xb1   :  { %1808 = vmatpush1.bf16.msra.mxu1 %v1137_v18  ;;  %1768 = vmatprep.subr.bf16.mxu0 %v1002_v19  ;;  %v3679_v18 = vrot.slane %v3675_v11, %v3603_v55  ;;  %v1065_v19 = vunpack.c.h.s8.bf16 %v481_v16  ;;  %v1185_v30 = vunpack.c.l.s8.bf16 %v545_v17  ;;  %v577_v16 = vld [vmem:[#allocation6 + $0x800] sm:$0xff] }
  0xb2   :  { %1809 = vmatprep.subr.bf16.mxu1 %v1130_v20  ;;  %v1193_v20 = vunpack.c.h.s8.bf16 %v545_v17  ;;  %v641_v17 = vld [vmem:[#allocation6 + $0xa00] sm:$0xff] }
  0xb4   :  { %1769 = vmatpush1.bf16.msra.mxu0 %v1001_v23  ;;  %v602_v23 = vld [vmem:[#allocation6 + $0x8c8] sm:$0xff] }
  0xb5   :  { %1810 = vmatpush1.bf16.msra.mxu1 %v1129_v25  ;;  %1770 = vmatprep.subr.bf16.mxu0 %v994_v26  ;;  %v666_v25 = vld [vmem:[#allocation6 + $0xac8] sm:$0xff]  ;;  %v1637_v26 = vcombine.high %v3679_v18, %v3679_v18 }
  0xb6   :  { %1811 = vmatprep.subr.bf16.mxu1 %v1122_v28  ;;  %v3685_v28 = vrot.slane %v3631_v9, %v3603_v55 }
  0xb7   :  { %v3688_v35 = vrot.slane %v1637_v26, %v3603_v55  ;;  %v1249_v26 = vunpack.c.l.s8.bf16 %v577_v16 }
  0xb8   :  { %1771 = vmatpush1.bf16.msra.mxu0 %v993_v38  ;;  %v1306_v38 = vunpack.c.h.s8.bf16 %v602_v23  ;;  %v3692_v37 = vcombine.high %v3685_v28, %v3685_v28 }
  0xb9   :  { %1812 = vmatpush1.bf16.msra.mxu1 %v1121_v31  ;;  %1772 = vmatprep.subr.bf16.mxu0 %v1114_v34  ;;  %v1434_v31 = vunpack.c.h.s8.bf16 %v666_v25  ;;  %v601_v34 = vld [vmem:[#allocation6 + $0x8c0] sm:$0xff]  ;;  %v3696_v46 = vcombine.high %v3688_v35, %v3688_v35 }
  0xba   :  { %1813 = vmatprep.subr.bf16.mxu1 %v1242_v32  ;;  %v665_v32 = vld [vmem:[#allocation6 + $0xac0] sm:$0xff]  ;;  %v1305_v9 = vunpack.c.h.s8.bf16 %v601_v34 }
  0xbc   :  { %1773 = vmatpush2.bf16.msra.mxu0 %v1113_v39  ;;  %v1433_v39 = vunpack.c.h.s8.bf16 %v665_v32 }
  0xbd   :  { %1814 = vmatpush2.bf16.msra.mxu1 %v1241_v40  ;;  %1774 = vmatprep.subr.bf16.mxu0 %v1106_v41  ;;  %v1298_v40 = vunpack.c.l.s8.bf16 %v602_v23  ;;  %v1426_v41 = vunpack.c.l.s8.bf16 %v666_v25  ;;  %v634_v23 = vld [vmem:[#allocation6 + $0x9c8] sm:$0xff] }
  0xbe   :  { %1815 = vmatprep.subr.bf16.mxu1 %v1234_v42  ;;  %v594_v42 = vld [vmem:[#allocation6 + $0x888] sm:$0xff] }
  0xbf   :  { %v698_v25 = vld [vmem:[#allocation6 + $0xbc8] sm:$0xff] }
  0xc0   :  { %1775 = vmatpush2.bf16.msra.mxu0 %v1105_v47  ;;  %v1297_v47 = vunpack.c.l.s8.bf16 %v601_v34  ;;  %v697_v34 = vld [vmem:[#allocation6 + $0xbc0] sm:$0xff] }
  0xc1   :  { %1816 = vmatpush2.bf16.msra.mxu1 %v1233_v49  ;;  %1776 = vmatprep.subr.bf16.mxu0 %v1098_v50  ;;  %v1425_v49 = vunpack.c.l.s8.bf16 %v665_v32  ;;  %v1290_v50 = vunpack.c.h.s8.bf16 %v594_v42 }
  0xc2   :  { %1817 = vmatprep.subr.bf16.mxu1 %v1226_v51  ;;  %v1418_v51 = vunpack.c.h.s8.bf16 %v658_v45 }
  0xc4   :  { %1777 = vmatpush2.bf16.msra.mxu0 %v1097_v54  ;;  %v1289_v54 = vunpack.c.h.s8.bf16 %v593_v52 }
  0xc5   :  { %1818 = vmatpush2.bf16.msra.mxu1 %v1225_v56  ;;  %1778 = vmatprep.subr.bf16.mxu0 %v1090_v57  ;;  %v1417_v56 = vunpack.c.h.s8.bf16 %v657_v53  ;;  %v1282_v57 = vunpack.c.l.s8.bf16 %v594_v42  ;;  %v690_v42 = vld [vmem:[#allocation6 + $0xb88] sm:$0xff] }
  0xc6   :  { %1819 = vmatprep.subr.bf16.mxu1 %v1218_v58  ;;  %v1410_v58 = vunpack.c.l.s8.bf16 %v658_v45 }
  0xc8   :  { %1779 = vmatpush2.bf16.msra.mxu0 %v1089_v61  ;;  %v1281_v61 = vunpack.c.l.s8.bf16 %v593_v52  ;;  %v689_v52 = vld [vmem:[#allocation6 + $0xb80] sm:$0xff] }
  0xc9   :  { %1820 = vmatpush2.bf16.msra.mxu1 %v1217_v62  ;;  %1780 = vmatprep.subr.bf16.mxu0 %v1082_v63  ;;  %v1409_v62 = vunpack.c.l.s8.bf16 %v657_v53  ;;  %v1274_v63 = vunpack.c.h.s8.bf16 %v586_v59 }
  0xca   :  { %1821 = vmatprep.subr.bf16.mxu1 %v1210_v1  ;;  %v1402_v1 = vunpack.c.h.s8.bf16 %v650_v60 }
  0xcc   :  { %1781 = vmatpush2.bf16.msra.mxu0 %v1081_v4  ;;  %v1273_v4 = vunpack.c.h.s8.bf16 %v585_v2 }
  0xcd   :  { %1822 = vmatpush2.bf16.msra.mxu1 %v1209_v5  ;;  %1782 = vmatprep.subr.bf16.mxu0 %v1074_v6  ;;  %v1401_v5 = vunpack.c.h.s8.bf16 %v649_v3  ;;  %v1266_v6 = vunpack.c.l.s8.bf16 %v586_v59  ;;  %v682_v59 = vld [vmem:[#allocation6 + $0xb48] sm:$0xff] }
  0xce   :  { %1823 = vmatprep.subr.bf16.mxu1 %v1202_v7  ;;  %v1394_v7 = vunpack.c.l.s8.bf16 %v650_v60 }
  0xd0   :  { %1783 = vmatpush2.bf16.msra.mxu0 %v1073_v12  ;;  %v1265_v12 = vunpack.c.l.s8.bf16 %v585_v2  ;;  %v681_v2 = vld [vmem:[#allocation6 + $0xb40] sm:$0xff] }
  0xd1   :  { %1824 = vmatpush2.bf16.msra.mxu1 %v1201_v13  ;;  %1784 = vmatprep.subr.bf16.mxu0 %v1066_v14  ;;  %v1393_v13 = vunpack.c.l.s8.bf16 %v649_v3  ;;  %v1258_v14 = vunpack.c.h.s8.bf16 %v578_v8 }
  0xd2   :  { %1825 = vmatprep.subr.bf16.mxu1 %v1194_v15  ;;  %v1386_v15 = vunpack.c.h.s8.bf16 %v642_v10 }
  0xd4   :  { %1785 = vmatpush2.bf16.msra.mxu0 %v1065_v19  ;;  %v1257_v19 = vunpack.c.h.s8.bf16 %v577_v16  ;;  %v673_v16 = vld [vmem:[#allocation6 + $0xb00] sm:$0xff] }
  0xd5   :  { %1826 = vmatpush2.bf16.msra.mxu1 %v1193_v20  ;;  %1786 = vmatprep.subr.bf16.mxu0 %v1058_v21  ;;  %v1385_v20 = vunpack.c.h.s8.bf16 %v641_v17  ;;  %v1250_v21 = vunpack.c.l.s8.bf16 %v578_v8  ;;  %v674_v8 = vld [vmem:[#allocation6 + $0xb08] sm:$0xff] }
  0xd6   :  { %1827 = vmatprep.subr.bf16.mxu1 %v1186_v22  ;;  %v1378_v22 = vunpack.c.l.s8.bf16 %v642_v10 }
  0xd8   :  { %1787 = vmatpush2.bf16.msra.mxu0 %v1057_v29  ;;  %v1377_v29 = vunpack.c.l.s8.bf16 %v641_v17 }
  0xd9   :  { %1828 = vmatpush2.bf16.msra.mxu1 %v1185_v30  ;;  %1838 = vmatprep.subr.bf16.mxu0 %v1306_v38  ;;  %v1370_v30 = vunpack.c.h.s8.bf16 %v634_v23  ;;  %v1498_v38 = vunpack.c.h.s8.bf16 %v698_v25 }
  0xda   :  { %1879 = vmatprep.subr.bf16.mxu1 %v1434_v31  ;;  %v633_v31 = vld [vmem:[#allocation6 + $0x9c0] sm:$0xff] }
  0xdb   :  { %1789 = vmatmul.mubr.bf16.vlgmr.msra.gmra.mxu0 %v3685_v28  ;;  %v1369_v32 = vunpack.c.h.s8.bf16 %v633_v31  ;;  %v1361_v45 = vunpack.c.l.s8.bf16 %v633_v31  ;;  %v729_v31 = vld [vmem:[#allocation6 + $0xcc0] sm:$0xff] }
  0xdc   :  { %1830 = vmatmul.mubr.bf16.vlgmr.msra.gmra.mxu1 %v3692_v37  ;;  %1839 = vmatpush1.bf16.msra.mxu0 %v1305_v9  ;;  %v1497_v9 = vunpack.c.h.s8.bf16 %v697_v34 }
  0xdd   :  { %1880 = vmatpush1.bf16.msra.mxu1 %v1433_v39  ;;  %1840 = vmatprep.subr.bf16.mxu0 %v1298_v40  ;;  %v1362_v39 = vunpack.c.l.s8.bf16 %v634_v23  ;;  %v1490_v40 = vunpack.c.l.s8.bf16 %v698_v25  ;;  %v348_v23 = vld [vmem:[#allocation6 + $0xd8] sm:$0xff]  ;;  %v3704_v25 = vrot.slane %v3679_v18, %v3603_v55 }
  0xde   :  { %1881 = vmatprep.subr.bf16.mxu1 %v1426_v41  ;;  %1870 = vmatprep.mubr.bf16.mxu0 %v3688_v35  ;;  %v626_v41 = vld [vmem:[#allocation6 + $0x988] sm:$0xff] }
  0xdf   :  { %1911 = vmatprep.mubr.bf16.mxu1 %v3696_v46 }
  0xe0   :  { %1841 = vmatpush1.bf16.msra.mxu0 %v1297_v47  ;;  %v1489_v47 = vunpack.c.l.s8.bf16 %v697_v34  ;;  %v347_v34 = vld [vmem:[#allocation6 + $0xd0] sm:$0xff] }
  0xe1   :  { %1882 = vmatpush1.bf16.msra.mxu1 %v1425_v49  ;;  %1842 = vmatprep.subr.bf16.mxu0 %v1290_v50  ;;  %v1354_v49 = vunpack.c.h.s8.bf16 %v626_v41  ;;  %v1482_v50 = vunpack.c.h.s8.bf16 %v690_v42 }
  0xe2   :  { %1883 = vmatprep.subr.bf16.mxu1 %v1418_v51  ;;  %v625_v51 = vld [vmem:[#allocation6 + $0x980] sm:$0xff] }
  0xe3   :  { %v1353_v53 = vunpack.c.h.s8.bf16 %v625_v51  ;;  %v1345_v60 = vunpack.c.l.s8.bf16 %v625_v51  ;;  %v721_v51 = vld [vmem:[#allocation6 + $0xc80] sm:$0xff] }
  0xe4   :  { %1843 = vmatpush1.bf16.msra.mxu0 %v1289_v54  ;;  %v1481_v54 = vunpack.c.h.s8.bf16 %v689_v52 }
  0xe5   :  { %1884 = vmatpush1.bf16.msra.mxu1 %v1417_v56  ;;  %1844 = vmatprep.subr.bf16.mxu0 %v1282_v57  ;;  %v1346_v56 = vunpack.c.l.s8.bf16 %v626_v41  ;;  %v1474_v57 = vunpack.c.l.s8.bf16 %v690_v42  ;;  %v722_v41 = vld [vmem:[#allocation6 + $0xc88] sm:$0xff]  ;;  %v340_v42 = vld [vmem:[#allocation6 + $0x98] sm:$0xff] }
  0xe6   :  { %1885 = vmatprep.subr.bf16.mxu1 %v1410_v58  ;;  %v618_v58 = vld [vmem:[#allocation6 + $0x948] sm:$0xff] }
  0xe8   :  { %1845 = vmatpush1.bf16.msra.mxu0 %v1281_v61  ;;  %v1473_v61 = vunpack.c.l.s8.bf16 %v689_v52  ;;  %v339_v52 = vld [vmem:[#allocation6 + $0x90] sm:$0xff] }
  0xe9   :  { %1886 = vmatpush1.bf16.msra.mxu1 %v1409_v62  ;;  %1846 = vmatprep.subr.bf16.mxu0 %v1274_v63  ;;  %v1338_v62 = vunpack.c.h.s8.bf16 %v618_v58  ;;  %v1466_v63 = vunpack.c.h.s8.bf16 %v682_v59 }
  0xea   :  { %1887 = vmatprep.subr.bf16.mxu1 %v1402_v1  ;;  %v617_v1 = vld [vmem:[#allocation6 + $0x940] sm:$0xff] }
  0xeb   :  { %v1337_v3 = vunpack.c.h.s8.bf16 %v617_v1  ;;  %v1329_v10 = vunpack.c.l.s8.bf16 %v617_v1  ;;  %v713_v1 = vld [vmem:[#allocation6 + $0xc40] sm:$0xff] }
  0xec   :  { %1847 = vmatpush1.bf16.msra.mxu0 %v1273_v4  ;;  %v1465_v4 = vunpack.c.h.s8.bf16 %v681_v2 }
  0xed   :  { %1888 = vmatpush1.bf16.msra.mxu1 %v1401_v5  ;;  %1848 = vmatprep.subr.bf16.mxu0 %v1266_v6  ;;  %v1330_v5 = vunpack.c.l.s8.bf16 %v618_v58  ;;  %v1458_v6 = vunpack.c.l.s8.bf16 %v682_v59  ;;  %v714_v58 = vld [vmem:[#allocation6 + $0xc48] sm:$0xff]  ;;  %v332_v59 = vld [vmem:[#allocation6 + $0x58] sm:$0xff] }
  0xee   :  { %1889 = vmatprep.subr.bf16.mxu1 %v1394_v7  ;;  %v610_v7 = vld [vmem:[#allocation6 + $0x908] sm:$0xff] }
  0xf0   :  { %1849 = vmatpush1.bf16.msra.mxu0 %v1265_v12  ;;  %v1457_v12 = vunpack.c.l.s8.bf16 %v681_v2  ;;  %v331_v2 = vld [vmem:[#allocation6 + $0x50] sm:$0xff] }
  0xf1   :  { %1890 = vmatpush1.bf16.msra.mxu1 %v1393_v13  ;;  %1850 = vmatprep.subr.bf16.mxu0 %v1258_v14  ;;  %v1322_v13 = vunpack.c.h.s8.bf16 %v610_v7  ;;  %v1450_v14 = vunpack.c.h.s8.bf16 %v674_v8 }
  0xf2   :  { %1891 = vmatprep.subr.bf16.mxu1 %v1386_v15  ;;  %v609_v15 = vld [vmem:[#allocation6 + $0x900] sm:$0xff] }
  0xf3   :  { %v1321_v17 = vunpack.c.h.s8.bf16 %v609_v15 }
  0xf4   :  { %1851 = vmatpush1.bf16.msra.mxu0 %v1257_v19  ;;  %v1449_v19 = vunpack.c.h.s8.bf16 %v673_v16 }
  0xf5   :  { %1892 = vmatpush1.bf16.msra.mxu1 %v1385_v20  ;;  %1852 = vmatprep.subr.bf16.mxu0 %v1250_v21  ;;  %v1314_v20 = vunpack.c.l.s8.bf16 %v610_v7  ;;  %v1442_v21 = vunpack.c.l.s8.bf16 %v674_v8  ;;  %v706_v7 = vld [vmem:[#allocation6 + $0xc08] sm:$0xff]  ;;  %v324_v8 = vld [vmem:[#allocation6 + $0x18] sm:$0xff] }
  0xf6   :  { %1893 = vmatprep.subr.bf16.mxu1 %v1378_v22  ;;  %v730_v22 = vld [vmem:[#allocation6 + $0xcc8] sm:$0xff] }
  0xf7   :  { %v1554_v18 = vunpack.c.l.s8.bf16 %v730_v22 }
  0xf8   :  { %1853 = vmatpush1.bf16.msra.mxu0 %v1249_v26  ;;  %v1313_v26 = vunpack.c.l.s8.bf16 %v609_v15  ;;  %v705_v15 = vld [vmem:[#allocation6 + $0xc00] sm:$0xff] }
  0xf9   :  { %1894 = vmatpush1.bf16.msra.mxu1 %v1377_v29  ;;  %1854 = vmatprep.subr.bf16.mxu0 %v1370_v30  ;;  %v1441_v29 = vunpack.c.l.s8.bf16 %v673_v16  ;;  %v1562_v30 = vunpack.c.h.s8.bf16 %v730_v22  ;;  %v323_v16 = vld [vmem:[#allocation6 + $0x10] sm:$0xff]  ;;  %v740_v22 = vunpack.c.l.s8.bf16 %v324_v8 }
  0xfa   :  { %1895 = vmatprep.subr.bf16.mxu1 %v1498_v38  ;;  %v796_v38 = vunpack.c.h.s8.bf16 %v348_v23 }
  0xfc   :  { %1855 = vmatpush2.bf16.msra.mxu0 %v1369_v32  ;;  %v3708_v32 = vcombine.high %v3704_v25, %v3704_v25 }
  0xfd   :  { %1896 = vmatpush2.bf16.msra.mxu1 %v1497_v9  ;;  %1856 = vmatprep.subr.bf16.mxu0 %v1362_v39  ;;  %v1561_v9 = vunpack.c.h.s8.bf16 %v729_v31  ;;  %v795_v39 = vunpack.c.h.s8.bf16 %v347_v34 }
  0xfe   :  { %1897 = vmatprep.subr.bf16.mxu1 %v1490_v40  ;;  %v788_v40 = vunpack.c.l.s8.bf16 %v348_v23  ;;  %v380_v23 = vld [vmem:[#allocation6 + $0x1d8] sm:$0xff] }
 0x100   :  { %1857 = vmatpush2.bf16.msra.mxu0 %v1361_v45  ;;  %v1553_v45 = vunpack.c.l.s8.bf16 %v729_v31  ;;  %v860_v31 = vunpack.c.h.s8.bf16 %v380_v23 }
 0x101   :  { %1898 = vmatpush2.bf16.msra.mxu1 %v1489_v47  ;;  %1858 = vmatprep.subr.bf16.mxu0 %v1354_v49  ;;  %v787_v47 = vunpack.c.l.s8.bf16 %v347_v34  ;;  %v1546_v49 = vunpack.c.h.s8.bf16 %v722_v41  ;;  %v379_v34 = vld [vmem:[#allocation6 + $0x1d0] sm:$0xff] }
 0x102   :  { %1899 = vmatprep.subr.bf16.mxu1 %v1482_v50  ;;  %v780_v50 = vunpack.c.h.s8.bf16 %v340_v42 }
 0x104   :  { %1859 = vmatpush2.bf16.msra.mxu0 %v1353_v53  ;;  %v1545_v53 = vunpack.c.h.s8.bf16 %v721_v51 }
 0x105   :  { %1900 = vmatpush2.bf16.msra.mxu1 %v1481_v54  ;;  %1860 = vmatprep.subr.bf16.mxu0 %v1346_v56  ;;  %v779_v54 = vunpack.c.h.s8.bf16 %v339_v52  ;;  %v1538_v56 = vunpack.c.l.s8.bf16 %v722_v41  ;;  %v852_v41 = vunpack.c.l.s8.bf16 %v380_v23  ;;  %v444_v23 = vld [vmem:[#allocation6 + $0x3d8] sm:$0xff] }
 0x106   :  { %1901 = vmatprep.subr.bf16.mxu1 %v1474_v57  ;;  %v772_v57 = vunpack.c.l.s8.bf16 %v340_v42 }
 0x108   :  { %1861 = vmatpush2.bf16.msra.mxu0 %v1345_v60  ;;  %v1537_v60 = vunpack.c.l.s8.bf16 %v721_v51 }
 0x109   :  { %1902 = vmatpush2.bf16.msra.mxu1 %v1473_v61  ;;  %1862 = vmatprep.subr.bf16.mxu0 %v1338_v62  ;;  %v771_v61 = vunpack.c.l.s8.bf16 %v339_v52  ;;  %v1530_v62 = vunpack.c.h.s8.bf16 %v714_v58  ;;  %v371_v52 = vld [vmem:[#allocation6 + $0x190] sm:$0xff] }
 0x10a   :  { %1903 = vmatprep.subr.bf16.mxu1 %v1466_v63  ;;  %v764_v63 = vunpack.c.h.s8.bf16 %v332_v59 }
 0x10c   :  { %1863 = vmatpush2.bf16.msra.mxu0 %v1337_v3  ;;  %v1529_v3 = vunpack.c.h.s8.bf16 %v713_v1 }
 0x10d   :  { %1904 = vmatpush2.bf16.msra.mxu1 %v1465_v4  ;;  %1864 = vmatprep.subr.bf16.mxu0 %v1330_v5  ;;  %v763_v4 = vunpack.c.h.s8.bf16 %v331_v2  ;;  %v1522_v5 = vunpack.c.l.s8.bf16 %v714_v58 }
 0x10e   :  { %1905 = vmatprep.subr.bf16.mxu1 %v1458_v6  ;;  %v756_v6 = vunpack.c.l.s8.bf16 %v332_v59  ;;  %v364_v59 = vld [vmem:[#allocation6 + $0x158] sm:$0xff] }
 0x110   :  { %1865 = vmatpush2.bf16.msra.mxu0 %v1329_v10  ;;  %v1521_v10 = vunpack.c.l.s8.bf16 %v713_v1 }
 0x111   :  { %1906 = vmatpush2.bf16.msra.mxu1 %v1457_v12  ;;  %1866 = vmatprep.subr.bf16.mxu0 %v1322_v13  ;;  %v755_v12 = vunpack.c.l.s8.bf16 %v331_v2  ;;  %v1514_v13 = vunpack.c.h.s8.bf16 %v706_v7  ;;  %v363_v2 = vld [vmem:[#allocation6 + $0x150] sm:$0xff] }
 0x112   :  { %1907 = vmatprep.subr.bf16.mxu1 %v1450_v14  ;;  %v748_v14 = vunpack.c.h.s8.bf16 %v324_v8  ;;  %v356_v8 = vld [vmem:[#allocation6 + $0x118] sm:$0xff] }
 0x114   :  { %1867 = vmatpush2.bf16.msra.mxu0 %v1321_v17  ;;  %v1622_v17 = vcombine.high %v3675_v11, %v3675_v11 }
 0x115   :  { %1908 = vmatpush2.bf16.msra.mxu1 %v1449_v19  ;;  %1868 = vmatprep.subr.bf16.mxu0 %v1314_v20  ;;  %v1513_v19 = vunpack.c.h.s8.bf16 %v705_v15  ;;  %v747_v20 = vunpack.c.h.s8.bf16 %v323_v16 }
 0x116   :  { %1909 = vmatprep.subr.bf16.mxu1 %v1442_v21  ;;  %v1506_v21 = vunpack.c.l.s8.bf16 %v706_v7 }
 0x118   :  { %1869 = vmatpush2.bf16.msra.mxu0 %v1313_v26  ;;  %v412_v26 = vld [vmem:[#allocation6 + $0x2d8] sm:$0xff] }
 0x119   :  { %1910 = vmatpush2.bf16.msra.mxu1 %v1441_v29  ;;  %1920 = vmatprep.subr.bf16.mxu0 %v1562_v30  ;;  %v1636_v29 = vrot.slane %v1622_v17, %v3603_v55  ;;  %v1505_v30 = vunpack.c.l.s8.bf16 %v705_v15  ;;  %v924_v11 = vunpack.c.h.s8.bf16 %v412_v26  ;;  %v916_v42 = vunpack.c.l.s8.bf16 %v412_v26  ;;  %v387_v17 = vld [vmem:[#allocation6 + $0x210] sm:$0xff]  ;;  %v476_v26 = vld [vmem:[#allocation6 + $0x4d8] sm:$0xff] }
 0x11a   :  { %1961 = vmatprep.subr.bf16.mxu1 %v796_v38  ;;  %v739_v38 = vunpack.c.l.s8.bf16 %v323_v16  ;;  %v355_v16 = vld [vmem:[#allocation6 + $0x110] sm:$0xff] }
 0x11b   :  { %1871 = vmatmul.mubr.bf16.vlgmr.msra.gmra.mxu0 %v3704_v25 }
 0x11c   :  { %1912 = vmatmul.mubr.bf16.vlgmr.msra.gmra.mxu1 %v3708_v32  ;;  %1921 = vmatpush1.bf16.msra.mxu0 %v1561_v9  ;;  %v411_v9 = vld [vmem:[#allocation6 + $0x2d0] sm:$0xff] }
 0x11d   :  { %1962 = vmatpush1.bf16.msra.mxu1 %v795_v39  ;;  %1922 = vmatprep.subr.bf16.mxu0 %v1554_v18  ;;  %v3718_v39 = vrot.slane %v1636_v29, %v3603_v55  ;;  %v859_v18 = vunpack.c.h.s8.bf16 %v379_v34  ;;  %v803_v29 = vunpack.c.l.s8.bf16 %v355_v16 }
 0x11e   :  { %1963 = vmatprep.subr.bf16.mxu1 %v788_v40  ;;  %1952 = vmatprep.mubr.bf16.mxu0 %v3527_v0  ;;  %v923_v40 = vunpack.c.h.s8.bf16 %v411_v9 }
 0x11f   :  { %1993 = vmatprep.mubr.bf16.mxu1 %v3620_v43 }
 0x120   :  { %1923 = vmatpush1.bf16.msra.mxu0 %v1553_v45  ;;  %v372_v45 = vld [vmem:[#allocation6 + $0x198] sm:$0xff] }
 0x121   :  { %1964 = vmatpush1.bf16.msra.mxu1 %v787_v47  ;;  %1924 = vmatprep.subr.bf16.mxu0 %v1546_v49  ;;  %v404_v47 = vld [vmem:[#allocation6 + $0x298] sm:$0xff]  ;;  %v851_v49 = vunpack.c.l.s8.bf16 %v379_v34  ;;  %v844_v55 = vunpack.c.h.s8.bf16 %v372_v45  ;;  %v475_v34 = vld [vmem:[#allocation6 + $0x4d0] sm:$0xff] }
 0x122   :  { %1965 = vmatprep.subr.bf16.mxu1 %v780_v50  ;;  %v915_v50 = vunpack.c.l.s8.bf16 %v411_v9  ;;  %v908_v51 = vunpack.c.h.s8.bf16 %v404_v47  ;;  %v900_v58 = vunpack.c.l.s8.bf16 %v404_v47 }
 0x124   :  { %1925 = vmatpush1.bf16.msra.mxu0 %v1545_v53  ;;  %v403_v53 = vld [vmem:[#allocation6 + $0x290] sm:$0xff] }
 0x125   :  { %1966 = vmatpush1.bf16.msra.mxu1 %v779_v54  ;;  %1926 = vmatprep.subr.bf16.mxu0 %v1538_v56  ;;  %v843_v54 = vunpack.c.h.s8.bf16 %v371_v52  ;;  %v907_v56 = vunpack.c.h.s8.bf16 %v403_v53 }
 0x126   :  { %1967 = vmatprep.subr.bf16.mxu1 %v772_v57  ;;  %v836_v57 = vunpack.c.l.s8.bf16 %v372_v45  ;;  %v468_v45 = vld [vmem:[#allocation6 + $0x498] sm:$0xff] }
 0x128   :  { %1927 = vmatpush1.bf16.msra.mxu0 %v1537_v60  ;;  %v396_v60 = vld [vmem:[#allocation6 + $0x258] sm:$0xff] }
 0x129   :  { %1968 = vmatpush1.bf16.msra.mxu1 %v771_v61  ;;  %1928 = vmatprep.subr.bf16.mxu0 %v1530_v62  ;;  %v835_v61 = vunpack.c.l.s8.bf16 %v371_v52  ;;  %v899_v62 = vunpack.c.l.s8.bf16 %v403_v53  ;;  %v892_v1 = vunpack.c.h.s8.bf16 %v396_v60  ;;  %v884_v7 = vunpack.c.l.s8.bf16 %v396_v60 }
 0x12a   :  { %1969 = vmatprep.subr.bf16.mxu1 %v764_v63  ;;  %v828_v63 = vunpack.c.h.s8.bf16 %v364_v59 }
 0x12c   :  { %1929 = vmatpush1.bf16.msra.mxu0 %v1529_v3  ;;  %v395_v3 = vld [vmem:[#allocation6 + $0x250] sm:$0xff] }
 0x12d   :  { %1970 = vmatpush1.bf16.msra.mxu1 %v763_v4  ;;  %1930 = vmatprep.subr.bf16.mxu0 %v1522_v5  ;;  %v827_v4 = vunpack.c.h.s8.bf16 %v363_v2  ;;  %v891_v5 = vunpack.c.h.s8.bf16 %v395_v3 }
 0x12e   :  { %1971 = vmatprep.subr.bf16.mxu1 %v756_v6  ;;  %v820_v6 = vunpack.c.l.s8.bf16 %v364_v59 }
 0x130   :  { %1931 = vmatpush1.bf16.msra.mxu0 %v1521_v10  ;;  %v388_v10 = vld [vmem:[#allocation6 + $0x218] sm:$0xff] }
 0x131   :  { %1972 = vmatpush1.bf16.msra.mxu1 %v755_v12  ;;  %1932 = vmatprep.subr.bf16.mxu0 %v1514_v13  ;;  %v819_v12 = vunpack.c.l.s8.bf16 %v363_v2  ;;  %v883_v13 = vunpack.c.l.s8.bf16 %v395_v3  ;;  %v876_v15 = vunpack.c.h.s8.bf16 %v388_v10 }
 0x132   :  { %1973 = vmatprep.subr.bf16.mxu1 %v748_v14  ;;  %v812_v14 = vunpack.c.h.s8.bf16 %v356_v8 }
 0x134   :  { %1933 = vmatpush1.bf16.msra.mxu0 %v1513_v19  ;;  %v811_v19 = vunpack.c.h.s8.bf16 %v355_v16 }
 0x135   :  { %1974 = vmatpush1.bf16.msra.mxu1 %v747_v20  ;;  %1934 = vmatprep.subr.bf16.mxu0 %v1506_v21  ;;  %v875_v20 = vunpack.c.h.s8.bf16 %v387_v17  ;;  %v804_v21 = vunpack.c.l.s8.bf16 %v356_v8 }
 0x136   :  { %1975 = vmatprep.subr.bf16.mxu1 %v740_v22  ;;  %v868_v22 = vunpack.c.l.s8.bf16 %v388_v10 }
 0x138   :  { %1935 = vmatpush1.bf16.msra.mxu0 %v1505_v30  ;;  %v867_v30 = vunpack.c.l.s8.bf16 %v387_v17 }
 0x139   :  { %1976 = vmatpush1.bf16.msra.mxu1 %v739_v38  ;;  %2002 = vmatprep.subr.bf16.mxu0 %v924_v11  ;;  %v988_v38 = vunpack.c.h.s8.bf16 %v444_v23  ;;  %v443_v11 = vld [vmem:[#allocation6 + $0x3d0] sm:$0xff] }
 0x13a   :  { %1977 = vmatprep.subr.bf16.mxu1 %v860_v31  ;;  %v1052_v31 = vunpack.c.h.s8.bf16 %v476_v26  ;;  %v987_v9 = vunpack.c.h.s8.bf16 %v443_v11 }
 0x13b   :  { %1953 = vmatmul.mubr.bf16.vlgmr.msra.gmra.mxu0 %v3718_v39 }
 0x13c   :  { %2003 = vmatpush1.bf16.msra.mxu0 %v923_v40  ;;  %2034 = vmatprep.mubr.bf16.mxu0 %v3625_v44  ;;  %v980_v40 = vunpack.c.l.s8.bf16 %v444_v23 }
 0x13d   :  { %1978 = vmatpush2.bf16.msra.mxu1 %v859_v18  ;;  %2004 = vmatprep.subr.bf16.mxu0 %v916_v42  ;;  %v1051_v18 = vunpack.c.h.s8.bf16 %v475_v34  ;;  %v436_v42 = vld [vmem:[#allocation6 + $0x398] sm:$0xff] }
 0x13e   :  { %1979 = vmatprep.subr.bf16.mxu1 %v852_v41  ;;  %v1044_v41 = vunpack.c.l.s8.bf16 %v476_v26  ;;  %v964_v3 = vunpack.c.l.s8.bf16 %v436_v42 }
 0x140   :  { %2005 = vmatpush1.bf16.msra.mxu0 %v915_v50 }
 0x141   :  { %1980 = vmatpush2.bf16.msra.mxu1 %v851_v49  ;;  %2006 = vmatprep.subr.bf16.mxu0 %v908_v51  ;;  %v1043_v51 = vunpack.c.l.s8.bf16 %v475_v34 }
 0x142   :  { %1981 = vmatprep.subr.bf16.mxu1 %v844_v55  ;;  %v979_v55 = vunpack.c.l.s8.bf16 %v443_v11 }
 0x144   :  { %2007 = vmatpush1.bf16.msra.mxu0 %v907_v56  ;;  %v1036_v56 = vunpack.c.h.s8.bf16 %v468_v45 }
 0x145   :  { %1982 = vmatpush2.bf16.msra.mxu1 %v843_v54  ;;  %2008 = vmatprep.subr.bf16.mxu0 %v900_v58  ;;  %v972_v54 = vunpack.c.h.s8.bf16 %v436_v42  ;;  %v467_v58 = vld [vmem:[#allocation6 + $0x490] sm:$0xff] }
 0x146   :  { %1983 = vmatprep.subr.bf16.mxu1 %v836_v57  ;;  %v435_v57 = vld [vmem:[#allocation6 + $0x390] sm:$0xff]  ;;  %v1027_v8 = vunpack.c.l.s8.bf16 %v467_v58 }
 0x148   :  { %2009 = vmatpush1.bf16.msra.mxu0 %v899_v62  ;;  %v971_v62 = vunpack.c.h.s8.bf16 %v435_v57 }
 0x149   :  { %1984 = vmatpush2.bf16.msra.mxu1 %v835_v61  ;;  %2010 = vmatprep.subr.bf16.mxu0 %v892_v1 }
 0x14a   :  { %1985 = vmatprep.subr.bf16.mxu1 %v828_v63  ;;  %v1035_v63 = vunpack.c.h.s8.bf16 %v467_v58 }
 0x14c   :  { %2011 = vmatpush1.bf16.msra.mxu0 %v891_v5  ;;  %v428_v5 = vld [vmem:[#allocation6 + $0x358] sm:$0xff] }
 0x14d   :  { %1986 = vmatpush2.bf16.msra.mxu1 %v827_v4  ;;  %2012 = vmatprep.subr.bf16.mxu0 %v884_v7  ;;  %v1028_v4 = vunpack.c.l.s8.bf16 %v468_v45  ;;  %v963_v7 = vunpack.c.l.s8.bf16 %v435_v57  ;;  %v956_v10 = vunpack.c.h.s8.bf16 %v428_v5  ;;  %v948_v17 = vunpack.c.l.s8.bf16 %v428_v5  ;;  %v532_v57 = vld [vmem:[#allocation6 + $0x698] sm:$0xff] }
 0x14e   :  { %1987 = vmatprep.subr.bf16.mxu1 %v820_v6  ;;  %v460_v6 = vld [vmem:[#allocation6 + $0x458] sm:$0xff]  ;;  %v1156_v5 = vunpack.c.l.s8.bf16 %v532_v57 }
 0x150   :  { %2013 = vmatpush1.bf16.msra.mxu0 %v883_v13  ;;  %v427_v13 = vld [vmem:[#allocation6 + $0x350] sm:$0xff] }
 0x151   :  { %1988 = vmatpush2.bf16.msra.mxu1 %v819_v12  ;;  %2014 = vmatprep.subr.bf16.mxu0 %v876_v15  ;;  %v1020_v12 = vunpack.c.h.s8.bf16 %v460_v6  ;;  %v955_v15 = vunpack.c.h.s8.bf16 %v427_v13 }
 0x152   :  { %1989 = vmatprep.subr.bf16.mxu1 %v812_v14  ;;  %v459_v14 = vld [vmem:[#allocation6 + $0x450] sm:$0xff] }
 0x153   :  { %v1019_v16 = vunpack.c.h.s8.bf16 %v459_v14  ;;  %v1011_v23 = vunpack.c.l.s8.bf16 %v459_v14  ;;  %v491_v14 = vld [vmem:[#allocation6 + $0x550] sm:$0xff] }
 0x154   :  { %2015 = vmatpush1.bf16.msra.mxu0 %v875_v20  ;;  %v420_v20 = vld [vmem:[#allocation6 + $0x318] sm:$0xff] }
 0x155   :  { %1990 = vmatpush2.bf16.msra.mxu1 %v811_v19  ;;  %2016 = vmatprep.subr.bf16.mxu0 %v868_v22  ;;  %v1012_v19 = vunpack.c.l.s8.bf16 %v460_v6  ;;  %v947_v22 = vunpack.c.l.s8.bf16 %v427_v13  ;;  %v940_v26 = vunpack.c.h.s8.bf16 %v420_v20  ;;  %v932_v34 = vunpack.c.l.s8.bf16 %v420_v20  ;;  %v492_v6 = vld [vmem:[#allocation6 + $0x558] sm:$0xff] }
 0x156   :  { %1991 = vmatprep.subr.bf16.mxu1 %v804_v21  ;;  %v452_v21 = vld [vmem:[#allocation6 + $0x418] sm:$0xff] }
 0x158   :  { %2017 = vmatpush1.bf16.msra.mxu0 %v867_v30  ;;  %v419_v30 = vld [vmem:[#allocation6 + $0x310] sm:$0xff] }
 0x159   :  { %1992 = vmatpush2.bf16.msra.mxu1 %v803_v29  ;;  %2018 = vmatprep.subr.bf16.mxu0 %v988_v38  ;;  %v1004_v29 = vunpack.c.h.s8.bf16 %v452_v21  ;;  %v451_v38 = vld [vmem:[#allocation6 + $0x410] sm:$0xff] }
 0x15a   :  { %2043 = vmatprep.subr.bf16.mxu1 %v1052_v31  ;;  %v939_v31 = vunpack.c.h.s8.bf16 %v419_v30  ;;  %v1003_v11 = vunpack.c.h.s8.bf16 %v451_v38  ;;  %v995_v42 = vunpack.c.l.s8.bf16 %v451_v38  ;;  %v483_v38 = vld [vmem:[#allocation6 + $0x510] sm:$0xff] }
 0x15b   :  { %v1708_v47 = vpop.f32.mrf.mxu0 }
 0x15c   :  { %v1749_v49 = vpop.f32.mrf.mxu1  ;;  %1994 = vmatmul.mubr.bf16.vlgmr.msra.gmra.mxu1 %v3639_v24  ;;  %2019 = vmatpush2.bf16.msra.mxu0 %v987_v9  ;;  %v996_v9 = vunpack.c.l.s8.bf16 %v452_v21  ;;  %v484_v21 = vld [vmem:[#allocation6 + $0x518] sm:$0xff] }
 0x15d   :  { %v3723_v50 = vadd.f32 %v1749_v49, %v1708_v47  ;;  %2044 = vmatpush1.bf16.msra.mxu1 %v1051_v18  ;;  %v1710_v52 = vpop.f32.mrf.mxu0  ;;  %2020 = vmatprep.subr.bf16.mxu0 %v980_v40  ;;  %v508_v18 = vld [vmem:[#allocation6 + $0x5d8] sm:$0xff]  ;;  %v507_v49 = vld [vmem:[#allocation6 + $0x5d0] sm:$0xff] }
 0x15e   :  { %v1751_v53 = vpop.f32.mrf.mxu1  ;;  %2045 = vmatprep.subr.bf16.mxu1 %v1044_v41  ;;  %2075 = vmatprep.mubr.bf16.mxu1 %v3643_v33  ;;  %v540_v40 = vld [vmem:[#allocation6 + $0x6d8] sm:$0xff]  ;;  %v931_v41 = vunpack.c.l.s8.bf16 %v419_v30  ;;  %v1116_v45 = vunpack.c.h.s8.bf16 %v508_v18  ;;  %v1107_v58 = vunpack.c.l.s8.bf16 %v507_v49 }
 0x15f   :  { %v3725_v59 = vadd.f32 %v1751_v53, %v1710_v52  ;;  %v1712_v60 = vpop.f32.mrf.mxu0  ;;  %v1180_v47 = vunpack.c.h.s8.bf16 %v540_v40  ;;  %v1108_v53 = vunpack.c.l.s8.bf16 %v508_v18 }
 0x160   :  { %v1753_v61 = vpop.f32.mrf.mxu1  ;;  %2021 = vmatpush2.bf16.msra.mxu0 %v979_v55  ;;  %v539_v55 = vld [vmem:[#allocation6 + $0x6d0] sm:$0xff] }
 0x161   :  { %2046 = vmatpush1.bf16.msra.mxu1 %v1043_v51  ;;  %v1713_v1 = vpop.f32.mrf.mxu0  ;;  %2022 = vmatprep.subr.bf16.mxu0 %v972_v54  ;;  %v1115_v51 = vunpack.c.h.s8.bf16 %v507_v49  ;;  %v1179_v52 = vunpack.c.h.s8.bf16 %v539_v55  ;;  %v1172_v54 = vunpack.c.l.s8.bf16 %v540_v40  ;;  %v1171_v60 = vunpack.c.l.s8.bf16 %v539_v55  ;;  %v572_v40 = vld [vmem:[#allocation6 + $0x7d8] sm:$0xff]  ;;  %v571_v55 = vld [vmem:[#allocation6 + $0x7d0] sm:$0xff] }
 0x162   :  { %v1754_v2 = vpop.f32.mrf.mxu1  ;;  %2047 = vmatprep.subr.bf16.mxu1 %v1036_v56  ;;  %v500_v56 = vld [vmem:[#allocation6 + $0x598] sm:$0xff]  ;;  %v531_v1 = vld [vmem:[#allocation6 + $0x690] sm:$0xff] }
 0x163   :  { %v1100_v61 = vunpack.c.h.s8.bf16 %v500_v56 }
 0x164   :  { %2023 = vmatpush2.bf16.msra.mxu0 %v971_v62  ;;  %v1164_v62 = vunpack.c.h.s8.bf16 %v532_v57  ;;  %v564_v57 = vld [vmem:[#allocation6 + $0x798] sm:$0xff] }
 0x165   :  { %2048 = vmatpush1.bf16.msra.mxu1 %v1035_v63  ;;  %2024 = vmatprep.subr.bf16.mxu0 %v964_v3  ;;  %v499_v63 = vld [vmem:[#allocation6 + $0x590] sm:$0xff]  ;;  %v1163_v3 = vunpack.c.h.s8.bf16 %v531_v1 }
 0x166   :  { %2049 = vmatprep.subr.bf16.mxu1 %v1028_v4  ;;  %v1099_v2 = vunpack.c.h.s8.bf16 %v499_v63  ;;  %v1092_v4 = vunpack.c.l.s8.bf16 %v500_v56 }
 0x168   :  { %2025 = vmatpush2.bf16.msra.mxu0 %v963_v7  ;;  %v524_v7 = vld [vmem:[#allocation6 + $0x658] sm:$0xff] }
 0x169   :  { %2050 = vmatpush1.bf16.msra.mxu1 %v1027_v8  ;;  %2026 = vmatprep.subr.bf16.mxu0 %v956_v10  ;;  %v1091_v8 = vunpack.c.l.s8.bf16 %v499_v63  ;;  %v1155_v10 = vunpack.c.l.s8.bf16 %v531_v1  ;;  %v1148_v13 = vunpack.c.h.s8.bf16 %v524_v7  ;;  %v1140_v20 = vunpack.c.l.s8.bf16 %v524_v7  ;;  %v595_v7 = vld [vmem:[#allocation6 + $0x890] sm:$0xff] }
 0x16a   :  { %2051 = vmatprep.subr.bf16.mxu1 %v1020_v12  ;;  %v1084_v12 = vunpack.c.h.s8.bf16 %v492_v6  ;;  %v1235_v63 = vunpack.c.l.s8.bf16 %v571_v55 }
 0x16c   :  { %2027 = vmatpush2.bf16.msra.mxu0 %v955_v15  ;;  %v523_v15 = vld [vmem:[#allocation6 + $0x650] sm:$0xff] }
 0x16d   :  { %2052 = vmatpush1.bf16.msra.mxu1 %v1019_v16  ;;  %2028 = vmatprep.subr.bf16.mxu0 %v948_v17  ;;  %v1083_v16 = vunpack.c.h.s8.bf16 %v491_v14  ;;  %v1147_v17 = vunpack.c.h.s8.bf16 %v523_v15 }
 0x16e   :  { %2053 = vmatprep.subr.bf16.mxu1 %v1012_v19  ;;  %v1076_v19 = vunpack.c.l.s8.bf16 %v492_v6  ;;  %v563_v6 = vld [vmem:[#allocation6 + $0x790] sm:$0xff] }
 0x170   :  { %2029 = vmatpush2.bf16.msra.mxu0 %v947_v22  ;;  %v516_v22 = vld [vmem:[#allocation6 + $0x618] sm:$0xff] }
 0x171   :  { %2054 = vmatpush1.bf16.msra.mxu1 %v1011_v23  ;;  %2030 = vmatprep.subr.bf16.mxu0 %v940_v26  ;;  %v1075_v23 = vunpack.c.l.s8.bf16 %v491_v14  ;;  %v1139_v26 = vunpack.c.l.s8.bf16 %v523_v15  ;;  %v1132_v30 = vunpack.c.h.s8.bf16 %v516_v22  ;;  %v1124_v18 = vunpack.c.l.s8.bf16 %v516_v22  ;;  %v588_v22 = vld [vmem:[#allocation6 + $0x858] sm:$0xff] }
 0x172   :  { %2055 = vmatprep.subr.bf16.mxu1 %v1004_v29  ;;  %v1068_v29 = vunpack.c.h.s8.bf16 %v484_v21  ;;  %v1227_v14 = vunpack.c.h.s8.bf16 %v563_v6  ;;  %v1291_v15 = vunpack.c.h.s8.bf16 %v595_v7 }
 0x174   :  { %2031 = vmatpush2.bf16.msra.mxu0 %v939_v31  ;;  %v515_v31 = vld [vmem:[#allocation6 + $0x610] sm:$0xff] }
 0x175   :  { %2056 = vmatpush1.bf16.msra.mxu1 %v1003_v11  ;;  %2032 = vmatprep.subr.bf16.mxu0 %v932_v34  ;;  %v1067_v11 = vunpack.c.h.s8.bf16 %v483_v38  ;;  %v1131_v34 = vunpack.c.h.s8.bf16 %v515_v31 }
 0x176   :  { %2057 = vmatprep.subr.bf16.mxu1 %v996_v9  ;;  %v1060_v9 = vunpack.c.l.s8.bf16 %v484_v21  ;;  %v556_v21 = vld [vmem:[#allocation6 + $0x758] sm:$0xff] }
 0x178   :  { %2033 = vmatpush2.bf16.msra.mxu0 %v931_v41  ;;  %v604_v41 = vld [vmem:[#allocation6 + $0x8d8] sm:$0xff] }
 0x179   :  { %2058 = vmatpush1.bf16.msra.mxu1 %v995_v42  ;;  %2084 = vmatprep.subr.bf16.mxu0 %v1180_v47  ;;  %v1059_v42 = vunpack.c.l.s8.bf16 %v483_v38  ;;  %v1244_v47 = vunpack.c.h.s8.bf16 %v572_v40  ;;  %v1308_v49 = vunpack.c.h.s8.bf16 %v604_v41  ;;  %v1300_v56 = vunpack.c.l.s8.bf16 %v604_v41  ;;  %v587_v38 = vld [vmem:[#allocation6 + $0x850] sm:$0xff] }
 0x17a   :  { %2059 = vmatprep.subr.bf16.mxu1 %v1116_v45  ;;  %v1123_v45 = vunpack.c.l.s8.bf16 %v515_v31 }
 0x17b   :  { %2035 = vmatmul.mubr.bf16.vlgmr.msra.gmra.mxu0 %v3649_v36 }
 0x17c   :  { %2085 = vmatpush1.bf16.msra.mxu0 %v1179_v52  ;;  %2116 = vmatprep.mubr.bf16.mxu0 %v3658_v48  ;;  %v1243_v52 = vunpack.c.h.s8.bf16 %v571_v55  ;;  %v579_v55 = vld [vmem:[#allocation6 + $0x810] sm:$0xff] }
 0x17d   :  { %2060 = vmatpush2.bf16.msra.mxu1 %v1115_v51  ;;  %2086 = vmatprep.subr.bf16.mxu0 %v1172_v54  ;;  %v603_v51 = vld [vmem:[#allocation6 + $0x8d0] sm:$0xff]  ;;  %v1236_v54 = vunpack.c.l.s8.bf16 %v572_v40  ;;  %v580_v40 = vld [vmem:[#allocation6 + $0x818] sm:$0xff] }
 0x17e   :  { %2061 = vmatprep.subr.bf16.mxu1 %v1108_v53  ;;  %v1307_v53 = vunpack.c.h.s8.bf16 %v603_v51  ;;  %v1299_v1 = vunpack.c.l.s8.bf16 %v603_v51 }
 0x180   :  { %2087 = vmatpush1.bf16.msra.mxu0 %v1171_v60 }
 0x181   :  { %2062 = vmatpush2.bf16.msra.mxu1 %v1107_v58  ;;  %2088 = vmatprep.subr.bf16.mxu0 %v1164_v62  ;;  %v596_v58 = vld [vmem:[#allocation6 + $0x898] sm:$0xff] }
 0x182   :  { %2063 = vmatprep.subr.bf16.mxu1 %v1100_v61 }
 0x184   :  { %2089 = vmatpush1.bf16.msra.mxu0 %v1163_v3 }
 0x185   :  { %2064 = vmatpush2.bf16.msra.mxu1 %v1099_v2  ;;  %2090 = vmatprep.subr.bf16.mxu0 %v1156_v5  ;;  %v1292_v5 = vunpack.c.h.s8.bf16 %v596_v58 }
 0x186   :  { %2065 = vmatprep.subr.bf16.mxu1 %v1092_v4  ;;  %v1228_v4 = vunpack.c.h.s8.bf16 %v564_v57 }
 0x188   :  { %2091 = vmatpush1.bf16.msra.mxu0 %v1155_v10 }
 0x189   :  { %2066 = vmatpush2.bf16.msra.mxu1 %v1091_v8  ;;  %2092 = vmatprep.subr.bf16.mxu0 %v1148_v13 }
 0x18a   :  { %2067 = vmatprep.subr.bf16.mxu1 %v1084_v12 }
 0x18c   :  { %2093 = vmatpush1.bf16.msra.mxu0 %v1147_v17 }
 0x18d   :  { %2068 = vmatpush2.bf16.msra.mxu1 %v1083_v16  ;;  %2094 = vmatprep.subr.bf16.mxu0 %v1140_v20  ;;  %v1284_v20 = vunpack.c.l.s8.bf16 %v596_v58 }
 0x18e   :  { %2069 = vmatprep.subr.bf16.mxu1 %v1076_v19  ;;  %v1220_v19 = vunpack.c.l.s8.bf16 %v564_v57  ;;  %v668_v57 = vld [vmem:[#allocation6 + $0xad8] sm:$0xff] }
 0x190   :  { %2095 = vmatpush1.bf16.msra.mxu0 %v1139_v26  ;;  %v1212_v26 = vunpack.c.h.s8.bf16 %v556_v21 }
 0x191   :  { %2070 = vmatpush2.bf16.msra.mxu1 %v1075_v23  ;;  %2096 = vmatprep.subr.bf16.mxu0 %v1132_v30  ;;  %v1283_v23 = vunpack.c.l.s8.bf16 %v595_v7  ;;  %v555_v30 = vld [vmem:[#allocation6 + $0x750] sm:$0xff]  ;;  %v660_v7 = vld [vmem:[#allocation6 + $0xa98] sm:$0xff] }
 0x192   :  { %2071 = vmatprep.subr.bf16.mxu1 %v1068_v29  ;;  %v1276_v29 = vunpack.c.h.s8.bf16 %v588_v22  ;;  %v1211_v31 = vunpack.c.h.s8.bf16 %v555_v30  ;;  %v1203_v41 = vunpack.c.l.s8.bf16 %v555_v30 }
 0x194   :  { %2097 = vmatpush1.bf16.msra.mxu0 %v1131_v34  ;;  %v1204_v34 = vunpack.c.l.s8.bf16 %v556_v21  ;;  %v1412_v21 = vunpack.c.l.s8.bf16 %v660_v7 }
 0x195   :  { %2072 = vmatpush2.bf16.msra.mxu1 %v1067_v11  ;;  %2098 = vmatprep.subr.bf16.mxu0 %v1124_v18  ;;  %v1275_v11 = vunpack.c.h.s8.bf16 %v587_v38  ;;  %v548_v18 = vld [vmem:[#allocation6 + $0x718] sm:$0xff] }
 0x196   :  { %2073 = vmatprep.subr.bf16.mxu1 %v1060_v9  ;;  %v1268_v9 = vunpack.c.l.s8.bf16 %v588_v22  ;;  %v620_v22 = vld [vmem:[#allocation6 + $0x958] sm:$0xff] }
 0x198   :  { %2099 = vmatpush1.bf16.msra.mxu0 %v1123_v45  ;;  %v1196_v45 = vunpack.c.h.s8.bf16 %v548_v18 }
 0x199   :  { %2074 = vmatpush2.bf16.msra.mxu1 %v1059_v42  ;;  %2100 = vmatprep.subr.bf16.mxu0 %v1244_v47  ;;  %v1267_v42 = vunpack.c.l.s8.bf16 %v587_v38  ;;  %v1260_v47 = vunpack.c.h.s8.bf16 %v580_v40  ;;  %v619_v38 = vld [vmem:[#allocation6 + $0x950] sm:$0xff] }
 0x19a   :  { %2125 = vmatprep.subr.bf16.mxu1 %v1308_v49  ;;  %v547_v49 = vld [vmem:[#allocation6 + $0x710] sm:$0xff] }
 0x19b   :  { %v1790_v60 = vpop.f32.mrf.mxu0  ;;  %v1195_v51 = vunpack.c.h.s8.bf16 %v547_v49  ;;  %v1187_v58 = vunpack.c.l.s8.bf16 %v547_v49 }
 0x19c   :  { %v1831_v61 = vpop.f32.mrf.mxu1  ;;  %2076 = vmatmul.mubr.bf16.vlgmr.msra.gmra.mxu1 %v3685_v28  ;;  %v1791_v62 = vadd.f32 %v1790_v60, %v3723_v50  ;;  %2101 = vmatpush2.bf16.msra.mxu0 %v1243_v52  ;;  %v1259_v52 = vunpack.c.h.s8.bf16 %v579_v55  ;;  %v1251_v60 = vunpack.c.l.s8.bf16 %v579_v55  ;;  %v611_v55 = vld [vmem:[#allocation6 + $0x910] sm:$0xff] }
 0x19d   :  { %2126 = vmatpush1.bf16.msra.mxu1 %v1307_v53  ;;  %v1792_v2 = vpop.f32.mrf.mxu0  ;;  %2102 = vmatprep.subr.bf16.mxu0 %v1236_v54  ;;  %v1188_v53 = vunpack.c.l.s8.bf16 %v548_v18  ;;  %v1252_v54 = vunpack.c.l.s8.bf16 %v580_v40  ;;  %v612_v40 = vld [vmem:[#allocation6 + $0x918] sm:$0xff] }
 0x19e   :  { %v1833_v3 = vpop.f32.mrf.mxu1  ;;  %2127 = vmatprep.subr.bf16.mxu1 %v1300_v56  ;;  %v3732_v8 = vadd.f32 %v1831_v61, %v1791_v62  ;;  %v1793_v10 = vadd.f32 %v1792_v2, %v3725_v59  ;;  %2157 = vmatprep.mubr.bf16.mxu1 %v3688_v35  ;;  %v1219_v59 = vunpack.c.l.s8.bf16 %v563_v6  ;;  %v636_v56 = vld [vmem:[#allocation6 + $0x9d8] sm:$0xff]  ;;  %v1436_v62 = vunpack.c.h.s8.bf16 %v668_v57 }
 0x19f   :  { %v1794_v12 = vpop.f32.mrf.mxu0  ;;  %v1372_v61 = vunpack.c.h.s8.bf16 %v636_v56  ;;  %v628_v6 = vld [vmem:[#allocation6 + $0x998] sm:$0xff] }
 0x1a0   :  { %v1835_v50 = vpop.f32.mrf.mxu1  ;;  %v3736_v13 = vadd.f32 %v1833_v3, %v1793_v10  ;;  %2103 = vmatpush2.bf16.msra.mxu0 %v1235_v63  ;;  %v635_v63 = vld [vmem:[#allocation6 + $0x9d0] sm:$0xff] }
 0x1a1   :  { %2128 = vmatpush1.bf16.msra.mxu1 %v1299_v1  ;;  %v1795_v16 = vpop.f32.mrf.mxu0  ;;  %2104 = vmatprep.subr.bf16.mxu0 %v1228_v4  ;;  %v667_v1 = vld [vmem:[#allocation6 + $0xad0] sm:$0xff]  ;;  %v1371_v2 = vunpack.c.h.s8.bf16 %v635_v63  ;;  %v1364_v4 = vunpack.c.l.s8.bf16 %v636_v56  ;;  %v1363_v10 = vunpack.c.l.s8.bf16 %v635_v63  ;;  %v1356_v50 = vunpack.c.h.s8.bf16 %v628_v6 }
 0x1a2   :  { %v1836_v17 = vpop.f32.mrf.mxu1  ;;  %2129 = vmatprep.subr.bf16.mxu1 %v1292_v5  ;;  %v1435_v3 = vunpack.c.h.s8.bf16 %v667_v1  ;;  %v1428_v5 = vunpack.c.l.s8.bf16 %v668_v57  ;;  %v1427_v12 = vunpack.c.l.s8.bf16 %v667_v1  ;;  %v659_v16 = vld [vmem:[#allocation6 + $0xa90] sm:$0xff]  ;;  %v700_v57 = vld [vmem:[#allocation6 + $0xbd8] sm:$0xff] }
 0x1a3   :  { %v699_v1 = vld [vmem:[#allocation6 + $0xbd0] sm:$0xff] }
 0x1a4   :  { %2105 = vmatpush2.bf16.msra.mxu0 %v1227_v14  ;;  %v1420_v14 = vunpack.c.h.s8.bf16 %v660_v7  ;;  %v692_v7 = vld [vmem:[#allocation6 + $0xb98] sm:$0xff] }
 0x1a5   :  { %2130 = vmatpush1.bf16.msra.mxu1 %v1291_v15  ;;  %2106 = vmatprep.subr.bf16.mxu0 %v1220_v19  ;;  %v627_v15 = vld [vmem:[#allocation6 + $0x990] sm:$0xff]  ;;  %v1419_v19 = vunpack.c.h.s8.bf16 %v659_v16 }
 0x1a6   :  { %2131 = vmatprep.subr.bf16.mxu1 %v1284_v20  ;;  %v1355_v17 = vunpack.c.h.s8.bf16 %v627_v15  ;;  %v1348_v20 = vunpack.c.l.s8.bf16 %v628_v6 }
 0x1a8   :  { %2107 = vmatpush2.bf16.msra.mxu0 %v1219_v59  ;;  %v652_v59 = vld [vmem:[#allocation6 + $0xa58] sm:$0xff] }
 0x1a9   :  { %2132 = vmatpush1.bf16.msra.mxu1 %v1283_v23  ;;  %2108 = vmatprep.subr.bf16.mxu0 %v1212_v26  ;;  %v1347_v23 = vunpack.c.l.s8.bf16 %v627_v15  ;;  %v1411_v26 = vunpack.c.l.s8.bf16 %v659_v16  ;;  %v1404_v30 = vunpack.c.h.s8.bf16 %v652_v59  ;;  %v1396_v18 = vunpack.c.l.s8.bf16 %v652_v59  ;;  %v723_v59 = vld [vmem:[#allocation6 + $0xc90] sm:$0xff] }
 0x1aa   :  { %2133 = vmatprep.subr.bf16.mxu1 %v1276_v29  ;;  %v1340_v29 = vunpack.c.h.s8.bf16 %v620_v22  ;;  %v1491_v15 = vunpack.c.l.s8.bf16 %v699_v1 }
 0x1ac   :  { %2109 = vmatpush2.bf16.msra.mxu0 %v1211_v31  ;;  %v651_v31 = vld [vmem:[#allocation6 + $0xa50] sm:$0xff] }
 0x1ad   :  { %2134 = vmatpush1.bf16.msra.mxu1 %v1275_v11  ;;  %2110 = vmatprep.subr.bf16.mxu0 %v1204_v34  ;;  %v1339_v11 = vunpack.c.h.s8.bf16 %v619_v38  ;;  %v1403_v34 = vunpack.c.h.s8.bf16 %v651_v31 }
 0x1ae   :  { %2135 = vmatprep.subr.bf16.mxu1 %v1268_v9  ;;  %v1332_v9 = vunpack.c.l.s8.bf16 %v620_v22  ;;  %v691_v22 = vld [vmem:[#allocation6 + $0xb90] sm:$0xff] }
 0x1b0   :  { %2111 = vmatpush2.bf16.msra.mxu0 %v1203_v41  ;;  %v644_v41 = vld [vmem:[#allocation6 + $0xa18] sm:$0xff] }
 0x1b1   :  { %2136 = vmatpush1.bf16.msra.mxu1 %v1267_v42  ;;  %2112 = vmatprep.subr.bf16.mxu0 %v1196_v45  ;;  %v1331_v42 = vunpack.c.l.s8.bf16 %v619_v38  ;;  %v1395_v45 = vunpack.c.l.s8.bf16 %v651_v31  ;;  %v1388_v49 = vunpack.c.h.s8.bf16 %v644_v41  ;;  %v1380_v56 = vunpack.c.l.s8.bf16 %v644_v41  ;;  %v716_v41 = vld [vmem:[#allocation6 + $0xc58] sm:$0xff] }
 0x1b2   :  { %2137 = vmatprep.subr.bf16.mxu1 %v1260_v47  ;;  %v1324_v47 = vunpack.c.h.s8.bf16 %v612_v40  ;;  %v1483_v38 = vunpack.c.h.s8.bf16 %v691_v22  ;;  %v1547_v31 = vunpack.c.h.s8.bf16 %v723_v59 }
 0x1b4   :  { %2113 = vmatpush2.bf16.msra.mxu0 %v1195_v51  ;;  %v643_v51 = vld [vmem:[#allocation6 + $0xa10] sm:$0xff] }
 0x1b5   :  { %2138 = vmatpush1.bf16.msra.mxu1 %v1259_v52  ;;  %2114 = vmatprep.subr.bf16.mxu0 %v1188_v53  ;;  %v1323_v52 = vunpack.c.h.s8.bf16 %v611_v55  ;;  %v1387_v53 = vunpack.c.h.s8.bf16 %v643_v51 }
 0x1b6   :  { %2139 = vmatprep.subr.bf16.mxu1 %v1252_v54  ;;  %v1316_v54 = vunpack.c.l.s8.bf16 %v612_v40  ;;  %v684_v40 = vld [vmem:[#allocation6 + $0xb58] sm:$0xff] }
 0x1b8   :  { %2115 = vmatpush2.bf16.msra.mxu0 %v1187_v58  ;;  %v732_v58 = vld [vmem:[#allocation6 + $0xcd8] sm:$0xff] }
 0x1b9   :  { %2140 = vmatpush1.bf16.msra.mxu1 %v1251_v60  ;;  %2166 = vmatprep.subr.bf16.mxu0 %v1436_v62  ;;  %v1315_v60 = vunpack.c.l.s8.bf16 %v611_v55  ;;  %v1500_v62 = vunpack.c.h.s8.bf16 %v700_v57  ;;  %v1564_v63 = vunpack.c.h.s8.bf16 %v732_v58  ;;  %v1556_v6 = vunpack.c.l.s8.bf16 %v732_v58  ;;  %v715_v55 = vld [vmem:[#allocation6 + $0xc50] sm:$0xff] }
 0x1ba   :  { %2141 = vmatprep.subr.bf16.mxu1 %v1372_v61  ;;  %v1379_v61 = vunpack.c.l.s8.bf16 %v643_v51 }
 0x1bb   :  { %2117 = vmatmul.mubr.bf16.vlgmr.msra.gmra.mxu0 %v3692_v37 }
 0x1bc   :  { %2167 = vmatpush1.bf16.msra.mxu0 %v1435_v3  ;;  %2198 = vmatprep.mubr.bf16.mxu0 %v3696_v46  ;;  %v1499_v3 = vunpack.c.h.s8.bf16 %v699_v1  ;;  %v707_v1 = vld [vmem:[#allocation6 + $0xc10] sm:$0xff] }
 0x1bd   :  { %2142 = vmatpush2.bf16.msra.mxu1 %v1371_v2  ;;  %2168 = vmatprep.subr.bf16.mxu0 %v1428_v5  ;;  %v731_v2 = vld [vmem:[#allocation6 + $0xcd0] sm:$0xff]  ;;  %v1492_v5 = vunpack.c.l.s8.bf16 %v700_v57  ;;  %v708_v57 = vld [vmem:[#allocation6 + $0xc18] sm:$0xff] }
 0x1be   :  { %2143 = vmatprep.subr.bf16.mxu1 %v1364_v4  ;;  %v1563_v4 = vunpack.c.h.s8.bf16 %v731_v2  ;;  %v1555_v16 = vunpack.c.l.s8.bf16 %v731_v2 }
 0x1c0   :  { %2169 = vmatpush1.bf16.msra.mxu0 %v1427_v12 }
 0x1c1   :  { %2144 = vmatpush2.bf16.msra.mxu1 %v1363_v10  ;;  %2170 = vmatprep.subr.bf16.mxu0 %v1420_v14  ;;  %v724_v10 = vld [vmem:[#allocation6 + $0xc98] sm:$0xff] }
 0x1c2   :  { %2145 = vmatprep.subr.bf16.mxu1 %v1356_v50 }
 0x1c4   :  { %2171 = vmatpush1.bf16.msra.mxu0 %v1419_v19 }
 0x1c5   :  { %2146 = vmatpush2.bf16.msra.mxu1 %v1355_v17  ;;  %2172 = vmatprep.subr.bf16.mxu0 %v1412_v21  ;;  %v1548_v21 = vunpack.c.h.s8.bf16 %v724_v10 }
 0x1c6   :  { %2147 = vmatprep.subr.bf16.mxu1 %v1348_v20  ;;  %v1484_v20 = vunpack.c.h.s8.bf16 %v692_v7 }
 0x1c8   :  { %2173 = vmatpush1.bf16.msra.mxu0 %v1411_v26 }
 0x1c9   :  { %2148 = vmatpush2.bf16.msra.mxu1 %v1347_v23  ;;  %2174 = vmatprep.subr.bf16.mxu0 %v1404_v30 }
 0x1ca   :  { %2149 = vmatprep.subr.bf16.mxu1 %v1340_v29 }
 0x1cc   :  { %2175 = vmatpush1.bf16.msra.mxu0 %v1403_v34 }
 0x1cd   :  { %2150 = vmatpush2.bf16.msra.mxu1 %v1339_v11  ;;  %2176 = vmatprep.subr.bf16.mxu0 %v1396_v18  ;;  %v1540_v18 = vunpack.c.l.s8.bf16 %v724_v10 }
 0x1ce   :  { %2151 = vmatprep.subr.bf16.mxu1 %v1332_v9  ;;  %v1476_v9 = vunpack.c.l.s8.bf16 %v692_v7  ;;  %v414_v7 = vld [vmem:[#allocation6 + $0x2e8] sm:$0xff] }
 0x1d0   :  { %2177 = vmatpush1.bf16.msra.mxu0 %v1395_v45  ;;  %v1468_v45 = vunpack.c.h.s8.bf16 %v684_v40 }
 0x1d1   :  { %2152 = vmatpush2.bf16.msra.mxu1 %v1331_v42  ;;  %2178 = vmatprep.subr.bf16.mxu0 %v1388_v49  ;;  %v1539_v42 = vunpack.c.l.s8.bf16 %v723_v59  ;;  %v683_v49 = vld [vmem:[#allocation6 + $0xb50] sm:$0xff]  ;;  %v406_v59 = vld [vmem:[#allocation6 + $0x2a8] sm:$0xff] }
 0x1d2   :  { %2153 = vmatprep.subr.bf16.mxu1 %v1324_v47  ;;  %v1532_v47 = vunpack.c.h.s8.bf16 %v716_v41  ;;  %v1467_v51 = vunpack.c.h.s8.bf16 %v683_v49  ;;  %v1459_v58 = vunpack.c.l.s8.bf16 %v683_v49  ;;  %v334_v49 = vld [vmem:[#allocation6 + $0x68] sm:$0xff] }
 0x1d4   :  { %2179 = vmatpush1.bf16.msra.mxu0 %v1387_v53  ;;  %v1460_v53 = vunpack.c.l.s8.bf16 %v684_v40 }
 0x1d5   :  { %2154 = vmatpush2.bf16.msra.mxu1 %v1323_v52  ;;  %2180 = vmatprep.subr.bf16.mxu0 %v1380_v56  ;;  %v1531_v52 = vunpack.c.h.s8.bf16 %v715_v55  ;;  %v676_v56 = vld [vmem:[#allocation6 + $0xb18] sm:$0xff] }
 0x1d6   :  { %2155 = vmatprep.subr.bf16.mxu1 %v1316_v54  ;;  %v1524_v54 = vunpack.c.l.s8.bf16 %v716_v41 }
 0x1d8   :  { %2181 = vmatpush1.bf16.msra.mxu0 %v1379_v61  ;;  %v1452_v61 = vunpack.c.h.s8.bf16 %v676_v56 }
 0x1d9   :  { %2156 = vmatpush2.bf16.msra.mxu1 %v1315_v60  ;;  %2182 = vmatprep.subr.bf16.mxu0 %v1500_v62  ;;  %v1523_v60 = vunpack.c.l.s8.bf16 %v715_v55  ;;  %v1516_v62 = vunpack.c.h.s8.bf16 %v708_v57  ;;  %v398_v55 = vld [vmem:[#allocation6 + $0x268] sm:$0xff] }
 0x1da   :  { %2207 = vmatprep.subr.bf16.mxu1 %v1564_v63  ;;  %v675_v63 = vld [vmem:[#allocation6 + $0xb10] sm:$0xff] }
 0x1db   :  { %v1872_v12 = vpop.f32.mrf.mxu0  ;;  %v1451_v2 = vunpack.c.h.s8.bf16 %v675_v63  ;;  %v1443_v10 = vunpack.c.l.s8.bf16 %v675_v63  ;;  %v390_v63 = vld [vmem:[#allocation6 + $0x228] sm:$0xff] }
 0x1dc   :  { %v1913_v50 = vpop.f32.mrf.mxu1  ;;  %2158 = vmatmul.mubr.bf16.vlgmr.msra.gmra.mxu1 %v3704_v25  ;;  %v1873_v14 = vadd.f32 %v1872_v12, %v3732_v8  ;;  %2183 = vmatpush2.bf16.msra.mxu0 %v1499_v3  ;;  %v1515_v3 = vunpack.c.h.s8.bf16 %v707_v1  ;;  %v1507_v12 = vunpack.c.l.s8.bf16 %v707_v1 }
 0x1dd   :  { %2208 = vmatpush1.bf16.msra.mxu1 %v1563_v4  ;;  %v1874_v17 = vpop.f32.mrf.mxu0  ;;  %2184 = vmatprep.subr.bf16.mxu0 %v1492_v5  ;;  %v1444_v4 = vunpack.c.l.s8.bf16 %v676_v56  ;;  %v1508_v5 = vunpack.c.l.s8.bf16 %v708_v57  ;;  %v397_v56 = vld [vmem:[#allocation6 + $0x260] sm:$0xff] }
 0x1de   :  { %v1915_v19 = vpop.f32.mrf.mxu1  ;;  %2209 = vmatprep.subr.bf16.mxu1 %v1556_v6  ;;  %v3742_v23 = vadd.f32 %v1913_v50, %v1873_v14  ;;  %v1875_v26 = vadd.f32 %v1874_v17, %v3736_v13  ;;  %2239 = vmatprep.mubr.bf16.mxu1 %v3527_v0  ;;  %v1475_v13 = vunpack.c.l.s8.bf16 %v691_v22  ;;  %v350_v6 = vld [vmem:[#allocation6 + $0xe8] sm:$0xff]  ;;  %v926_v14 = vunpack.c.h.s8.bf16 %v414_v7 }
 0x1df   :  { %v1876_v29 = vpop.f32.mrf.mxu0  ;;  %v798_v50 = vunpack.c.h.s8.bf16 %v350_v6  ;;  %v342_v22 = vld [vmem:[#allocation6 + $0xa8] sm:$0xff] }
 0x1e0   :  { %v1917_v8 = vpop.f32.mrf.mxu1  ;;  %v3746_v30 = vadd.f32 %v1915_v19, %v1875_v26  ;;  %2185 = vmatpush2.bf16.msra.mxu0 %v1491_v15  ;;  %v349_v15 = vld [vmem:[#allocation6 + $0xe0] sm:$0xff] }
 0x1e1   :  { %2210 = vmatpush1.bf16.msra.mxu1 %v1555_v16  ;;  %v1877_v11 = vpop.f32.mrf.mxu0  ;;  %2186 = vmatprep.subr.bf16.mxu0 %v1484_v20  ;;  %v413_v16 = vld [vmem:[#allocation6 + $0x2e0] sm:$0xff]  ;;  %v797_v17 = vunpack.c.h.s8.bf16 %v349_v15  ;;  %v790_v20 = vunpack.c.l.s8.bf16 %v350_v6  ;;  %v789_v8 = vunpack.c.l.s8.bf16 %v349_v15  ;;  %v446_v15 = vld [vmem:[#allocation6 + $0x3e8] sm:$0xff] }
 0x1e2   :  { %v1918_v34 = vpop.f32.mrf.mxu1  ;;  %2211 = vmatprep.subr.bf16.mxu1 %v1548_v21  ;;  %v925_v19 = vunpack.c.h.s8.bf16 %v413_v16  ;;  %v918_v21 = vunpack.c.l.s8.bf16 %v414_v7  ;;  %v782_v11 = vunpack.c.h.s8.bf16 %v342_v22  ;;  %v389_v6 = vld [vmem:[#allocation6 + $0x220] sm:$0xff] }
 0x1e3   :  { %v910_v34 = vunpack.c.h.s8.bf16 %v406_v59 }
 0x1e4   :  { %2187 = vmatpush2.bf16.msra.mxu0 %v1483_v38  ;;  %v917_v38 = vunpack.c.l.s8.bf16 %v413_v16 }
 0x1e5   :  { %2212 = vmatpush1.bf16.msra.mxu1 %v1547_v31  ;;  %2188 = vmatprep.subr.bf16.mxu0 %v1476_v9  ;;  %v341_v9 = vld [vmem:[#allocation6 + $0xa0] sm:$0xff] }
 0x1e6   :  { %2213 = vmatprep.subr.bf16.mxu1 %v1540_v18  ;;  %v405_v18 = vld [vmem:[#allocation6 + $0x2a0] sm:$0xff]  ;;  %v781_v41 = vunpack.c.h.s8.bf16 %v341_v9 }
 0x1e8   :  { %2189 = vmatpush2.bf16.msra.mxu0 %v1475_v13  ;;  %v909_v13 = vunpack.c.h.s8.bf16 %v405_v18 }
 0x1e9   :  { %2214 = vmatpush1.bf16.msra.mxu1 %v1539_v42  ;;  %2190 = vmatprep.subr.bf16.mxu0 %v1468_v45  ;;  %v774_v45 = vunpack.c.l.s8.bf16 %v342_v22  ;;  %v445_v22 = vld [vmem:[#allocation6 + $0x3e0] sm:$0xff] }
 0x1ea   :  { %2215 = vmatprep.subr.bf16.mxu1 %v1532_v47  ;;  %v902_v47 = vunpack.c.l.s8.bf16 %v406_v59 }
 0x1ec   :  { %2191 = vmatpush2.bf16.msra.mxu0 %v1467_v51  ;;  %v901_v51 = vunpack.c.l.s8.bf16 %v405_v18  ;;  %v981_v18 = vunpack.c.l.s8.bf16 %v445_v22 }
 0x1ed   :  { %2216 = vmatpush1.bf16.msra.mxu1 %v1531_v52  ;;  %2192 = vmatprep.subr.bf16.mxu0 %v1460_v53  ;;  %v766_v52 = vunpack.c.h.s8.bf16 %v334_v49  ;;  %v894_v53 = vunpack.c.h.s8.bf16 %v398_v55 }
 0x1ee   :  { %2217 = vmatprep.subr.bf16.mxu1 %v1524_v54  ;;  %v333_v54 = vld [vmem:[#allocation6 + $0x60] sm:$0xff] }
 0x1ef   :  { %v765_v57 = vunpack.c.h.s8.bf16 %v333_v54  ;;  %v757_v1 = vunpack.c.l.s8.bf16 %v333_v54  ;;  %v430_v54 = vld [vmem:[#allocation6 + $0x368] sm:$0xff] }
 0x1f0   :  { %2193 = vmatpush2.bf16.msra.mxu0 %v1459_v58  ;;  %v893_v58 = vunpack.c.h.s8.bf16 %v397_v56 }
 0x1f1   :  { %2218 = vmatpush1.bf16.msra.mxu1 %v1523_v60  ;;  %2194 = vmatprep.subr.bf16.mxu0 %v1452_v61  ;;  %v758_v60 = vunpack.c.l.s8.bf16 %v334_v49  ;;  %v886_v61 = vunpack.c.l.s8.bf16 %v398_v55 }
 0x1f2   :  { %2219 = vmatprep.subr.bf16.mxu1 %v1516_v62  ;;  %v326_v62 = vld [vmem:[#allocation6 + $0x28] sm:$0xff] }
 0x1f4   :  { %2195 = vmatpush2.bf16.msra.mxu0 %v1451_v2  ;;  %v885_v2 = vunpack.c.l.s8.bf16 %v397_v56 }
 0x1f5   :  { %2220 = vmatpush1.bf16.msra.mxu1 %v1515_v3  ;;  %2196 = vmatprep.subr.bf16.mxu0 %v1444_v4  ;;  %v750_v3 = vunpack.c.h.s8.bf16 %v326_v62  ;;  %v878_v4 = vunpack.c.h.s8.bf16 %v390_v63 }
 0x1f6   :  { %2221 = vmatprep.subr.bf16.mxu1 %v1508_v5  ;;  %v325_v5 = vld [vmem:[#allocation6 + $0x20] sm:$0xff] }
 0x1f7   :  { %v749_v7 = vunpack.c.h.s8.bf16 %v325_v5  ;;  %v741_v16 = vunpack.c.l.s8.bf16 %v325_v5  ;;  %v422_v5 = vld [vmem:[#allocation6 + $0x328] sm:$0xff] }
 0x1f8   :  { %2197 = vmatpush2.bf16.msra.mxu0 %v1443_v10  ;;  %v877_v10 = vunpack.c.h.s8.bf16 %v389_v6 }
 0x1f9   :  { %2222 = vmatpush1.bf16.msra.mxu1 %v1507_v12  ;;  %2248 = vmatprep.subr.bf16.mxu0 %v798_v50  ;;  %v742_v12 = vunpack.c.l.s8.bf16 %v326_v62  ;;  %v870_v50 = vunpack.c.l.s8.bf16 %v390_v63  ;;  %v429_v62 = vld [vmem:[#allocation6 + $0x360] sm:$0xff] }
 0x1fa   :  { %2289 = vmatprep.subr.bf16.mxu1 %v926_v14  ;;  %v382_v14 = vld [vmem:[#allocation6 + $0x1e8] sm:$0xff] }
 0x1fb   :  { %v1954_v26 = vpop.f32.mrf.mxu0  ;;  %2199 = vmatmul.mubr.bf16.vlgmr.msra.gmra.mxu0 %v3708_v32 }
 0x1fc   :  { %2240 = vmatmul.mubr.bf16.vlgmr.msra.gmra.mxu1 %v3718_v39  ;;  %v3751_v29 = vadd.f32 %v1954_v26, %v3742_v23  ;;  %2249 = vmatpush1.bf16.msra.mxu0 %v797_v17  ;;  %v869_v17 = vunpack.c.l.s8.bf16 %v389_v6  ;;  %v989_v26 = vunpack.c.h.s8.bf16 %v445_v22 }
 0x1fd   :  { %2290 = vmatpush1.bf16.msra.mxu1 %v925_v19  ;;  %v1956_v31 = vpop.f32.mrf.mxu0  ;;  %2250 = vmatprep.subr.bf16.mxu0 %v790_v20  ;;  %v862_v19 = vunpack.c.h.s8.bf16 %v382_v14  ;;  %v990_v20 = vunpack.c.h.s8.bf16 %v446_v15 }
 0x1fe   :  { %2291 = vmatprep.subr.bf16.mxu1 %v918_v21  ;;  %v3754_v40 = vadd.f32 %v1956_v31, %v3746_v30  ;;  %2280 = vmatprep.mubr.bf16.mxu0 %v3620_v43  ;;  %v773_v30 = vunpack.c.l.s8.bf16 %v341_v9  ;;  %v381_v21 = vld [vmem:[#allocation6 + $0x1e0] sm:$0xff]  ;;  %v374_v31 = vld [vmem:[#allocation6 + $0x1a8] sm:$0xff] }
 0x1ff   :  { %2321 = vmatprep.mubr.bf16.mxu1 %v3625_v44  ;;  %v1958_v23 = vpop.f32.mrf.mxu0  ;;  %v861_v59 = vunpack.c.h.s8.bf16 %v381_v21  ;;  %v853_v9 = vunpack.c.l.s8.bf16 %v381_v21  ;;  %v542_v21 = vld [vmem:[#allocation6 + $0x6e8] sm:$0xff] }
 0x200   :  { %2251 = vmatpush1.bf16.msra.mxu0 %v789_v8  ;;  %v854_v8 = vunpack.c.l.s8.bf16 %v382_v14  ;;  %v421_v14 = vld [vmem:[#allocation6 + $0x320] sm:$0xff] }
 0x201   :  { %2292 = vmatpush1.bf16.msra.mxu1 %v917_v38  ;;  %v1959_v42 = vpop.f32.mrf.mxu0  ;;  %2252 = vmatprep.subr.bf16.mxu0 %v782_v11  ;;  %v982_v38 = vunpack.c.l.s8.bf16 %v446_v15  ;;  %v438_v11 = vld [vmem:[#allocation6 + $0x3a8] sm:$0xff] }
 0x202   :  { %2293 = vmatprep.subr.bf16.mxu1 %v910_v34  ;;  %v373_v42 = vld [vmem:[#allocation6 + $0x1a0] sm:$0xff] }
 0x203   :  { %v845_v49 = vunpack.c.h.s8.bf16 %v373_v42  ;;  %v837_v56 = vunpack.c.l.s8.bf16 %v373_v42  ;;  %v534_v42 = vld [vmem:[#allocation6 + $0x6a8] sm:$0xff] }
 0x204   :  { %2253 = vmatpush1.bf16.msra.mxu0 %v781_v41  ;;  %v846_v41 = vunpack.c.h.s8.bf16 %v374_v31 }
 0x205   :  { %2294 = vmatpush1.bf16.msra.mxu1 %v909_v13  ;;  %2254 = vmatprep.subr.bf16.mxu0 %v774_v45  ;;  %v974_v13 = vunpack.c.h.s8.bf16 %v438_v11  ;;  %v437_v45 = vld [vmem:[#allocation6 + $0x3a0] sm:$0xff] }
 0x206   :  { %2295 = vmatprep.subr.bf16.mxu1 %v902_v47  ;;  %v973_v55 = vunpack.c.h.s8.bf16 %v437_v45 }
 0x208   :  { %2255 = vmatpush1.bf16.msra.mxu0 %v773_v30 }
 0x209   :  { %2296 = vmatpush1.bf16.msra.mxu1 %v901_v51  ;;  %2256 = vmatprep.subr.bf16.mxu0 %v766_v52  ;;  %v838_v51 = vunpack.c.l.s8.bf16 %v374_v31  ;;  %v966_v52 = vunpack.c.l.s8.bf16 %v438_v11  ;;  %v541_v31 = vld [vmem:[#allocation6 + $0x6e0] sm:$0xff] }
 0x20a   :  { %2297 = vmatprep.subr.bf16.mxu1 %v894_v53  ;;  %v366_v53 = vld [vmem:[#allocation6 + $0x168] sm:$0xff] }
 0x20c   :  { %2257 = vmatpush1.bf16.msra.mxu0 %v765_v57  ;;  %v965_v57 = vunpack.c.l.s8.bf16 %v437_v45 }
 0x20d   :  { %2298 = vmatpush1.bf16.msra.mxu1 %v893_v58  ;;  %2258 = vmatprep.subr.bf16.mxu0 %v758_v60  ;;  %v830_v58 = vunpack.c.h.s8.bf16 %v366_v53  ;;  %v958_v60 = vunpack.c.h.s8.bf16 %v430_v54 }
 0x20e   :  { %2299 = vmatprep.subr.bf16.mxu1 %v886_v61  ;;  %v365_v61 = vld [vmem:[#allocation6 + $0x160] sm:$0xff] }
 0x20f   :  { %v829_v63 = vunpack.c.h.s8.bf16 %v365_v61  ;;  %v821_v6 = vunpack.c.l.s8.bf16 %v365_v61 }
 0x210   :  { %2259 = vmatpush1.bf16.msra.mxu0 %v757_v1  ;;  %v957_v1 = vunpack.c.h.s8.bf16 %v429_v62 }
 0x211   :  { %2300 = vmatpush1.bf16.msra.mxu1 %v885_v2  ;;  %2260 = vmatprep.subr.bf16.mxu0 %v750_v3  ;;  %v822_v2 = vunpack.c.l.s8.bf16 %v366_v53  ;;  %v950_v3 = vunpack.c.l.s8.bf16 %v430_v54  ;;  %v469_v53 = vld [vmem:[#allocation6 + $0x4a0] sm:$0xff] }
 0x212   :  { %2301 = vmatprep.subr.bf16.mxu1 %v878_v4  ;;  %v358_v4 = vld [vmem:[#allocation6 + $0x128] sm:$0xff]  ;;  %v533_v54 = vld [vmem:[#allocation6 + $0x6a0] sm:$0xff] }
 0x214   :  { %2261 = vmatpush1.bf16.msra.mxu0 %v749_v7  ;;  %v949_v7 = vunpack.c.l.s8.bf16 %v429_v62  ;;  %v1158_v62 = vunpack.c.l.s8.bf16 %v534_v42 }
 0x215   :  { %2302 = vmatpush1.bf16.msra.mxu1 %v877_v10  ;;  %2262 = vmatprep.subr.bf16.mxu0 %v742_v12  ;;  %v814_v10 = vunpack.c.h.s8.bf16 %v358_v4  ;;  %v942_v12 = vunpack.c.h.s8.bf16 %v422_v5 }
 0x216   :  { %2303 = vmatprep.subr.bf16.mxu1 %v870_v50  ;;  %v357_v50 = vld [vmem:[#allocation6 + $0x120] sm:$0xff] }
 0x217   :  { %v813_v15 = vunpack.c.h.s8.bf16 %v357_v50  ;;  %v805_v22 = vunpack.c.l.s8.bf16 %v357_v50 }
 0x218   :  { %2263 = vmatpush1.bf16.msra.mxu0 %v741_v16  ;;  %v941_v16 = vunpack.c.h.s8.bf16 %v421_v14 }
 0x219   :  { %2304 = vmatpush1.bf16.msra.mxu1 %v869_v17  ;;  %2264 = vmatprep.subr.bf16.mxu0 %v862_v19  ;;  %v806_v17 = vunpack.c.l.s8.bf16 %v358_v4  ;;  %v934_v19 = vunpack.c.l.s8.bf16 %v422_v5  ;;  %v461_v5 = vld [vmem:[#allocation6 + $0x460] sm:$0xff] }
 0x21a   :  { %2305 = vmatprep.subr.bf16.mxu1 %v990_v20  ;;  %v478_v20 = vld [vmem:[#allocation6 + $0x4e8] sm:$0xff] }
 0x21c   :  { %v3758_v34 = vpop.f32.mrf.mxu1  ;;  %2265 = vmatpush2.bf16.msra.mxu0 %v861_v59  ;;  %v933_v59 = vunpack.c.l.s8.bf16 %v421_v14  ;;  %v454_v14 = vld [vmem:[#allocation6 + $0x428] sm:$0xff] }
 0x21d   :  { %2306 = vmatpush2.bf16.msra.mxu1 %v989_v26  ;;  %2266 = vmatprep.subr.bf16.mxu0 %v854_v8  ;;  %v1054_v26 = vunpack.c.h.s8.bf16 %v478_v20  ;;  %v1182_v8 = vunpack.c.h.s8.bf16 %v542_v21 }
 0x21e   :  { %v3760_v23 = vpop.f32.mrf.mxu1  ;;  %2307 = vmatprep.subr.bf16.mxu1 %v982_v38  ;;  %v477_v38 = vld [vmem:[#allocation6 + $0x4e0] sm:$0xff] }
 0x21f   :  { %v1053_v11 = vunpack.c.h.s8.bf16 %v477_v38 }
 0x220   :  { %v1999_v47 = vpop.f32.mrf.mxu1  ;;  %2267 = vmatpush2.bf16.msra.mxu0 %v853_v9  ;;  %v1181_v9 = vunpack.c.h.s8.bf16 %v541_v31 }
 0x221   :  { %2308 = vmatpush2.bf16.msra.mxu1 %v981_v18  ;;  %2268 = vmatprep.subr.bf16.mxu0 %v846_v41  ;;  %v1046_v18 = vunpack.c.l.s8.bf16 %v478_v20  ;;  %v1174_v41 = vunpack.c.l.s8.bf16 %v542_v21  ;;  %v453_v21 = vld [vmem:[#allocation6 + $0x420] sm:$0xff] }
 0x222   :  { %v2000_v30 = vpop.f32.mrf.mxu1  ;;  %2309 = vmatprep.subr.bf16.mxu1 %v974_v13  ;;  %v470_v13 = vld [vmem:[#allocation6 + $0x4a8] sm:$0xff] }
 0x223   :  { %v1030_v61 = vunpack.c.l.s8.bf16 %v470_v13 }
 0x224   :  { %2269 = vmatpush2.bf16.msra.mxu0 %v845_v49  ;;  %v1045_v49 = vunpack.c.l.s8.bf16 %v477_v38 }
 0x225   :  { %2310 = vmatpush2.bf16.msra.mxu1 %v973_v55  ;;  %2270 = vmatprep.subr.bf16.mxu0 %v838_v51  ;;  %v1173_v55 = vunpack.c.l.s8.bf16 %v541_v31  ;;  %v1038_v51 = vunpack.c.h.s8.bf16 %v470_v13  ;;  %v510_v31 = vld [vmem:[#allocation6 + $0x5e8] sm:$0xff] }
 0x226   :  { %2311 = vmatprep.subr.bf16.mxu1 %v966_v52  ;;  %v1166_v52 = vunpack.c.h.s8.bf16 %v534_v42  ;;  %v509_v42 = vld [vmem:[#allocation6 + $0x5e0] sm:$0xff] }
 0x228   :  { %2271 = vmatpush2.bf16.msra.mxu0 %v837_v56 }
 0x229   :  { %2312 = vmatpush2.bf16.msra.mxu1 %v965_v57  ;;  %2272 = vmatprep.subr.bf16.mxu0 %v830_v58  ;;  %v1037_v57 = vunpack.c.h.s8.bf16 %v469_v53  ;;  %v1165_v58 = vunpack.c.h.s8.bf16 %v533_v54 }
 0x22a   :  { %2313 = vmatprep.subr.bf16.mxu1 %v958_v60 }
 0x22c   :  { %2273 = vmatpush2.bf16.msra.mxu0 %v829_v63  ;;  %v462_v63 = vld [vmem:[#allocation6 + $0x468] sm:$0xff] }
 0x22d   :  { %2314 = vmatpush2.bf16.msra.mxu1 %v957_v1  ;;  %2274 = vmatprep.subr.bf16.mxu0 %v822_v2  ;;  %v526_v1 = vld [vmem:[#allocation6 + $0x668] sm:$0xff]  ;;  %v1157_v2 = vunpack.c.l.s8.bf16 %v533_v54 }
 0x22e   :  { %2315 = vmatprep.subr.bf16.mxu1 %v950_v3  ;;  %v1022_v3 = vunpack.c.h.s8.bf16 %v462_v63  ;;  %v1150_v4 = vunpack.c.h.s8.bf16 %v526_v1  ;;  %v1142_v50 = vunpack.c.l.s8.bf16 %v526_v1  ;;  %v565_v1 = vld [vmem:[#allocation6 + $0x7a0] sm:$0xff] }
 0x230   :  { %2275 = vmatpush2.bf16.msra.mxu0 %v821_v6  ;;  %v525_v6 = vld [vmem:[#allocation6 + $0x660] sm:$0xff] }
 0x231   :  { %2316 = vmatpush2.bf16.msra.mxu1 %v949_v7  ;;  %2276 = vmatprep.subr.bf16.mxu0 %v814_v10  ;;  %v1021_v7 = vunpack.c.h.s8.bf16 %v461_v5  ;;  %v1149_v10 = vunpack.c.h.s8.bf16 %v525_v6 }
 0x232   :  { %2317 = vmatprep.subr.bf16.mxu1 %v942_v12  ;;  %v1014_v12 = vunpack.c.l.s8.bf16 %v462_v63  ;;  %v501_v63 = vld [vmem:[#allocation6 + $0x5a0] sm:$0xff] }
 0x234   :  { %2277 = vmatpush2.bf16.msra.mxu0 %v813_v15  ;;  %v518_v15 = vld [vmem:[#allocation6 + $0x628] sm:$0xff] }
 0x235   :  { %2318 = vmatpush2.bf16.msra.mxu1 %v941_v16  ;;  %2278 = vmatprep.subr.bf16.mxu0 %v806_v17  ;;  %v1013_v16 = vunpack.c.l.s8.bf16 %v461_v5  ;;  %v1141_v17 = vunpack.c.l.s8.bf16 %v525_v6  ;;  %v1134_v20 = vunpack.c.h.s8.bf16 %v518_v15  ;;  %v1126_v38 = vunpack.c.l.s8.bf16 %v518_v15  ;;  %v493_v15 = vld [vmem:[#allocation6 + $0x560] sm:$0xff] }
 0x236   :  { %2319 = vmatprep.subr.bf16.mxu1 %v934_v19  ;;  %v1006_v19 = vunpack.c.h.s8.bf16 %v454_v14 }
 0x238   :  { %2279 = vmatpush2.bf16.msra.mxu0 %v805_v22  ;;  %v517_v22 = vld [vmem:[#allocation6 + $0x620] sm:$0xff] }
 0x239   :  { %2320 = vmatpush2.bf16.msra.mxu1 %v933_v59  ;;  %2330 = vmatprep.subr.bf16.mxu0 %v1054_v26  ;;  %v1005_v59 = vunpack.c.h.s8.bf16 %v453_v21  ;;  %v1133_v26 = vunpack.c.h.s8.bf16 %v517_v22 }
 0x23a   :  { %2371 = vmatprep.subr.bf16.mxu1 %v1182_v8  ;;  %v998_v8 = vunpack.c.l.s8.bf16 %v454_v14 }
 0x23b   :  { %v2036_v45 = vpop.f32.mrf.mxu0  ;;  %2281 = vmatmul.mubr.bf16.vlgmr.msra.gmra.mxu0 %v3639_v24 }
 0x23c   :  { %2322 = vmatmul.mubr.bf16.vlgmr.msra.gmra.mxu1 %v3649_v36  ;;  %v3765_v47 = vadd.f32 %v2036_v45, %v3758_v34  ;;  %2331 = vmatpush1.bf16.msra.mxu0 %v1053_v11  ;;  %v574_v11 = vld [vmem:[#allocation6 + $0x7e8] sm:$0xff]  ;;  %v573_v45 = vld [vmem:[#allocation6 + $0x7e0] sm:$0xff] }
 0x23d   :  { %2372 = vmatpush1.bf16.msra.mxu1 %v1181_v9  ;;  %v2038_v30 = vpop.f32.mrf.mxu0  ;;  %2332 = vmatprep.subr.bf16.mxu0 %v1046_v18  ;;  %v997_v9 = vunpack.c.l.s8.bf16 %v453_v21  ;;  %v1125_v18 = vunpack.c.l.s8.bf16 %v517_v22  ;;  %v1246_v13 = vunpack.c.h.s8.bf16 %v574_v11  ;;  %v486_v22 = vld [vmem:[#allocation6 + $0x528] sm:$0xff] }
 0x23e   :  { %2373 = vmatprep.subr.bf16.mxu1 %v1174_v41  ;;  %v3768_v56 = vadd.f32 %v2038_v30, %v3760_v23  ;;  %2362 = vmatprep.mubr.bf16.mxu0 %v3643_v33  ;;  %v1029_v23 = vunpack.c.l.s8.bf16 %v469_v53  ;;  %v1118_v41 = vunpack.c.h.s8.bf16 %v510_v31  ;;  %v1110_v30 = vunpack.c.l.s8.bf16 %v510_v31  ;;  %v566_v53 = vld [vmem:[#allocation6 + $0x7a8] sm:$0xff] }
 0x23f   :  { %2403 = vmatprep.mubr.bf16.mxu1 %v3658_v48  ;;  %v2040_v34 = vpop.f32.mrf.mxu0  ;;  %v1222_v6 = vunpack.c.l.s8.bf16 %v566_v53 }
 0x240   :  { %2333 = vmatpush1.bf16.msra.mxu0 %v1045_v49  ;;  %v1117_v49 = vunpack.c.h.s8.bf16 %v509_v42 }
 0x241   :  { %2374 = vmatpush1.bf16.msra.mxu1 %v1173_v55  ;;  %v2041_v60 = vpop.f32.mrf.mxu0  ;;  %2334 = vmatprep.subr.bf16.mxu0 %v1038_v51  ;;  %v1245_v55 = vunpack.c.h.s8.bf16 %v573_v45  ;;  %v1238_v51 = vunpack.c.l.s8.bf16 %v574_v11  ;;  %v485_v11 = vld [vmem:[#allocation6 + $0x520] sm:$0xff] }
 0x242   :  { %2375 = vmatprep.subr.bf16.mxu1 %v1166_v52  ;;  %v502_v52 = vld [vmem:[#allocation6 + $0x5a8] sm:$0xff] }
 0x243   :  { %v1094_v5 = vunpack.c.l.s8.bf16 %v502_v52 }
 0x244   :  { %2335 = vmatpush1.bf16.msra.mxu0 %v1037_v57  ;;  %v1109_v57 = vunpack.c.l.s8.bf16 %v509_v42 }
 0x245   :  { %2376 = vmatpush1.bf16.msra.mxu1 %v1165_v58  ;;  %2336 = vmatprep.subr.bf16.mxu0 %v1030_v61  ;;  %v1237_v58 = vunpack.c.l.s8.bf16 %v573_v45  ;;  %v1102_v61 = vunpack.c.h.s8.bf16 %v502_v52  ;;  %v606_v45 = vld [vmem:[#allocation6 + $0x8e8] sm:$0xff] }
 0x246   :  { %2377 = vmatprep.subr.bf16.mxu1 %v1158_v62  ;;  %v1230_v62 = vunpack.c.h.s8.bf16 %v566_v53  ;;  %v605_v53 = vld [vmem:[#allocation6 + $0x8e0] sm:$0xff] }
 0x248   :  { %2337 = vmatpush1.bf16.msra.mxu0 %v1029_v23 }
 0x249   :  { %2378 = vmatpush1.bf16.msra.mxu1 %v1157_v2  ;;  %2338 = vmatprep.subr.bf16.mxu0 %v1022_v3  ;;  %v1101_v3 = vunpack.c.h.s8.bf16 %v501_v63 }
 0x24a   :  { %2379 = vmatprep.subr.bf16.mxu1 %v1150_v4 }
 0x24c   :  { %2339 = vmatpush1.bf16.msra.mxu0 %v1021_v7  ;;  %v494_v7 = vld [vmem:[#allocation6 + $0x568] sm:$0xff] }
 0x24d   :  { %2380 = vmatpush1.bf16.msra.mxu1 %v1149_v10  ;;  %2340 = vmatprep.subr.bf16.mxu0 %v1014_v12  ;;  %v558_v10 = vld [vmem:[#allocation6 + $0x768] sm:$0xff]  ;;  %v1093_v12 = vunpack.c.l.s8.bf16 %v501_v63 }
 0x24e   :  { %2381 = vmatprep.subr.bf16.mxu1 %v1142_v50  ;;  %v1221_v50 = vunpack.c.l.s8.bf16 %v565_v1  ;;  %v1214_v14 = vunpack.c.h.s8.bf16 %v558_v10  ;;  %v1206_v21 = vunpack.c.l.s8.bf16 %v558_v10  ;;  %v662_v63 = vld [vmem:[#allocation6 + $0xaa8] sm:$0xff]  ;;  %v661_v10 = vld [vmem:[#allocation6 + $0xaa0] sm:$0xff] }
 0x250   :  { %2341 = vmatpush1.bf16.msra.mxu0 %v1013_v16  ;;  %v557_v16 = vld [vmem:[#allocation6 + $0x760] sm:$0xff] }
 0x251   :  { %2382 = vmatpush1.bf16.msra.mxu1 %v1141_v17  ;;  %2342 = vmatprep.subr.bf16.mxu0 %v1006_v19  ;;  %v1085_v17 = vunpack.c.h.s8.bf16 %v493_v15  ;;  %v1213_v19 = vunpack.c.h.s8.bf16 %v557_v16 }
 0x252   :  { %2383 = vmatprep.subr.bf16.mxu1 %v1134_v20  ;;  %v1078_v20 = vunpack.c.l.s8.bf16 %v494_v7 }
 0x254   :  { %2343 = vmatpush1.bf16.msra.mxu0 %v1005_v59  ;;  %v550_v59 = vld [vmem:[#allocation6 + $0x728] sm:$0xff] }
 0x255   :  { %2384 = vmatpush1.bf16.msra.mxu1 %v1133_v26  ;;  %2344 = vmatprep.subr.bf16.mxu0 %v998_v8  ;;  %v1077_v26 = vunpack.c.l.s8.bf16 %v493_v15  ;;  %v1205_v8 = vunpack.c.l.s8.bf16 %v557_v16  ;;  %v1198_v31 = vunpack.c.h.s8.bf16 %v550_v59  ;;  %v1190_v42 = vunpack.c.l.s8.bf16 %v550_v59  ;;  %v589_v59 = vld [vmem:[#allocation6 + $0x860] sm:$0xff] }
 0x256   :  { %2385 = vmatprep.subr.bf16.mxu1 %v1126_v38  ;;  %v1070_v38 = vunpack.c.h.s8.bf16 %v486_v22  ;;  %v1414_v16 = vunpack.c.l.s8.bf16 %v662_v63 }
 0x258   :  { %2345 = vmatpush1.bf16.msra.mxu0 %v997_v9  ;;  %v549_v9 = vld [vmem:[#allocation6 + $0x720] sm:$0xff] }
 0x259   :  { %2386 = vmatpush1.bf16.msra.mxu1 %v1125_v18  ;;  %2346 = vmatprep.subr.bf16.mxu0 %v1118_v41  ;;  %v1069_v18 = vunpack.c.h.s8.bf16 %v485_v11  ;;  %v1197_v41 = vunpack.c.h.s8.bf16 %v549_v9 }
 0x25a   :  { %2387 = vmatprep.subr.bf16.mxu1 %v1246_v13  ;;  %v1062_v13 = vunpack.c.l.s8.bf16 %v486_v22 }
 0x25c   :  { %v2077_v54 = vpop.f32.mrf.mxu1  ;;  %2347 = vmatpush2.bf16.msra.mxu0 %v1117_v49  ;;  %v670_v49 = vld [vmem:[#allocation6 + $0xae8] sm:$0xff] }
 0x25d   :  { %v3773_v34 = vadd.f32 %v2077_v54, %v3765_v47  ;;  %2388 = vmatpush2.bf16.msra.mxu1 %v1245_v55  ;;  %2348 = vmatprep.subr.bf16.mxu0 %v1110_v30  ;;  %v1229_v47 = vunpack.c.h.s8.bf16 %v565_v1  ;;  %v1061_v55 = vunpack.c.l.s8.bf16 %v485_v11  ;;  %v1189_v30 = vunpack.c.l.s8.bf16 %v549_v9  ;;  %v669_v54 = vld [vmem:[#allocation6 + $0xae0] sm:$0xff]  ;;  %v582_v9 = vld [vmem:[#allocation6 + $0x828] sm:$0xff] }
 0x25e   :  { %v2079_v60 = vpop.f32.mrf.mxu1  ;;  %2389 = vmatprep.subr.bf16.mxu1 %v1238_v51  ;;  %v1310_v51 = vunpack.c.h.s8.bf16 %v606_v45  ;;  %v1438_v52 = vunpack.c.h.s8.bf16 %v670_v49 }
 0x25f   :  { %v3776_v23 = vadd.f32 %v2079_v60, %v3768_v56  ;;  %v1086_v56 = vunpack.c.h.s8.bf16 %v494_v7  ;;  %v1302_v60 = vunpack.c.l.s8.bf16 %v606_v45  ;;  %v597_v7 = vld [vmem:[#allocation6 + $0x8a0] sm:$0xff] }
 0x260   :  { %v2081_v2 = vpop.f32.mrf.mxu1  ;;  %2349 = vmatpush2.bf16.msra.mxu0 %v1109_v57  ;;  %v1309_v57 = vunpack.c.h.s8.bf16 %v605_v53 }
 0x261   :  { %2390 = vmatpush2.bf16.msra.mxu1 %v1237_v58  ;;  %2350 = vmatprep.subr.bf16.mxu0 %v1102_v61  ;;  %v1437_v58 = vunpack.c.h.s8.bf16 %v669_v54  ;;  %v1430_v61 = vunpack.c.l.s8.bf16 %v670_v49  ;;  %v581_v49 = vld [vmem:[#allocation6 + $0x820] sm:$0xff] }
 0x262   :  { %v2082_v4 = vpop.f32.mrf.mxu1  ;;  %2391 = vmatprep.subr.bf16.mxu1 %v1230_v62  ;;  %v598_v62 = vld [vmem:[#allocation6 + $0x8a8] sm:$0xff] }
 0x263   :  { %v1286_v15 = vunpack.c.l.s8.bf16 %v598_v62 }
 0x264   :  { %2351 = vmatpush2.bf16.msra.mxu0 %v1101_v3  ;;  %v1301_v3 = vunpack.c.l.s8.bf16 %v605_v53 }
 0x265   :  { %2392 = vmatpush2.bf16.msra.mxu1 %v1229_v47  ;;  %2352 = vmatprep.subr.bf16.mxu0 %v1094_v5  ;;  %v1429_v47 = vunpack.c.l.s8.bf16 %v669_v54  ;;  %v1294_v5 = vunpack.c.h.s8.bf16 %v598_v62  ;;  %v638_v54 = vld [vmem:[#allocation6 + $0x9e8] sm:$0xff] }
 0x266   :  { %2393 = vmatprep.subr.bf16.mxu1 %v1222_v6  ;;  %v1422_v6 = vunpack.c.h.s8.bf16 %v662_v63  ;;  %v637_v63 = vld [vmem:[#allocation6 + $0x9e0] sm:$0xff] }
 0x268   :  { %2353 = vmatpush2.bf16.msra.mxu0 %v1093_v12 }
 0x269   :  { %2394 = vmatpush2.bf16.msra.mxu1 %v1221_v50  ;;  %2354 = vmatprep.subr.bf16.mxu0 %v1086_v56  ;;  %v1293_v50 = vunpack.c.h.s8.bf16 %v597_v7  ;;  %v1421_v56 = vunpack.c.h.s8.bf16 %v661_v10 }
 0x26a   :  { %2395 = vmatprep.subr.bf16.mxu1 %v1214_v14 }
 0x26c   :  { %2355 = vmatpush2.bf16.msra.mxu0 %v1085_v17  ;;  %v590_v17 = vld [vmem:[#allocation6 + $0x868] sm:$0xff] }
 0x26d   :  { %2396 = vmatpush2.bf16.msra.mxu1 %v1213_v19  ;;  %2356 = vmatprep.subr.bf16.mxu0 %v1078_v20  ;;  %v654_v19 = vld [vmem:[#allocation6 + $0xa68] sm:$0xff]  ;;  %v1413_v20 = vunpack.c.l.s8.bf16 %v661_v10 }
 0x26e   :  { %2397 = vmatprep.subr.bf16.mxu1 %v1206_v21  ;;  %v1278_v21 = vunpack.c.h.s8.bf16 %v590_v17  ;;  %v1406_v22 = vunpack.c.h.s8.bf16 %v654_v19  ;;  %v1398_v11 = vunpack.c.l.s8.bf16 %v654_v19  ;;  %v693_v19 = vld [vmem:[#allocation6 + $0xba0] sm:$0xff] }
 0x270   :  { %2357 = vmatpush2.bf16.msra.mxu0 %v1077_v26  ;;  %v653_v26 = vld [vmem:[#allocation6 + $0xa60] sm:$0xff] }
 0x271   :  { %2398 = vmatpush2.bf16.msra.mxu1 %v1205_v8  ;;  %2358 = vmatprep.subr.bf16.mxu0 %v1070_v38  ;;  %v1277_v8 = vunpack.c.h.s8.bf16 %v589_v59  ;;  %v1405_v38 = vunpack.c.h.s8.bf16 %v653_v26 }
 0x272   :  { %2399 = vmatprep.subr.bf16.mxu1 %v1198_v31  ;;  %v1270_v31 = vunpack.c.l.s8.bf16 %v590_v17  ;;  %v629_v17 = vld [vmem:[#allocation6 + $0x9a0] sm:$0xff] }
 0x274   :  { %2359 = vmatpush2.bf16.msra.mxu0 %v1069_v18  ;;  %v646_v18 = vld [vmem:[#allocation6 + $0xa28] sm:$0xff] }
 0x275   :  { %2400 = vmatpush2.bf16.msra.mxu1 %v1197_v41  ;;  %2360 = vmatprep.subr.bf16.mxu0 %v1062_v13  ;;  %v1269_v41 = vunpack.c.l.s8.bf16 %v589_v59  ;;  %v1397_v13 = vunpack.c.l.s8.bf16 %v653_v26  ;;  %v1390_v45 = vunpack.c.h.s8.bf16 %v646_v18  ;;  %v1382_v53 = vunpack.c.l.s8.bf16 %v646_v18  ;;  %v621_v18 = vld [vmem:[#allocation6 + $0x960] sm:$0xff] }
 0x276   :  { %2401 = vmatprep.subr.bf16.mxu1 %v1190_v42  ;;  %v1262_v42 = vunpack.c.h.s8.bf16 %v582_v9 }
 0x278   :  { %2361 = vmatpush2.bf16.msra.mxu0 %v1061_v55  ;;  %v645_v55 = vld [vmem:[#allocation6 + $0xa20] sm:$0xff] }
 0x279   :  { %2402 = vmatpush2.bf16.msra.mxu1 %v1189_v30  ;;  %2412 = vmatprep.subr.bf16.mxu0 %v1310_v51  ;;  %v1261_v30 = vunpack.c.h.s8.bf16 %v581_v49  ;;  %v1389_v51 = vunpack.c.h.s8.bf16 %v645_v55 }
 0x27a   :  { %2453 = vmatprep.subr.bf16.mxu1 %v1438_v52  ;;  %v1254_v52 = vunpack.c.l.s8.bf16 %v582_v9 }
 0x27b   :  { %v2118_v1 = vpop.f32.mrf.mxu0  ;;  %2363 = vmatmul.mubr.bf16.vlgmr.msra.gmra.mxu0 %v3685_v28 }
 0x27c   :  { %2404 = vmatmul.mubr.bf16.vlgmr.msra.gmra.mxu1 %v3692_v37  ;;  %v3781_v2 = vadd.f32 %v2118_v1, %v3773_v34  ;;  %2413 = vmatpush1.bf16.msra.mxu0 %v1309_v57  ;;  %v702_v57 = vld [vmem:[#allocation6 + $0xbe8] sm:$0xff]  ;;  %v701_v1 = vld [vmem:[#allocation6 + $0xbe0] sm:$0xff] }
 0x27d   :  { %2454 = vmatpush1.bf16.msra.mxu1 %v1437_v58  ;;  %v2120_v4 = vpop.f32.mrf.mxu0  ;;  %2414 = vmatprep.subr.bf16.mxu0 %v1302_v60  ;;  %v1253_v58 = vunpack.c.l.s8.bf16 %v581_v49  ;;  %v1381_v60 = vunpack.c.l.s8.bf16 %v645_v55  ;;  %v1502_v62 = vunpack.c.h.s8.bf16 %v702_v57  ;;  %v614_v55 = vld [vmem:[#allocation6 + $0x928] sm:$0xff] }
 0x27e   :  { %2455 = vmatprep.subr.bf16.mxu1 %v1430_v61  ;;  %v3784_v12 = vadd.f32 %v2120_v4, %v3776_v23  ;;  %2444 = vmatprep.mubr.bf16.mxu0 %v3688_v35  ;;  %v1285_v23 = vunpack.c.l.s8.bf16 %v597_v7  ;;  %v1374_v61 = vunpack.c.h.s8.bf16 %v638_v54  ;;  %v1366_v4 = vunpack.c.l.s8.bf16 %v638_v54  ;;  %v694_v7 = vld [vmem:[#allocation6 + $0xba8] sm:$0xff] }
 0x27f   :  { %2485 = vmatprep.mubr.bf16.mxu1 %v3696_v46  ;;  %v2122_v34 = vpop.f32.mrf.mxu0  ;;  %v1478_v26 = vunpack.c.l.s8.bf16 %v694_v7 }
 0x280   :  { %2415 = vmatpush1.bf16.msra.mxu0 %v1301_v3  ;;  %v1373_v3 = vunpack.c.h.s8.bf16 %v637_v63 }
 0x281   :  { %2456 = vmatpush1.bf16.msra.mxu1 %v1429_v47  ;;  %v2123_v14 = vpop.f32.mrf.mxu0  ;;  %2416 = vmatprep.subr.bf16.mxu0 %v1294_v5  ;;  %v1501_v47 = vunpack.c.h.s8.bf16 %v701_v1  ;;  %v1494_v5 = vunpack.c.l.s8.bf16 %v702_v57  ;;  %v613_v57 = vld [vmem:[#allocation6 + $0x920] sm:$0xff] }
 0x282   :  { %2457 = vmatprep.subr.bf16.mxu1 %v1422_v6  ;;  %v630_v6 = vld [vmem:[#allocation6 + $0x9a8] sm:$0xff] }
 0x283   :  { %v1350_v59 = vunpack.c.l.s8.bf16 %v630_v6 }
 0x284   :  { %2417 = vmatpush1.bf16.msra.mxu0 %v1293_v50  ;;  %v1365_v50 = vunpack.c.l.s8.bf16 %v637_v63 }
 0x285   :  { %2458 = vmatpush1.bf16.msra.mxu1 %v1421_v56  ;;  %2418 = vmatprep.subr.bf16.mxu0 %v1286_v15  ;;  %v1493_v56 = vunpack.c.l.s8.bf16 %v701_v1  ;;  %v1358_v15 = vunpack.c.h.s8.bf16 %v630_v6  ;;  %v734_v1 = vld [vmem:[#allocation6 + $0xce8] sm:$0xff] }
 0x286   :  { %2459 = vmatprep.subr.bf16.mxu1 %v1414_v16  ;;  %v1486_v16 = vunpack.c.h.s8.bf16 %v694_v7  ;;  %v733_v7 = vld [vmem:[#allocation6 + $0xce0] sm:$0xff] }
 0x288   :  { %2419 = vmatpush1.bf16.msra.mxu0 %v1285_v23 }
 0x289   :  { %2460 = vmatpush1.bf16.msra.mxu1 %v1413_v20  ;;  %2420 = vmatprep.subr.bf16.mxu0 %v1278_v21  ;;  %v1357_v21 = vunpack.c.h.s8.bf16 %v629_v17 }
 0x28a   :  { %2461 = vmatprep.subr.bf16.mxu1 %v1406_v22 }
 0x28c   :  { %2421 = vmatpush1.bf16.msra.mxu0 %v1277_v8  ;;  %v622_v8 = vld [vmem:[#allocation6 + $0x968] sm:$0xff] }
 0x28d   :  { %2462 = vmatpush1.bf16.msra.mxu1 %v1405_v38  ;;  %2422 = vmatprep.subr.bf16.mxu0 %v1270_v31  ;;  %v686_v38 = vld [vmem:[#allocation6 + $0xb68] sm:$0xff]  ;;  %v1349_v31 = vunpack.c.l.s8.bf16 %v629_v17  ;;  %v344_v17 = vld [vmem:[#allocation6 + $0xb8] sm:$0xff] }
 0x28e   :  { %2463 = vmatprep.subr.bf16.mxu1 %v1398_v11  ;;  %v1477_v11 = vunpack.c.l.s8.bf16 %v693_v19  ;;  %v1470_v9 = vunpack.c.h.s8.bf16 %v686_v38  ;;  %v1462_v49 = vunpack.c.l.s8.bf16 %v686_v38  ;;  %v784_v38 = vunpack.c.h.s8.bf16 %v344_v17 }
 0x290   :  { %2423 = vmatpush1.bf16.msra.mxu0 %v1269_v41  ;;  %v685_v41 = vld [vmem:[#allocation6 + $0xb60] sm:$0xff] }
 0x291   :  { %2464 = vmatpush1.bf16.msra.mxu1 %v1397_v13  ;;  %2424 = vmatprep.subr.bf16.mxu0 %v1262_v42  ;;  %v1341_v13 = vunpack.c.h.s8.bf16 %v621_v18  ;;  %v1469_v42 = vunpack.c.h.s8.bf16 %v685_v41 }
 0x292   :  { %2465 = vmatprep.subr.bf16.mxu1 %v1390_v45  ;;  %v1334_v45 = vunpack.c.l.s8.bf16 %v622_v8 }
 0x294   :  { %2425 = vmatpush1.bf16.msra.mxu0 %v1261_v30  ;;  %v678_v30 = vld [vmem:[#allocation6 + $0xb28] sm:$0xff] }
 0x295   :  { %2466 = vmatpush1.bf16.msra.mxu1 %v1389_v51  ;;  %2426 = vmatprep.subr.bf16.mxu0 %v1254_v52  ;;  %v1333_v51 = vunpack.c.l.s8.bf16 %v621_v18  ;;  %v1461_v52 = vunpack.c.l.s8.bf16 %v685_v41  ;;  %v1454_v54 = vunpack.c.h.s8.bf16 %v678_v30  ;;  %v1446_v63 = vunpack.c.l.s8.bf16 %v678_v30 }
 0x296   :  { %2467 = vmatprep.subr.bf16.mxu1 %v1382_v53  ;;  %v1326_v53 = vunpack.c.h.s8.bf16 %v614_v55  ;;  %v776_v30 = vunpack.c.l.s8.bf16 %v344_v17  ;;  %v416_v17 = vld [vmem:[#allocation6 + $0x2f8] sm:$0xff] }
 0x298   :  { %2427 = vmatpush1.bf16.msra.mxu0 %v1253_v58  ;;  %v677_v58 = vld [vmem:[#allocation6 + $0xb20] sm:$0xff] }
 0x299   :  { %2468 = vmatpush1.bf16.msra.mxu1 %v1381_v60  ;;  %2428 = vmatprep.subr.bf16.mxu0 %v1374_v61  ;;  %v1325_v60 = vunpack.c.h.s8.bf16 %v613_v57  ;;  %v1453_v61 = vunpack.c.h.s8.bf16 %v677_v58 }
 0x29a   :  { %2469 = vmatprep.subr.bf16.mxu1 %v1502_v62  ;;  %v1318_v62 = vunpack.c.l.s8.bf16 %v614_v55 }
 0x29c   :  { %v2159_v10 = vpop.f32.mrf.mxu1  ;;  %2429 = vmatpush2.bf16.msra.mxu0 %v1373_v3  ;;  %v352_v3 = vld [vmem:[#allocation6 + $0xf8] sm:$0xff] }
 0x29d   :  { %v3789_v34 = vadd.f32 %v2159_v10, %v3781_v2  ;;  %2470 = vmatpush2.bf16.msra.mxu1 %v1501_v47  ;;  %2430 = vmatprep.subr.bf16.mxu0 %v1366_v4  ;;  %v1485_v2 = vunpack.c.h.s8.bf16 %v693_v19  ;;  %v1317_v47 = vunpack.c.l.s8.bf16 %v613_v57  ;;  %v1445_v4 = vunpack.c.l.s8.bf16 %v677_v58  ;;  %v351_v10 = vld [vmem:[#allocation6 + $0xf0] sm:$0xff]  ;;  %v717_v57 = vld [vmem:[#allocation6 + $0xc60] sm:$0xff] }
 0x29e   :  { %v2161_v14 = vpop.f32.mrf.mxu1  ;;  %2471 = vmatprep.subr.bf16.mxu1 %v1494_v5  ;;  %v1566_v5 = vunpack.c.h.s8.bf16 %v734_v1  ;;  %v800_v6 = vunpack.c.h.s8.bf16 %v352_v3  ;;  %v335_v58 = vld [vmem:[#allocation6 + $0x70] sm:$0xff] }
 0x29f   :  { %v3792_v23 = vadd.f32 %v2161_v14, %v3784_v12  ;;  %v1342_v12 = vunpack.c.h.s8.bf16 %v622_v8  ;;  %v1558_v14 = vunpack.c.l.s8.bf16 %v734_v1  ;;  %v710_v1 = vld [vmem:[#allocation6 + $0xc28] sm:$0xff] }
 0x2a0   :  { %v2163_v20 = vpop.f32.mrf.mxu1  ;;  %2431 = vmatpush2.bf16.msra.mxu0 %v1365_v50  ;;  %v1565_v50 = vunpack.c.h.s8.bf16 %v733_v7 }
 0x2a1   :  { %2472 = vmatpush2.bf16.msra.mxu1 %v1493_v56  ;;  %2432 = vmatprep.subr.bf16.mxu0 %v1358_v15  ;;  %v799_v56 = vunpack.c.h.s8.bf16 %v351_v10  ;;  %v792_v15 = vunpack.c.l.s8.bf16 %v352_v3  ;;  %v328_v3 = vld [vmem:[#allocation6 + $0x38] sm:$0xff] }
 0x2a2   :  { %v2164_v22 = vpop.f32.mrf.mxu1  ;;  %2473 = vmatprep.subr.bf16.mxu1 %v1486_v16  ;;  %v726_v16 = vld [vmem:[#allocation6 + $0xca8] sm:$0xff] }
 0x2a3   :  { %v791_v22 = vunpack.c.l.s8.bf16 %v351_v10  ;;  %v1550_v8 = vunpack.c.h.s8.bf16 %v726_v16  ;;  %v1542_v55 = vunpack.c.l.s8.bf16 %v726_v16  ;;  %v327_v10 = vld [vmem:[#allocation6 + $0x30] sm:$0xff]  ;;  %v384_v16 = vld [vmem:[#allocation6 + $0x1f8] sm:$0xff] }
 0x2a4   :  { %2433 = vmatpush2.bf16.msra.mxu0 %v1357_v21 }
 0x2a5   :  { %2474 = vmatpush2.bf16.msra.mxu1 %v1485_v2  ;;  %2434 = vmatprep.subr.bf16.mxu0 %v1350_v59  ;;  %v1557_v2 = vunpack.c.l.s8.bf16 %v733_v7  ;;  %v709_v7 = vld [vmem:[#allocation6 + $0xc20] sm:$0xff] }
 0x2a6   :  { %2475 = vmatprep.subr.bf16.mxu1 %v1478_v26 }
 0x2a8   :  { %2435 = vmatpush2.bf16.msra.mxu0 %v1349_v31  ;;  %v725_v31 = vld [vmem:[#allocation6 + $0xca0] sm:$0xff] }
 0x2a9   :  { %2476 = vmatpush2.bf16.msra.mxu1 %v1477_v11  ;;  %2436 = vmatprep.subr.bf16.mxu0 %v1342_v12  ;;  %v343_v11 = vld [vmem:[#allocation6 + $0xb0] sm:$0xff] }
 0x2aa   :  { %2477 = vmatprep.subr.bf16.mxu1 %v1470_v9 }
 0x2ac   :  { %2437 = vmatpush2.bf16.msra.mxu0 %v1341_v13  ;;  %v1549_v13 = vunpack.c.h.s8.bf16 %v725_v31 }
 0x2ad   :  { %2478 = vmatpush2.bf16.msra.mxu1 %v1469_v42  ;;  %2438 = vmatprep.subr.bf16.mxu0 %v1334_v45  ;;  %v783_v42 = vunpack.c.h.s8.bf16 %v343_v11 }
 0x2ae   :  { %2479 = vmatprep.subr.bf16.mxu1 %v1462_v49 }
 0x2b0   :  { %2439 = vmatpush2.bf16.msra.mxu0 %v1333_v51  ;;  %v718_v51 = vld [vmem:[#allocation6 + $0xc68] sm:$0xff] }
 0x2b1   :  { %2480 = vmatpush2.bf16.msra.mxu1 %v1461_v52  ;;  %2440 = vmatprep.subr.bf16.mxu0 %v1326_v53  ;;  %v1541_v52 = vunpack.c.l.s8.bf16 %v725_v31  ;;  %v1534_v53 = vunpack.c.h.s8.bf16 %v718_v51  ;;  %v920_v31 = vunpack.c.l.s8.bf16 %v416_v17 }
 0x2b2   :  { %2481 = vmatprep.subr.bf16.mxu1 %v1454_v54 }
 0x2b4   :  { %2441 = vmatpush2.bf16.msra.mxu0 %v1325_v60  ;;  %v1533_v60 = vunpack.c.h.s8.bf16 %v717_v57 }
 0x2b5   :  { %2482 = vmatpush2.bf16.msra.mxu1 %v1453_v61  ;;  %2442 = vmatprep.subr.bf16.mxu0 %v1318_v62  ;;  %v767_v61 = vunpack.c.h.s8.bf16 %v335_v58  ;;  %v1526_v62 = vunpack.c.l.s8.bf16 %v718_v51 }
 0x2b6   :  { %2483 = vmatprep.subr.bf16.mxu1 %v1446_v63 }
 0x2b8   :  { %2443 = vmatpush2.bf16.msra.mxu0 %v1317_v47  ;;  %v1525_v47 = vunpack.c.l.s8.bf16 %v717_v57 }
 0x2b9   :  { %2484 = vmatpush2.bf16.msra.mxu1 %v1445_v4  ;;  %2494 = vmatprep.subr.bf16.mxu0 %v1566_v5  ;;  %v759_v4 = vunpack.c.l.s8.bf16 %v335_v58  ;;  %v1518_v5 = vunpack.c.h.s8.bf16 %v710_v1 }
 0x2ba   :  { %2535 = vmatprep.subr.bf16.mxu1 %v800_v6  ;;  %v752_v6 = vunpack.c.h.s8.bf16 %v328_v3 }
 0x2bb   :  { %v2200_v19 = vpop.f32.mrf.mxu0  ;;  %2445 = vmatmul.mubr.bf16.vlgmr.msra.gmra.mxu0 %v3704_v25 }
 0x2bc   :  { %v2241_v20 = vpop.f32.mrf.mxu1  ;;  %2486 = vmatmul.mubr.bf16.vlgmr.msra.gmra.mxu1 %v3708_v32  ;;  %v2201_v21 = vadd.f32 %v2200_v19, %v3789_v34  ;;  %2495 = vmatpush1.bf16.msra.mxu0 %v1565_v50  ;;  %v1517_v50 = vunpack.c.h.s8.bf16 %v709_v7  ;;  %v1509_v19 = vunpack.c.l.s8.bf16 %v709_v7 }
 0x2bd   :  { %2536 = vmatpush1.bf16.msra.mxu1 %v799_v56  ;;  %v2202_v59 = vpop.f32.mrf.mxu0  ;;  %2496 = vmatprep.subr.bf16.mxu0 %v1558_v14  ;;  %v751_v56 = vunpack.c.h.s8.bf16 %v327_v10  ;;  %v1510_v14 = vunpack.c.l.s8.bf16 %v710_v1 }
 0x2be   :  { %v2243_v26 = vpop.f32.mrf.mxu1  ;;  %2537 = vmatprep.subr.bf16.mxu1 %v792_v15  ;;  %v3797_v12 = vadd.f32 %v2241_v20, %v2201_v21  ;;  %v2203_v9 = vadd.f32 %v2202_v59, %v3792_v23  ;;  %2526 = vmatprep.mubr.bf16.mxu0 %v3527_v0  ;;  %v336_v23 = vld [vmem:[#allocation6 + $0x78] sm:$0xff]  ;;  %v744_v15 = vunpack.c.l.s8.bf16 %v328_v3  ;;  %v743_v20 = vunpack.c.l.s8.bf16 %v327_v10  ;;  %v415_v59 = vld [vmem:[#allocation6 + $0x2f0] sm:$0xff] }
 0x2bf   :  { %2567 = vmatprep.mubr.bf16.mxu1 %v3620_v43  ;;  %v2204_v34 = vpop.f32.mrf.mxu0  ;;  %v775_v43 = vunpack.c.l.s8.bf16 %v343_v11  ;;  %v768_v54 = vunpack.c.h.s8.bf16 %v336_v23  ;;  %v760_v63 = vunpack.c.l.s8.bf16 %v336_v23  ;;  %v864_v21 = vunpack.c.h.s8.bf16 %v384_v16  ;;  %v376_v11 = vld [vmem:[#allocation6 + $0x1b8] sm:$0xff]  ;;  %v359_v10 = vld [vmem:[#allocation6 + $0x130] sm:$0xff] }
 0x2c0   :  { %v2245_v18 = vpop.f32.mrf.mxu1  ;;  %v3802_v41 = vadd.f32 %v2243_v26, %v2203_v9  ;;  %2497 = vmatpush1.bf16.msra.mxu0 %v1557_v2  ;;  %v928_v2 = vunpack.c.h.s8.bf16 %v416_v17  ;;  %v408_v9 = vld [vmem:[#allocation6 + $0x2b8] sm:$0xff]  ;;  %v840_v51 = vunpack.c.l.s8.bf16 %v376_v11 }
 0x2c1   :  { %2538 = vmatpush1.bf16.msra.mxu1 %v791_v22  ;;  %v2205_v45 = vpop.f32.mrf.mxu0  ;;  %2498 = vmatprep.subr.bf16.mxu0 %v1550_v8  ;;  %v383_v22 = vld [vmem:[#allocation6 + $0x1f0] sm:$0xff]  ;;  %v927_v8 = vunpack.c.h.s8.bf16 %v415_v59  ;;  %v919_v18 = vunpack.c.l.s8.bf16 %v415_v59  ;;  %v904_v23 = vunpack.c.l.s8.bf16 %v408_v9  ;;  %v360_v3 = vld [vmem:[#allocation6 + $0x138] sm:$0xff] }
 0x2c2   :  { %v2246_v49 = vpop.f32.mrf.mxu1  ;;  %2539 = vmatprep.subr.bf16.mxu1 %v784_v38  ;;  %v863_v26 = vunpack.c.h.s8.bf16 %v383_v22  ;;  %v856_v38 = vunpack.c.l.s8.bf16 %v384_v16  ;;  %v855_v34 = vunpack.c.l.s8.bf16 %v383_v22  ;;  %v375_v45 = vld [vmem:[#allocation6 + $0x1b0] sm:$0xff]  ;;  %v448_v17 = vld [vmem:[#allocation6 + $0x3f8] sm:$0xff] }
 0x2c3   :  { %v407_v49 = vld [vmem:[#allocation6 + $0x2b0] sm:$0xff] }
 0x2c4   :  { %2499 = vmatpush1.bf16.msra.mxu0 %v1549_v13  ;;  %v848_v13 = vunpack.c.h.s8.bf16 %v376_v11  ;;  %v447_v59 = vld [vmem:[#allocation6 + $0x3f0] sm:$0xff] }
 0x2c5   :  { %2540 = vmatpush1.bf16.msra.mxu1 %v783_v42  ;;  %2500 = vmatprep.subr.bf16.mxu0 %v1542_v55  ;;  %v912_v42 = vunpack.c.h.s8.bf16 %v408_v9  ;;  %v847_v55 = vunpack.c.h.s8.bf16 %v375_v45  ;;  %v440_v9 = vld [vmem:[#allocation6 + $0x3b8] sm:$0xff] }
 0x2c6   :  { %2541 = vmatprep.subr.bf16.mxu1 %v776_v30  ;;  %v911_v30 = vunpack.c.h.s8.bf16 %v407_v49 }
 0x2c8   :  { %2501 = vmatpush1.bf16.msra.mxu0 %v1541_v52  ;;  %v368_v52 = vld [vmem:[#allocation6 + $0x178] sm:$0xff] }
 0x2c9   :  { %2542 = vmatpush1.bf16.msra.mxu1 %v775_v43  ;;  %2502 = vmatprep.subr.bf16.mxu0 %v1534_v53  ;;  %v400_v43 = vld [vmem:[#allocation6 + $0x278] sm:$0xff]  ;;  %v839_v53 = vunpack.c.l.s8.bf16 %v375_v45  ;;  %v832_v57 = vunpack.c.h.s8.bf16 %v368_v52  ;;  %v983_v45 = vunpack.c.l.s8.bf16 %v447_v59 }
 0x2ca   :  { %2543 = vmatprep.subr.bf16.mxu1 %v768_v54  ;;  %v903_v54 = vunpack.c.l.s8.bf16 %v407_v49  ;;  %v896_v58 = vunpack.c.h.s8.bf16 %v400_v43  ;;  %v888_v1 = vunpack.c.l.s8.bf16 %v400_v43  ;;  %v471_v43 = vld [vmem:[#allocation6 + $0x4b0] sm:$0xff] }
 0x2cc   :  { %2503 = vmatpush1.bf16.msra.mxu0 %v1533_v60  ;;  %v367_v60 = vld [vmem:[#allocation6 + $0x170] sm:$0xff] }
 0x2cd   :  { %2544 = vmatpush1.bf16.msra.mxu1 %v767_v61  ;;  %2504 = vmatprep.subr.bf16.mxu0 %v1526_v62  ;;  %v831_v61 = vunpack.c.h.s8.bf16 %v367_v60 }
 0x2ce   :  { %2545 = vmatprep.subr.bf16.mxu1 %v760_v63  ;;  %v824_v63 = vunpack.c.l.s8.bf16 %v368_v52  ;;  %v439_v52 = vld [vmem:[#allocation6 + $0x3b0] sm:$0xff] }
 0x2d0   :  { %2505 = vmatpush1.bf16.msra.mxu0 %v1525_v47  ;;  %v392_v47 = vld [vmem:[#allocation6 + $0x238] sm:$0xff] }
 0x2d1   :  { %2546 = vmatpush1.bf16.msra.mxu1 %v759_v4  ;;  %2506 = vmatprep.subr.bf16.mxu0 %v1518_v5  ;;  %v823_v4 = vunpack.c.l.s8.bf16 %v367_v60  ;;  %v880_v7 = vunpack.c.h.s8.bf16 %v392_v47  ;;  %v872_v16 = vunpack.c.l.s8.bf16 %v392_v47  ;;  %v1031_v47 = vunpack.c.l.s8.bf16 %v471_v43 }
 0x2d2   :  { %2547 = vmatprep.subr.bf16.mxu1 %v752_v6  ;;  %v816_v6 = vunpack.c.h.s8.bf16 %v360_v3 }
 0x2d4   :  { %2507 = vmatpush1.bf16.msra.mxu0 %v1517_v50  ;;  %v391_v50 = vld [vmem:[#allocation6 + $0x230] sm:$0xff] }
 0x2d5   :  { %2548 = vmatpush1.bf16.msra.mxu1 %v751_v56  ;;  %2508 = vmatprep.subr.bf16.mxu0 %v1510_v14  ;;  %v815_v56 = vunpack.c.h.s8.bf16 %v359_v10  ;;  %v879_v14 = vunpack.c.h.s8.bf16 %v391_v50 }
 0x2d6   :  { %2549 = vmatprep.subr.bf16.mxu1 %v744_v15  ;;  %v808_v15 = vunpack.c.l.s8.bf16 %v360_v3  ;;  %v967_v3 = vunpack.c.l.s8.bf16 %v439_v52 }
 0x2d8   :  { %2509 = vmatpush1.bf16.msra.mxu0 %v1509_v19  ;;  %v480_v19 = vld [vmem:[#allocation6 + $0x4f8] sm:$0xff] }
 0x2d9   :  { %2550 = vmatpush1.bf16.msra.mxu1 %v743_v20  ;;  %2576 = vmatprep.subr.bf16.mxu0 %v928_v2  ;;  %v807_v20 = vunpack.c.l.s8.bf16 %v359_v10  ;;  %v992_v2 = vunpack.c.h.s8.bf16 %v448_v17  ;;  %v1056_v22 = vunpack.c.h.s8.bf16 %v480_v19  ;;  %v1048_v11 = vunpack.c.l.s8.bf16 %v480_v19 }
 0x2da   :  { %2551 = vmatprep.subr.bf16.mxu1 %v864_v21  ;;  %v871_v21 = vunpack.c.l.s8.bf16 %v391_v50 }
 0x2db   :  { %2527 = vmatmul.mubr.bf16.vlgmr.msra.gmra.mxu0 %v3718_v39 }
 0x2dc   :  { %2577 = vmatpush1.bf16.msra.mxu0 %v927_v8  ;;  %2608 = vmatprep.mubr.bf16.mxu0 %v3625_v44  ;;  %v399_v44 = vld [vmem:[#allocation6 + $0x270] sm:$0xff]  ;;  %v991_v8 = vunpack.c.h.s8.bf16 %v447_v59 }
 0x2dd   :  { %2552 = vmatpush2.bf16.msra.mxu1 %v863_v26  ;;  %2578 = vmatprep.subr.bf16.mxu0 %v920_v31  ;;  %v895_v62 = vunpack.c.h.s8.bf16 %v399_v44  ;;  %v887_v5 = vunpack.c.l.s8.bf16 %v399_v44  ;;  %v479_v26 = vld [vmem:[#allocation6 + $0x4f0] sm:$0xff]  ;;  %v984_v31 = vunpack.c.l.s8.bf16 %v448_v17 }
 0x2de   :  { %2553 = vmatprep.subr.bf16.mxu1 %v856_v38  ;;  %v1055_v38 = vunpack.c.h.s8.bf16 %v479_v26  ;;  %v1047_v49 = vunpack.c.l.s8.bf16 %v479_v26 }
 0x2e0   :  { %2579 = vmatpush1.bf16.msra.mxu0 %v919_v18 }
 0x2e1   :  { %2554 = vmatpush2.bf16.msra.mxu1 %v855_v34  ;;  %2580 = vmatprep.subr.bf16.mxu0 %v912_v42  ;;  %v472_v34 = vld [vmem:[#allocation6 + $0x4b8] sm:$0xff] }
 0x2e2   :  { %2555 = vmatprep.subr.bf16.mxu1 %v848_v13 }
 0x2e4   :  { %2581 = vmatpush1.bf16.msra.mxu0 %v911_v30 }
 0x2e5   :  { %2556 = vmatpush2.bf16.msra.mxu1 %v847_v55  ;;  %2582 = vmatprep.subr.bf16.mxu0 %v904_v23  ;;  %v1040_v23 = vunpack.c.h.s8.bf16 %v472_v34 }
 0x2e6   :  { %2557 = vmatprep.subr.bf16.mxu1 %v840_v51  ;;  %v976_v51 = vunpack.c.h.s8.bf16 %v440_v9 }
 0x2e8   :  { %2583 = vmatpush1.bf16.msra.mxu0 %v903_v54 }
 0x2e9   :  { %2558 = vmatpush2.bf16.msra.mxu1 %v839_v53  ;;  %2584 = vmatprep.subr.bf16.mxu0 %v896_v58  ;;  %v1039_v58 = vunpack.c.h.s8.bf16 %v471_v43 }
 0x2ea   :  { %2559 = vmatprep.subr.bf16.mxu1 %v832_v57  ;;  %v975_v57 = vunpack.c.h.s8.bf16 %v439_v52  ;;  %v536_v52 = vld [vmem:[#allocation6 + $0x6b8] sm:$0xff] }
 0x2ec   :  { %2585 = vmatpush1.bf16.msra.mxu0 %v895_v62  ;;  %v1032_v62 = vunpack.c.l.s8.bf16 %v472_v34 }
 0x2ed   :  { %2560 = vmatpush2.bf16.msra.mxu1 %v831_v61  ;;  %2586 = vmatprep.subr.bf16.mxu0 %v888_v1  ;;  %v968_v61 = vunpack.c.l.s8.bf16 %v440_v9  ;;  %v464_v1 = vld [vmem:[#allocation6 + $0x478] sm:$0xff] }
 0x2ee   :  { %2561 = vmatprep.subr.bf16.mxu1 %v824_v63  ;;  %v432_v63 = vld [vmem:[#allocation6 + $0x378] sm:$0xff] }
 0x2ef   :  { %v952_v50 = vunpack.c.l.s8.bf16 %v432_v63 }
 0x2f0   :  { %2587 = vmatpush1.bf16.msra.mxu0 %v887_v5  ;;  %v431_v5 = vld [vmem:[#allocation6 + $0x370] sm:$0xff] }
 0x2f1   :  { %2562 = vmatpush2.bf16.msra.mxu1 %v823_v4  ;;  %2588 = vmatprep.subr.bf16.mxu0 %v880_v7  ;;  %v1024_v4 = vunpack.c.h.s8.bf16 %v464_v1  ;;  %v959_v7 = vunpack.c.h.s8.bf16 %v431_v5 }
 0x2f2   :  { %2563 = vmatprep.subr.bf16.mxu1 %v816_v6  ;;  %v463_v6 = vld [vmem:[#allocation6 + $0x470] sm:$0xff] }
 0x2f3   :  { %v1023_v10 = vunpack.c.h.s8.bf16 %v463_v6  ;;  %v1015_v17 = vunpack.c.l.s8.bf16 %v463_v6 }
 0x2f4   :  { %2589 = vmatpush1.bf16.msra.mxu0 %v879_v14  ;;  %v424_v14 = vld [vmem:[#allocation6 + $0x338] sm:$0xff] }
 0x2f5   :  { %2564 = vmatpush2.bf16.msra.mxu1 %v815_v56  ;;  %2590 = vmatprep.subr.bf16.mxu0 %v872_v16  ;;  %v1016_v56 = vunpack.c.l.s8.bf16 %v464_v1  ;;  %v951_v16 = vunpack.c.l.s8.bf16 %v431_v5  ;;  %v944_v19 = vunpack.c.h.s8.bf16 %v424_v14  ;;  %v936_v26 = vunpack.c.l.s8.bf16 %v424_v14  ;;  %v528_v1 = vld [vmem:[#allocation6 + $0x678] sm:$0xff]  ;;  %v495_v5 = vld [vmem:[#allocation6 + $0x570] sm:$0xff] }
 0x2f6   :  { %2565 = vmatprep.subr.bf16.mxu1 %v808_v15  ;;  %v456_v15 = vld [vmem:[#allocation6 + $0x438] sm:$0xff]  ;;  %v1087_v6 = vunpack.c.h.s8.bf16 %v495_v5 }
 0x2f7   :  { %v520_v14 = vld [vmem:[#allocation6 + $0x638] sm:$0xff] }
 0x2f8   :  { %2591 = vmatpush1.bf16.msra.mxu0 %v871_v21  ;;  %v423_v21 = vld [vmem:[#allocation6 + $0x330] sm:$0xff] }
 0x2f9   :  { %2566 = vmatpush2.bf16.msra.mxu1 %v807_v20  ;;  %2592 = vmatprep.subr.bf16.mxu0 %v992_v2  ;;  %v1008_v20 = vunpack.c.h.s8.bf16 %v456_v15  ;;  %v455_v2 = vld [vmem:[#allocation6 + $0x430] sm:$0xff] }
 0x2fa   :  { %2617 = vmatprep.subr.bf16.mxu1 %v1056_v22  ;;  %v943_v22 = vunpack.c.h.s8.bf16 %v423_v21  ;;  %v1007_v59 = vunpack.c.h.s8.bf16 %v455_v2  ;;  %v999_v9 = vunpack.c.l.s8.bf16 %v455_v2 }
 0x2fb   :  { %v2282_v18 = vpop.f32.mrf.mxu0 }
 0x2fc   :  { %v2323_v13 = vpop.f32.mrf.mxu1  ;;  %2568 = vmatmul.mubr.bf16.vlgmr.msra.gmra.mxu1 %v3639_v24  ;;  %2593 = vmatpush2.bf16.msra.mxu0 %v991_v8  ;;  %v1000_v8 = vunpack.c.l.s8.bf16 %v456_v15  ;;  %v1079_v15 = vunpack.c.l.s8.bf16 %v495_v5 }
 0x2fd   :  { %v3807_v42 = vadd.f32 %v2323_v13, %v2282_v18  ;;  %2618 = vmatpush1.bf16.msra.mxu1 %v1055_v38  ;;  %v2284_v55 = vpop.f32.mrf.mxu0  ;;  %2594 = vmatprep.subr.bf16.mxu0 %v984_v31  ;;  %v512_v38 = vld [vmem:[#allocation6 + $0x5f8] sm:$0xff]  ;;  %v511_v13 = vld [vmem:[#allocation6 + $0x5f0] sm:$0xff] }
 0x2fe   :  { %v2325_v30 = vpop.f32.mrf.mxu1  ;;  %2619 = vmatprep.subr.bf16.mxu1 %v1048_v11  ;;  %2649 = vmatprep.mubr.bf16.mxu1 %v3643_v33  ;;  %v960_v33 = vunpack.c.h.s8.bf16 %v432_v63  ;;  %v544_v31 = vld [vmem:[#allocation6 + $0x6f8] sm:$0xff]  ;;  %v935_v11 = vunpack.c.l.s8.bf16 %v423_v21  ;;  %v1120_v34 = vunpack.c.h.s8.bf16 %v512_v38  ;;  %v1111_v43 = vunpack.c.l.s8.bf16 %v511_v13  ;;  %v519_v21 = vld [vmem:[#allocation6 + $0x630] sm:$0xff] }
 0x2ff   :  { %v3809_v53 = vadd.f32 %v2325_v30, %v2284_v55  ;;  %v2286_v54 = vpop.f32.mrf.mxu0  ;;  %v1184_v18 = vunpack.c.h.s8.bf16 %v544_v31  ;;  %v1112_v30 = vunpack.c.l.s8.bf16 %v512_v38  ;;  %v496_v63 = vld [vmem:[#allocation6 + $0x578] sm:$0xff] }
 0x300   :  { %v2327_v24 = vpop.f32.mrf.mxu1  ;;  %2595 = vmatpush2.bf16.msra.mxu0 %v983_v45  ;;  %v543_v45 = vld [vmem:[#allocation6 + $0x6f0] sm:$0xff]  ;;  %v608_v38 = vld [vmem:[#allocation6 + $0x8f8] sm:$0xff] }
 0x301   :  { %2620 = vmatpush1.bf16.msra.mxu1 %v1047_v49  ;;  %v2287_v60 = vpop.f32.mrf.mxu0  ;;  %2596 = vmatprep.subr.bf16.mxu0 %v976_v51  ;;  %v1119_v49 = vunpack.c.h.s8.bf16 %v511_v13  ;;  %v1183_v55 = vunpack.c.h.s8.bf16 %v543_v45  ;;  %v1176_v51 = vunpack.c.l.s8.bf16 %v544_v31  ;;  %v1175_v54 = vunpack.c.l.s8.bf16 %v543_v45  ;;  %v607_v13 = vld [vmem:[#allocation6 + $0x8f0] sm:$0xff] }
 0x302   :  { %v2328_v44 = vpop.f32.mrf.mxu1  ;;  %2621 = vmatprep.subr.bf16.mxu1 %v1040_v23  ;;  %v504_v23 = vld [vmem:[#allocation6 + $0x5b8] sm:$0xff]  ;;  %v535_v60 = vld [vmem:[#allocation6 + $0x6b0] sm:$0xff] }
 0x303   :  { %v1104_v24 = vunpack.c.h.s8.bf16 %v504_v23 }
 0x304   :  { %2597 = vmatpush2.bf16.msra.mxu0 %v975_v57  ;;  %v1168_v57 = vunpack.c.h.s8.bf16 %v536_v52 }
 0x305   :  { %2622 = vmatpush1.bf16.msra.mxu1 %v1039_v58  ;;  %2598 = vmatprep.subr.bf16.mxu0 %v968_v61  ;;  %v503_v58 = vld [vmem:[#allocation6 + $0x5b0] sm:$0xff]  ;;  %v1167_v61 = vunpack.c.h.s8.bf16 %v535_v60 }
 0x306   :  { %2623 = vmatprep.subr.bf16.mxu1 %v1032_v62  ;;  %v1103_v44 = vunpack.c.h.s8.bf16 %v503_v58  ;;  %v1096_v62 = vunpack.c.l.s8.bf16 %v504_v23  ;;  %v600_v23 = vld [vmem:[#allocation6 + $0x8b8] sm:$0xff] }
 0x308   :  { %2599 = vmatpush2.bf16.msra.mxu0 %v967_v3  ;;  %v1095_v3 = vunpack.c.l.s8.bf16 %v503_v58 }
 0x309   :  { %2624 = vmatpush1.bf16.msra.mxu1 %v1031_v47  ;;  %2600 = vmatprep.subr.bf16.mxu0 %v960_v33  ;;  %v1159_v47 = vunpack.c.l.s8.bf16 %v535_v60  ;;  %v1088_v33 = vunpack.c.h.s8.bf16 %v496_v63 }
 0x30a   :  { %2625 = vmatprep.subr.bf16.mxu1 %v1024_v4  ;;  %v1152_v4 = vunpack.c.h.s8.bf16 %v528_v1 }
 0x30c   :  { %2601 = vmatpush2.bf16.msra.mxu0 %v959_v7 }
 0x30d   :  { %2626 = vmatpush1.bf16.msra.mxu1 %v1023_v10  ;;  %2602 = vmatprep.subr.bf16.mxu0 %v952_v50  ;;  %v1080_v10 = vunpack.c.l.s8.bf16 %v496_v63  ;;  %v1144_v50 = vunpack.c.l.s8.bf16 %v528_v1 }
 0x30e   :  { %2627 = vmatprep.subr.bf16.mxu1 %v1016_v56  ;;  %v488_v56 = vld [vmem:[#allocation6 + $0x538] sm:$0xff] }
 0x310   :  { %2603 = vmatpush2.bf16.msra.mxu0 %v951_v16 }
 0x311   :  { %2628 = vmatpush1.bf16.msra.mxu1 %v1015_v17  ;;  %2604 = vmatprep.subr.bf16.mxu0 %v944_v19  ;;  %v1072_v17 = vunpack.c.h.s8.bf16 %v488_v56  ;;  %v1136_v19 = vunpack.c.h.s8.bf16 %v520_v14 }
 0x312   :  { %2629 = vmatprep.subr.bf16.mxu1 %v1008_v20  ;;  %v487_v20 = vld [vmem:[#allocation6 + $0x530] sm:$0xff] }
 0x313   :  { %v1071_v2 = vunpack.c.h.s8.bf16 %v487_v20  ;;  %v1063_v31 = vunpack.c.l.s8.bf16 %v487_v20 }
 0x314   :  { %2605 = vmatpush2.bf16.msra.mxu0 %v943_v22  ;;  %v1135_v22 = vunpack.c.h.s8.bf16 %v519_v21 }
 0x315   :  { %2630 = vmatpush1.bf16.msra.mxu1 %v1007_v59  ;;  %2606 = vmatprep.subr.bf16.mxu0 %v936_v26  ;;  %v1064_v59 = vunpack.c.l.s8.bf16 %v488_v56  ;;  %v1128_v26 = vunpack.c.l.s8.bf16 %v520_v14  ;;  %v559_v14 = vld [vmem:[#allocation6 + $0x770] sm:$0xff] }
 0x316   :  { %2631 = vmatprep.subr.bf16.mxu1 %v1000_v8  ;;  %v576_v8 = vld [vmem:[#allocation6 + $0x7f8] sm:$0xff] }
 0x318   :  { %2607 = vmatpush2.bf16.msra.mxu0 %v935_v11  ;;  %v1127_v11 = vunpack.c.l.s8.bf16 %v519_v21  ;;  %v552_v21 = vld [vmem:[#allocation6 + $0x738] sm:$0xff] }
 0x319   :  { %2632 = vmatpush1.bf16.msra.mxu1 %v999_v9  ;;  %2658 = vmatprep.subr.bf16.mxu0 %v1184_v18  ;;  %v1248_v9 = vunpack.c.h.s8.bf16 %v576_v8  ;;  %v575_v18 = vld [vmem:[#allocation6 + $0x7f0] sm:$0xff] }
 0x31a   :  { %2633 = vmatprep.subr.bf16.mxu1 %v1120_v34  ;;  %v1312_v34 = vunpack.c.h.s8.bf16 %v608_v38  ;;  %v1247_v45 = vunpack.c.h.s8.bf16 %v575_v18 }
 0x31b   :  { %2609 = vmatmul.mubr.bf16.vlgmr.msra.gmra.mxu0 %v3649_v36  ;;  %v1160_v36 = vunpack.c.l.s8.bf16 %v536_v52 }
 0x31c   :  { %2659 = vmatpush1.bf16.msra.mxu0 %v1183_v55  ;;  %2690 = vmatprep.mubr.bf16.mxu0 %v3658_v48  ;;  %v527_v48 = vld [vmem:[#allocation6 + $0x670] sm:$0xff]  ;;  %v1240_v55 = vunpack.c.l.s8.bf16 %v576_v8 }
 0x31d   :  { %2634 = vmatpush2.bf16.msra.mxu1 %v1119_v49  ;;  %2660 = vmatprep.subr.bf16.mxu0 %v1176_v51  ;;  %v1151_v7 = vunpack.c.h.s8.bf16 %v527_v48  ;;  %v1143_v16 = vunpack.c.l.s8.bf16 %v527_v48  ;;  %v1311_v49 = vunpack.c.h.s8.bf16 %v607_v13  ;;  %v568_v51 = vld [vmem:[#allocation6 + $0x7b8] sm:$0xff] }
 0x31e   :  { %2635 = vmatprep.subr.bf16.mxu1 %v1112_v30  ;;  %v1304_v30 = vunpack.c.l.s8.bf16 %v608_v38  ;;  %v1224_v48 = vunpack.c.l.s8.bf16 %v568_v51  ;;  %v551_v38 = vld [vmem:[#allocation6 + $0x730] sm:$0xff] }
 0x320   :  { %2661 = vmatpush1.bf16.msra.mxu0 %v1175_v54 }
 0x321   :  { %2636 = vmatpush2.bf16.msra.mxu1 %v1111_v43  ;;  %2662 = vmatprep.subr.bf16.mxu0 %v1168_v57  ;;  %v1303_v57 = vunpack.c.l.s8.bf16 %v607_v13  ;;  %v640_v13 = vld [vmem:[#allocation6 + $0x9f8] sm:$0xff] }
 0x322   :  { %2637 = vmatprep.subr.bf16.mxu1 %v1104_v24  ;;  %v1239_v24 = vunpack.c.l.s8.bf16 %v575_v18 }
 0x324   :  { %2663 = vmatpush1.bf16.msra.mxu0 %v1167_v61  ;;  %v1296_v61 = vunpack.c.h.s8.bf16 %v600_v23 }
 0x325   :  { %2638 = vmatpush2.bf16.msra.mxu1 %v1103_v44  ;;  %2664 = vmatprep.subr.bf16.mxu0 %v1160_v36  ;;  %v1232_v44 = vunpack.c.h.s8.bf16 %v568_v51  ;;  %v599_v36 = vld [vmem:[#allocation6 + $0x8b0] sm:$0xff] }
 0x326   :  { %2639 = vmatprep.subr.bf16.mxu1 %v1096_v62  ;;  %v567_v62 = vld [vmem:[#allocation6 + $0x7b0] sm:$0xff] }
 0x328   :  { %2665 = vmatpush1.bf16.msra.mxu0 %v1159_v47  ;;  %v1231_v47 = vunpack.c.h.s8.bf16 %v567_v62 }
 0x329   :  { %2640 = vmatpush2.bf16.msra.mxu1 %v1095_v3  ;;  %2666 = vmatprep.subr.bf16.mxu0 %v1152_v4 }
 0x32a   :  { %2641 = vmatprep.subr.bf16.mxu1 %v1088_v33  ;;  %v1295_v33 = vunpack.c.h.s8.bf16 %v599_v36 }
 0x32c   :  { %2667 = vmatpush1.bf16.msra.mxu0 %v1151_v7  ;;  %v560_v7 = vld [vmem:[#allocation6 + $0x778] sm:$0xff] }
 0x32d   :  { %2642 = vmatpush2.bf16.msra.mxu1 %v1087_v6  ;;  %2668 = vmatprep.subr.bf16.mxu0 %v1144_v50  ;;  %v1288_v6 = vunpack.c.l.s8.bf16 %v600_v23  ;;  %v1216_v50 = vunpack.c.h.s8.bf16 %v560_v7  ;;  %v639_v23 = vld [vmem:[#allocation6 + $0x9f0] sm:$0xff] }
 0x32e   :  { %2643 = vmatprep.subr.bf16.mxu1 %v1080_v10  ;;  %v592_v10 = vld [vmem:[#allocation6 + $0x878] sm:$0xff] }
 0x32f   :  { %v1280_v56 = vunpack.c.h.s8.bf16 %v592_v10  ;;  %v1272_v20 = vunpack.c.l.s8.bf16 %v592_v10 }
 0x330   :  { %2669 = vmatpush1.bf16.msra.mxu0 %v1143_v16  ;;  %v1215_v16 = vunpack.c.h.s8.bf16 %v559_v14 }
 0x331   :  { %2644 = vmatpush2.bf16.msra.mxu1 %v1079_v15  ;;  %2670 = vmatprep.subr.bf16.mxu0 %v1136_v19  ;;  %v591_v15 = vld [vmem:[#allocation6 + $0x870] sm:$0xff]  ;;  %v1208_v19 = vunpack.c.l.s8.bf16 %v560_v7 }
 0x332   :  { %2645 = vmatprep.subr.bf16.mxu1 %v1072_v17  ;;  %v1279_v17 = vunpack.c.h.s8.bf16 %v591_v15 }
 0x334   :  { %2671 = vmatpush1.bf16.msra.mxu0 %v1135_v22  ;;  %v1207_v22 = vunpack.c.l.s8.bf16 %v559_v14 }
 0x335   :  { %2646 = vmatpush2.bf16.msra.mxu1 %v1071_v2  ;;  %2672 = vmatprep.subr.bf16.mxu0 %v1128_v26  ;;  %v584_v2 = vld [vmem:[#allocation6 + $0x838] sm:$0xff]  ;;  %v1200_v26 = vunpack.c.h.s8.bf16 %v552_v21 }
 0x336   :  { %2647 = vmatprep.subr.bf16.mxu1 %v1064_v59  ;;  %v1271_v59 = vunpack.c.l.s8.bf16 %v591_v15  ;;  %v1264_v8 = vunpack.c.h.s8.bf16 %v584_v2  ;;  %v1256_v18 = vunpack.c.l.s8.bf16 %v584_v2  ;;  %v616_v15 = vld [vmem:[#allocation6 + $0x938] sm:$0xff]  ;;  %v615_v2 = vld [vmem:[#allocation6 + $0x930] sm:$0xff] }
 0x338   :  { %2673 = vmatpush1.bf16.msra.mxu0 %v1127_v11  ;;  %v1199_v11 = vunpack.c.h.s8.bf16 %v551_v38 }
 0x339   :  { %2648 = vmatpush2.bf16.msra.mxu1 %v1063_v31  ;;  %2674 = vmatprep.subr.bf16.mxu0 %v1248_v9  ;;  %v583_v31 = vld [vmem:[#allocation6 + $0x830] sm:$0xff] }
 0x33a   :  { %2699 = vmatprep.subr.bf16.mxu1 %v1312_v34  ;;  %v1263_v9 = vunpack.c.h.s8.bf16 %v583_v31  ;;  %v1192_v34 = vunpack.c.l.s8.bf16 %v552_v21 }
 0x33b   :  { %v2364_v52 = vpop.f32.mrf.mxu0 }
 0x33c   :  { %v2405_v43 = vpop.f32.mrf.mxu1  ;;  %2650 = vmatmul.mubr.bf16.vlgmr.msra.gmra.mxu1 %v3685_v28  ;;  %v2365_v54 = vadd.f32 %v2364_v52, %v3807_v42  ;;  %2675 = vmatpush2.bf16.msra.mxu0 %v1247_v45  ;;  %v672_v45 = vld [vmem:[#allocation6 + $0xaf8] sm:$0xff]  ;;  %v671_v52 = vld [vmem:[#allocation6 + $0xaf0] sm:$0xff] }
 0x33d   :  { %2700 = vmatpush1.bf16.msra.mxu1 %v1311_v49  ;;  %v2366_v58 = vpop.f32.mrf.mxu0  ;;  %2676 = vmatprep.subr.bf16.mxu0 %v1240_v55  ;;  %v1191_v49 = vunpack.c.l.s8.bf16 %v551_v38  ;;  %v1255_v55 = vunpack.c.l.s8.bf16 %v583_v31  ;;  %v1440_v51 = vunpack.c.h.s8.bf16 %v672_v45  ;;  %v704_v31 = vld [vmem:[#allocation6 + $0xbf8] sm:$0xff] }
 0x33e   :  { %v2407_v60 = vpop.f32.mrf.mxu1  ;;  %2701 = vmatprep.subr.bf16.mxu1 %v1304_v30  ;;  %v3816_v63 = vadd.f32 %v2405_v43, %v2365_v54  ;;  %v2367_v1 = vadd.f32 %v2366_v58, %v3809_v53  ;;  %2731 = vmatprep.mubr.bf16.mxu1 %v3688_v35  ;;  %v1223_v53 = vunpack.c.l.s8.bf16 %v567_v62  ;;  %v1287_v35 = vunpack.c.l.s8.bf16 %v599_v36  ;;  %v632_v58 = vld [vmem:[#allocation6 + $0x9b8] sm:$0xff] }
 0x33f   :  { %v2368_v28 = vpop.f32.mrf.mxu0  ;;  %v1376_v30 = vunpack.c.h.s8.bf16 %v640_v13  ;;  %v1375_v43 = vunpack.c.h.s8.bf16 %v639_v23  ;;  %v1439_v54 = vunpack.c.h.s8.bf16 %v671_v52  ;;  %v1360_v62 = vunpack.c.h.s8.bf16 %v632_v58 }
 0x340   :  { %v2409_v42 = vpop.f32.mrf.mxu1  ;;  %v3820_v3 = vadd.f32 %v2407_v60, %v2367_v1  ;;  %2677 = vmatpush2.bf16.msra.mxu0 %v1239_v24  ;;  %v1368_v24 = vunpack.c.l.s8.bf16 %v640_v13  ;;  %v664_v60 = vld [vmem:[#allocation6 + $0xab8] sm:$0xff]  ;;  %v631_v1 = vld [vmem:[#allocation6 + $0x9b0] sm:$0xff] }
 0x341   :  { %2702 = vmatpush1.bf16.msra.mxu1 %v1303_v57  ;;  %v2369_v4 = vpop.f32.mrf.mxu0  ;;  %2678 = vmatprep.subr.bf16.mxu0 %v1232_v44  ;;  %v1432_v57 = vunpack.c.l.s8.bf16 %v672_v45  ;;  %v1367_v44 = vunpack.c.l.s8.bf16 %v639_v23  ;;  %v1424_v36 = vunpack.c.h.s8.bf16 %v664_v60  ;;  %v663_v28 = vld [vmem:[#allocation6 + $0xab0] sm:$0xff]  ;;  %v1359_v42 = vunpack.c.h.s8.bf16 %v631_v1 }
 0x342   :  { %v2410_v5 = vpop.f32.mrf.mxu1  ;;  %2703 = vmatprep.subr.bf16.mxu1 %v1296_v61  ;;  %v1431_v61 = vunpack.c.l.s8.bf16 %v671_v52  ;;  %v624_v4 = vld [vmem:[#allocation6 + $0x978] sm:$0xff]  ;;  %v703_v45 = vld [vmem:[#allocation6 + $0xbf0] sm:$0xff] }
 0x343   :  { %v656_v5 = vld [vmem:[#allocation6 + $0xa78] sm:$0xff]  ;;  %v1344_v7 = vunpack.c.h.s8.bf16 %v624_v4 }
 0x344   :  { %2679 = vmatpush2.bf16.msra.mxu0 %v1231_v47  ;;  %v1423_v47 = vunpack.c.h.s8.bf16 %v663_v28  ;;  %v1408_v10 = vunpack.c.h.s8.bf16 %v656_v5  ;;  %v1400_v14 = vunpack.c.l.s8.bf16 %v656_v5  ;;  %v696_v52 = vld [vmem:[#allocation6 + $0xbb8] sm:$0xff] }
 0x345   :  { %2704 = vmatpush1.bf16.msra.mxu1 %v1295_v33  ;;  %2680 = vmatprep.subr.bf16.mxu0 %v1224_v48  ;;  %v1352_v33 = vunpack.c.l.s8.bf16 %v632_v58  ;;  %v1351_v48 = vunpack.c.l.s8.bf16 %v631_v1  ;;  %v1495_v58 = vunpack.c.l.s8.bf16 %v703_v45  ;;  %v695_v1 = vld [vmem:[#allocation6 + $0xbb0] sm:$0xff]  ;;  %v1480_v5 = vunpack.c.l.s8.bf16 %v696_v52 }
 0x346   :  { %2705 = vmatprep.subr.bf16.mxu1 %v1288_v6  ;;  %v1415_v6 = vunpack.c.l.s8.bf16 %v663_v28  ;;  %v727_v28 = vld [vmem:[#allocation6 + $0xcb0] sm:$0xff] }
 0x348   :  { %2681 = vmatpush2.bf16.msra.mxu0 %v1223_v53  ;;  %v623_v53 = vld [vmem:[#allocation6 + $0x970] sm:$0xff] }
 0x349   :  { %2706 = vmatpush1.bf16.msra.mxu1 %v1287_v35  ;;  %2682 = vmatprep.subr.bf16.mxu0 %v1216_v50  ;;  %v1343_v35 = vunpack.c.h.s8.bf16 %v623_v53 }
 0x34a   :  { %2707 = vmatprep.subr.bf16.mxu1 %v1280_v56  ;;  %v1336_v56 = vunpack.c.l.s8.bf16 %v624_v4 }
 0x34c   :  { %2683 = vmatpush2.bf16.msra.mxu0 %v1215_v16  ;;  %v648_v16 = vld [vmem:[#allocation6 + $0xa38] sm:$0xff] }
 0x34d   :  { %2708 = vmatpush1.bf16.msra.mxu1 %v1279_v17  ;;  %2684 = vmatprep.subr.bf16.mxu0 %v1208_v19  ;;  %v1335_v17 = vunpack.c.l.s8.bf16 %v623_v53  ;;  %v1392_v21 = vunpack.c.h.s8.bf16 %v648_v16  ;;  %v1384_v38 = vunpack.c.l.s8.bf16 %v648_v16  ;;  %v1543_v53 = vunpack.c.l.s8.bf16 %v727_v28 }
 0x34e   :  { %2709 = vmatprep.subr.bf16.mxu1 %v1272_v20  ;;  %v1328_v20 = vunpack.c.h.s8.bf16 %v616_v15 }
 0x350   :  { %2685 = vmatpush2.bf16.msra.mxu0 %v1207_v22  ;;  %v647_v22 = vld [vmem:[#allocation6 + $0xa30] sm:$0xff] }
 0x351   :  { %2710 = vmatpush1.bf16.msra.mxu1 %v1271_v59  ;;  %2686 = vmatprep.subr.bf16.mxu0 %v1200_v26  ;;  %v1327_v59 = vunpack.c.h.s8.bf16 %v615_v2  ;;  %v1391_v26 = vunpack.c.h.s8.bf16 %v647_v22 }
 0x352   :  { %2711 = vmatprep.subr.bf16.mxu1 %v1264_v8  ;;  %v1320_v8 = vunpack.c.l.s8.bf16 %v616_v15 }
 0x354   :  { %2687 = vmatpush2.bf16.msra.mxu0 %v1199_v11  ;;  %v736_v11 = vld [vmem:[#allocation6 + $0xcf8] sm:$0xff] }
 0x355   :  { %2712 = vmatpush1.bf16.msra.mxu1 %v1263_v9  ;;  %2688 = vmatprep.subr.bf16.mxu0 %v1192_v34  ;;  %v1319_v9 = vunpack.c.l.s8.bf16 %v615_v2  ;;  %v1383_v34 = vunpack.c.l.s8.bf16 %v647_v22  ;;  %v1568_v13 = vunpack.c.h.s8.bf16 %v736_v11  ;;  %v1560_v23 = vunpack.c.l.s8.bf16 %v736_v11  ;;  %v680_v2 = vld [vmem:[#allocation6 + $0xb38] sm:$0xff] }
 0x356   :  { %2713 = vmatprep.subr.bf16.mxu1 %v1256_v18  ;;  %v1504_v18 = vunpack.c.h.s8.bf16 %v704_v31  ;;  %v712_v22 = vld [vmem:[#allocation6 + $0xc38] sm:$0xff] }
 0x357   :  { %v1520_v11 = vunpack.c.h.s8.bf16 %v712_v22 }
 0x358   :  { %2689 = vmatpush2.bf16.msra.mxu0 %v1191_v49  ;;  %v735_v49 = vld [vmem:[#allocation6 + $0xcf0] sm:$0xff] }
 0x359   :  { %2714 = vmatpush1.bf16.msra.mxu1 %v1255_v55  ;;  %2740 = vmatprep.subr.bf16.mxu0 %v1440_v51  ;;  %v1503_v55 = vunpack.c.h.s8.bf16 %v703_v45  ;;  %v1496_v51 = vunpack.c.l.s8.bf16 %v704_v31  ;;  %v1456_v31 = vunpack.c.h.s8.bf16 %v680_v2 }
 0x35a   :  { %2715 = vmatprep.subr.bf16.mxu1 %v1376_v30  ;;  %v1567_v30 = vunpack.c.h.s8.bf16 %v735_v49 }
 0x35b   :  { %2691 = vmatmul.mubr.bf16.vlgmr.msra.gmra.mxu0 %v3692_v37  ;;  %v1416_v37 = vunpack.c.l.s8.bf16 %v664_v60  ;;  %v1559_v60 = vunpack.c.l.s8.bf16 %v735_v49 }
 0x35c   :  { %2741 = vmatpush1.bf16.msra.mxu0 %v1439_v54  ;;  %2772 = vmatprep.mubr.bf16.mxu0 %v3696_v46  ;;  %v655_v46 = vld [vmem:[#allocation6 + $0xa70] sm:$0xff] }
 0x35d   :  { %2716 = vmatpush2.bf16.msra.mxu1 %v1375_v43  ;;  %2742 = vmatprep.subr.bf16.mxu0 %v1432_v57  ;;  %v1407_v50 = vunpack.c.h.s8.bf16 %v655_v46  ;;  %v1399_v19 = vunpack.c.l.s8.bf16 %v655_v46  ;;  %v728_v43 = vld [vmem:[#allocation6 + $0xcb8] sm:$0xff] }
 0x35e   :  { %2717 = vmatprep.subr.bf16.mxu1 %v1368_v24 }
 0x360   :  { %2743 = vmatpush1.bf16.msra.mxu0 %v1431_v61 }
 0x361   :  { %2718 = vmatpush2.bf16.msra.mxu1 %v1367_v44  ;;  %2744 = vmatprep.subr.bf16.mxu0 %v1424_v36  ;;  %v1552_v36 = vunpack.c.h.s8.bf16 %v728_v43 }
 0x362   :  { %2719 = vmatprep.subr.bf16.mxu1 %v1360_v62  ;;  %v1488_v62 = vunpack.c.h.s8.bf16 %v696_v52 }
 0x364   :  { %2745 = vmatpush1.bf16.msra.mxu0 %v1423_v47  ;;  %v1487_v47 = vunpack.c.h.s8.bf16 %v695_v1 }
 0x365   :  { %2720 = vmatpush2.bf16.msra.mxu1 %v1359_v42  ;;  %2746 = vmatprep.subr.bf16.mxu0 %v1416_v37 }
 0x366   :  { %2721 = vmatprep.subr.bf16.mxu1 %v1352_v33  ;;  %v1551_v33 = vunpack.c.h.s8.bf16 %v727_v28 }
 0x368   :  { %2747 = vmatpush1.bf16.msra.mxu0 %v1415_v6  ;;  %v688_v6 = vld [vmem:[#allocation6 + $0xb78] sm:$0xff] }
 0x369   :  { %2722 = vmatpush2.bf16.msra.mxu1 %v1351_v48  ;;  %2748 = vmatprep.subr.bf16.mxu0 %v1408_v10  ;;  %v1544_v48 = vunpack.c.l.s8.bf16 %v728_v43  ;;  %v1479_v10 = vunpack.c.l.s8.bf16 %v695_v1  ;;  %v2937_v43 = vld [vmem:[#allocation11 + $0x38] sm:$0xff] }
 0x36a   :  { %2723 = vmatprep.subr.bf16.mxu1 %v1344_v7  ;;  %v720_v7 = vld [vmem:[#allocation6 + $0xc78] sm:$0xff] }
 0x36b   :  { %v1536_v46 = vunpack.c.h.s8.bf16 %v720_v7 }
 0x36c   :  { %2749 = vmatpush1.bf16.msra.mxu0 %v1407_v50  ;;  %v719_v50 = vld [vmem:[#allocation6 + $0xc70] sm:$0xff] }
 0x36d   :  { %2724 = vmatpush2.bf16.msra.mxu1 %v1343_v35  ;;  %2750 = vmatprep.subr.bf16.mxu0 %v1400_v14  ;;  %v687_v35 = vld [vmem:[#allocation6 + $0xb70] sm:$0xff]  ;;  %v2838_v14 = vsub.s32 3, %v3593_v27  ;;  %v1535_v16 = vunpack.c.h.s8.bf16 %v719_v50 }
 0x36e   :  { %2725 = vmatprep.subr.bf16.mxu1 %v1336_v56  ;;  %v2830_v56 = vsub.s32 1, %v3593_v27  ;;  %v1471_v15 = vunpack.c.h.s8.bf16 %v687_v35 }
 0x370   :  { %2751 = vmatpush1.bf16.msra.mxu0 %v1399_v19  ;;  %v1464_v19 = vunpack.c.l.s8.bf16 %v688_v6 }
 0x371   :  { %2726 = vmatpush2.bf16.msra.mxu1 %v1335_v17  ;;  %2752 = vmatprep.subr.bf16.mxu0 %v1392_v21  ;;  %v3835_v17 = vld [vmem:[#allocation8] sm:$0xff] }
 0x372   :  { %2727 = vmatprep.subr.bf16.mxu1 %v1328_v20  ;;  %v1528_v20 = vunpack.c.l.s8.bf16 %v720_v7  ;;  %v2831_v21 = vrot.slane %v3835_v17, %v2830_v56 }
 0x374   :  { %2753 = vmatpush1.bf16.msra.mxu0 %v1391_v26  ;;  %v1463_v26 = vunpack.c.l.s8.bf16 %v687_v35  ;;  %v2940_v35 = vld [vmem:[#allocation11 + $0x50] sm:$0xff] }
 0x375   :  { %2728 = vmatpush2.bf16.msra.mxu1 %v1327_v59  ;;  %2754 = vmatprep.subr.bf16.mxu0 %v1384_v38  ;;  %v2839_v59 = vrot.slane %v3835_v17, %v2838_v14  ;;  %v3839_v38 = vld [vmem:[#allocation9] sm:$0xff] }
 0x376   :  { %2729 = vmatprep.subr.bf16.mxu1 %v1320_v8  ;;  %v1527_v8 = vunpack.c.l.s8.bf16 %v719_v50  ;;  %v2889_v49 = vrot.slane %v3839_v38, %v2838_v14 }
 0x377   :  { %v2867_v45 = vmul.f32 %v2839_v59, %v3802_v41  ;;  %v2977_v41 = vunpack.c.h.s8.bf16 %v2937_v43 }
 0x378   :  { %2755 = vmatpush1.bf16.msra.mxu0 %v1383_v34  ;;  %v711_v34 = vld [vmem:[#allocation6 + $0xc30] sm:$0xff] }
 0x379   :  { %2730 = vmatpush2.bf16.msra.mxu1 %v1319_v9  ;;  %2756 = vmatprep.subr.bf16.mxu0 %v1504_v18  ;;  %v679_v9 = vld [vmem:[#allocation6 + $0xb30] sm:$0xff]  ;;  %v2865_v18 = vmul.f32 %v2831_v21, %v3754_v40  ;;  %v2826_v21 = vsub.s32 0, %v3593_v27 }
 0x37a   :  { %2781 = vmatprep.subr.bf16.mxu1 %v1568_v13  ;;  %v2881_v13 = vrot.slane %v3839_v38, %v2830_v56  ;;  %v1447_v40 = vunpack.c.l.s8.bf16 %v679_v9  ;;  %v2983_v56 = vunpack.c.h.s8.bf16 %v2940_v35 }
 0x37b   :  { %v2446_v54 = vpop.f32.mrf.mxu0 }
 0x37c   :  { %v2487_v24 = vpop.f32.mrf.mxu1  ;;  %2732 = vmatmul.mubr.bf16.vlgmr.msra.gmra.mxu1 %v3704_v25  ;;  %v2447_v57 = vadd.f32 %v2446_v54, %v3816_v63  ;;  %2757 = vmatpush2.bf16.msra.mxu0 %v1503_v55  ;;  %v1455_v55 = vunpack.c.h.s8.bf16 %v679_v9  ;;  %v2915_v52 = vadd.f32 %v2881_v13, %v2865_v18  ;;  %v2945_v54 = vld [vmem:[#allocation11 + $0x78] sm:$0xff]  ;;  %v2846_v9 = vsub.s32 5, %v3593_v27 }
 0x37d   :  { %2782 = vmatpush1.bf16.msra.mxu1 %v1567_v30  ;;  %v3826_v44 = vpop.f32.mrf.mxu0  ;;  %2758 = vmatprep.subr.bf16.mxu0 %v1496_v51  ;;  %v1519_v30 = vunpack.c.h.s8.bf16 %v711_v34  ;;  %v1448_v51 = vunpack.c.l.s8.bf16 %v680_v2  ;;  %v2827_v18 = vrot.slane %v3835_v17, %v2826_v21 }
 0x37e   :  { %v3828_v61 = vpop.f32.mrf.mxu1  ;;  %2783 = vmatprep.subr.bf16.mxu1 %v1560_v23  ;;  %v3830_v42 = vadd.f32 %v2487_v24, %v2447_v57  ;;  %2813 = vmatprep.mubr.bf16.mxu1 %v3527_v0  ;;  %v1472_v0 = vunpack.c.h.s8.bf16 %v688_v6  ;;  %v1512_v23 = vunpack.c.l.s8.bf16 %v712_v22  ;;  %v2917_v24 = vadd.f32 %v2889_v49, %v2867_v45 }
 0x37f   :  { %v2450_v25 = vpop.f32.mrf.mxu0  ;;  %v1511_v57 = vunpack.c.l.s8.bf16 %v711_v34  ;;  %v2449_v2 = vadd.f32 %v3826_v44, %v3820_v3  ;;  %v2982_v22 = vunpack.c.l.s8.bf16 %v2940_v35 }
 0x380   :  { %v2491_v63 = vpop.f32.mrf.mxu1  ;;  %2759 = vmatpush2.bf16.msra.mxu0 %v1495_v58  ;;  %v2993_v58 = vunpack.c.h.s8.bf16 %v2945_v54  ;;  %v2925_v1 = vmax.f32 %v2917_v24, 0.0 }
 0x381   :  { %2784 = vmatpush1.bf16.msra.mxu1 %v1559_v60  ;;  %v2451_v37 = vpop.f32.mrf.mxu0  ;;  %2760 = vmatprep.subr.bf16.mxu0 %v1488_v62  ;;  %v2933_v60 = vld [vmem:[#allocation11 + $0x18] sm:$0xff]  ;;  %v2923_v62 = vmax.f32 %v2915_v52, 0.0  ;;  %v2490_v13 = vadd.f32 %v3828_v61, %v2449_v2 }
 0x382   :  { %v2492_v4 = vpop.f32.mrf.mxu1  ;;  %2785 = vmatprep.subr.bf16.mxu1 %v1552_v36  ;;  %v2941_v36 = vld [vmem:[#allocation11 + $0x58] sm:$0xff]  ;;  %v2969_v28 = vunpack.c.h.s8.bf16 %v2933_v60  ;;  %v2936_v37 = vld [vmem:[#allocation11 + $0x30] sm:$0xff]  ;;  %v2968_v6 = vunpack.c.l.s8.bf16 %v2933_v60  ;;  %v2938_v60 = vld [vmem:[#allocation11 + $0x40] sm:$0xff] }
 0x383   :  { %v2985_v25 = vunpack.c.h.s8.bf16 %v2941_v36  ;;  %v3027_v63 = vpack.c.bf16 %v2923_v62, %v2923_v62  ;;  %v2974_v14 = vunpack.c.l.s8.bf16 %v2936_v37 }
 0x384   :  { %2761 = vmatpush2.bf16.msra.mxu0 %v1487_v47  ;;  %v2976_v47 = vunpack.c.l.s8.bf16 %v2937_v43  ;;  %v2864_v43 = vmul.f32 %v2827_v18, %v3751_v29 }
 0x385   :  { %2786 = vmatpush1.bf16.msra.mxu1 %v1551_v33  ;;  %2762 = vmatprep.subr.bf16.mxu0 %v1480_v5  ;;  %v2992_v33 = vunpack.c.l.s8.bf16 %v2945_v54  ;;  %v3029_v5 = vpack.c.bf16 %v2925_v1, %v2925_v1  ;;  %v2877_v54 = vrot.slane %v3839_v38, %v2826_v21 }
 0x386   :  { %2787 = vmatprep.subr.bf16.mxu1 %v1544_v48  ;;  %v2944_v48 = vld [vmem:[#allocation11 + $0x70] sm:$0xff] }
 0x387   :  { %v2914_v29 = vadd.f32 %v2877_v54, %v2864_v43  ;;  %v2950_v54 = vld [vmem:[#allocation11 + $0xa0] sm:$0xff] }
 0x388   :  { %2763 = vmatpush2.bf16.msra.mxu0 %v1479_v10  ;;  %v2984_v10 = vunpack.c.l.s8.bf16 %v2941_v36  ;;  %v2897_v36 = vrot.slane %v3839_v38, %v2846_v9 }
 0x389   :  { %2788 = vmatpush1.bf16.msra.mxu1 %v1543_v53  ;;  %2764 = vmatprep.subr.bf16.mxu0 %v1472_v0  ;;  %v2975_v53 = vunpack.c.h.s8.bf16 %v2936_v37  ;;  %v2932_v0 = vld [vmem:[#allocation11 + $0x10] sm:$0xff] }
 0x38a   :  { %2789 = vmatprep.subr.bf16.mxu1 %v1536_v46  ;;  %v2991_v46 = vunpack.c.h.s8.bf16 %v2944_v48 }
 0x38c   :  { %2765 = vmatpush2.bf16.msra.mxu0 %v1471_v15  ;;  %v2990_v15 = vunpack.c.l.s8.bf16 %v2944_v48  ;;  %v2978_v48 = vunpack.c.l.s8.bf16 %v2938_v60 }
 0x38d   :  { %2790 = vmatpush1.bf16.msra.mxu1 %v1535_v16  ;;  %2766 = vmatprep.subr.bf16.mxu0 %v1464_v19  ;;  %v2935_v16 = vld [vmem:[#allocation11 + $0x28] sm:$0xff] }
 0x38e   :  { %2791 = vmatprep.subr.bf16.mxu1 %v1528_v20  ;;  %v2943_v19 = vld [vmem:[#allocation11 + $0x68] sm:$0xff]  ;;  %v2966_v20 = vunpack.c.l.s8.bf16 %v2932_v0  ;;  %v2973_v59 = vunpack.c.h.s8.bf16 %v2935_v16  ;;  %v2972_v44 = vunpack.c.l.s8.bf16 %v2935_v16 }
 0x38f   :  { %v2988_v49 = vunpack.c.l.s8.bf16 %v2943_v19 }
 0x390   :  { %2767 = vmatpush2.bf16.msra.mxu0 %v1463_v26  ;;  %v2931_v26 = vld [vmem:[#allocation11 + $0x8] sm:$0xff] }
 0x391   :  { %2792 = vmatpush1.bf16.msra.mxu1 %v1527_v8  ;;  %2768 = vmatprep.subr.bf16.mxu0 %v1456_v31  ;;  %v2834_v8 = vsub.s32 2, %v3593_v27  ;;  %v2989_v31 = vunpack.c.h.s8.bf16 %v2943_v19  ;;  %v2965_v34 = vunpack.c.h.s8.bf16 %v2931_v26  ;;  %v2964_v52 = vunpack.c.l.s8.bf16 %v2931_v26  ;;  %v2948_v19 = vld [vmem:[#allocation11 + $0x90] sm:$0xff]  ;;  %v2957_v26 = vld [vmem:[#allocation11 + $0xd8] sm:$0xff] }
 0x392   :  { %2793 = vmatprep.subr.bf16.mxu1 %v1520_v11  ;;  %v2939_v11 = vld [vmem:[#allocation11 + $0x48] sm:$0xff]  ;;  %v2999_v21 = vunpack.c.h.s8.bf16 %v2948_v19  ;;  %v2998_v18 = vunpack.c.l.s8.bf16 %v2948_v19 }
 0x393   :  { %v2981_v3 = vunpack.c.h.s8.bf16 %v2939_v11  ;;  %v2835_v45 = vrot.slane %v3835_v17, %v2834_v8  ;;  %v2980_v61 = vunpack.c.l.s8.bf16 %v2939_v11  ;;  %v3017_v11 = vunpack.c.h.s8.bf16 %v2957_v26 }
 0x394   :  { %2769 = vmatpush2.bf16.msra.mxu0 %v1455_v55  ;;  %v2934_v55 = vld [vmem:[#allocation11 + $0x20] sm:$0xff] }
 0x395   :  { %2794 = vmatpush1.bf16.msra.mxu1 %v1519_v30  ;;  %2770 = vmatprep.subr.bf16.mxu0 %v1448_v51  ;;  %v2847_v51 = vrot.slane %v3835_v17, %v2846_v9  ;;  %v2971_v24 = vunpack.c.h.s8.bf16 %v2934_v55 }
 0x396   :  { %2795 = vmatprep.subr.bf16.mxu1 %v1512_v23  ;;  %v2942_v23 = vld [vmem:[#allocation11 + $0x60] sm:$0xff] }
 0x398   :  { %2771 = vmatpush2.bf16.msra.mxu0 %v1447_v40  ;;  %v2930_v40 = vld [vmem:[#allocation11] sm:$0xff] }
 0x399   :  { %2796 = vmatpush1.bf16.msra.mxu1 %v1511_v57  ;;  %3238 = vmatprep.subr.bf16.mxu0 %v2977_v41  ;;  %v2866_v57 = vmul.f32 %v2835_v45, %v3797_v12  ;;  %v2885_v41 = vrot.slane %v3839_v38, %v2834_v8  ;;  %v2963_v1 = vunpack.c.h.s8.bf16 %v2930_v40  ;;  %v2962_v37 = vunpack.c.l.s8.bf16 %v2930_v40  ;;  %v2951_v8 = vld [vmem:[#allocation11 + $0xa8] sm:$0xff] }
 0x39a   :  { %3260 = vmatprep.subr.bf16.mxu1 %v2993_v58  ;;  %v2987_v58 = vunpack.c.h.s8.bf16 %v2942_v23  ;;  %v3016_v45 = vunpack.c.l.s8.bf16 %v2957_v26 }
 0x39b   :  { %v3845_v4 = vpop.f32.mrf.mxu0  ;;  %2773 = vmatmul.mubr.bf16.vlgmr.msra.gmra.mxu0 %v3708_v32  ;;  %v2967_v32 = vunpack.c.h.s8.bf16 %v2932_v0 }
 0x39c   :  { %2814 = vmatmul.mubr.bf16.vlgmr.msra.gmra.mxu1 %v3718_v39  ;;  %3239 = vmatpush3.bf16.msra.mxu0 %v2969_v28  ;;  %v2979_v28 = vunpack.c.h.s8.bf16 %v2938_v60 }
 0x39d   :  { %3066 = vmatprep.mubr.bf16.mxu0 %v3027_v63  ;;  %3261 = vmatpush3.bf16.msra.mxu1 %v2985_v25  ;;  %v2530_v7 = vpop.f32.mrf.mxu0  ;;  %v2970_v25 = vunpack.c.l.s8.bf16 %v2934_v55  ;;  %v2916_v63 = vadd.f32 %v2885_v41, %v2866_v57  ;;  %v2956_v55 = vld [vmem:[#allocation11 + $0xd0] sm:$0xff]  ;;  %v3003_v41 = vunpack.c.h.s8.bf16 %v2950_v54 }
 0x39e   :  { %3106 = vmatprep.mubr.bf16.mxu1 %v3029_v5  ;;  %3240 = vmatprep.subr.bf16.mxu0 %v2976_v47  ;;  %v2531_v30 = vadd.f32 %v2530_v7, %v2490_v13  ;;  %v2986_v47 = vunpack.c.l.s8.bf16 %v2942_v23  ;;  %v2922_v5 = vmax.f32 %v2914_v29, 0.0  ;;  %v2949_v7 = vld [vmem:[#allocation11 + $0x98] sm:$0xff]  ;;  %v2842_v13 = vsub.s32 4, %v3593_v27 }
 0x39f   :  { %3262 = vmatprep.subr.bf16.mxu1 %v2992_v33  ;;  %v2532_v50 = vpop.f32.mrf.mxu0  ;;  %v2953_v33 = vld [vmem:[#allocation11 + $0xb8] sm:$0xff]  ;;  %v3001_v0 = vunpack.c.h.s8.bf16 %v2949_v7  ;;  %v3015_v43 = vunpack.c.h.s8.bf16 %v2956_v55  ;;  %v3014_v60 = vunpack.c.l.s8.bf16 %v2956_v55 }
 0x3a0   :  { %3241 = vmatpush3.bf16.msra.mxu0 %v2968_v6  ;;  %v2869_v62 = vmul.f32 %v2847_v51, %v2531_v30  ;;  %v3009_v6 = vunpack.c.h.s8.bf16 %v2953_v33  ;;  %v3008_v35 = vunpack.c.l.s8.bf16 %v2953_v33  ;;  %v2529_v51 = vadd.f32 %v3845_v4, %v3830_v42 }
 0x3a1   :  { %3263 = vmatpush3.bf16.msra.mxu1 %v2984_v10  ;;  %v2533_v39 = vpop.f32.mrf.mxu0  ;;  %3242 = vmatprep.subr.bf16.mxu0 %v2975_v53  ;;  %v2924_v10 = vmax.f32 %v2916_v63, 0.0  ;;  %v2843_v23 = vrot.slane %v3835_v17, %v2842_v13  ;;  %v2893_v57 = vrot.slane %v3839_v38, %v2842_v13  ;;  %v2955_v63 = vld [vmem:[#allocation11 + $0xc8] sm:$0xff]  ;;  %v2854_v13 = vsub.s32 7, %v3593_v27 }
 0x3a2   :  { %3264 = vmatprep.subr.bf16.mxu1 %v2991_v46  ;;  %v2919_v12 = vadd.f32 %v2897_v36, %v2869_v62  ;;  %v3026_v46 = vpack.c.bf16 %v2922_v5, %v2922_v5  ;;  %v3002_v62 = vunpack.c.l.s8.bf16 %v2950_v54  ;;  %v3013_v33 = vunpack.c.h.s8.bf16 %v2955_v63 }
 0x3a3   :  { %v3028_v50 = vpack.c.bf16 %v2924_v10, %v2924_v10  ;;  %v2868_v40 = vmul.f32 %v2843_v23, %v2529_v51  ;;  %v2855_v54 = vrot.slane %v3835_v17, %v2854_v13 }
 0x3a4   :  { %3243 = vmatpush3.bf16.msra.mxu0 %v2967_v32  ;;  %v2927_v53 = vmax.f32 %v2919_v12, 0.0  ;;  %v2952_v32 = vld [vmem:[#allocation11 + $0xb0] sm:$0xff] }
 0x3a5   :  { %3265 = vmatpush3.bf16.msra.mxu1 %v2983_v56  ;;  %3244 = vmatprep.subr.bf16.mxu0 %v2974_v14  ;;  %v3000_v14 = vunpack.c.l.s8.bf16 %v2949_v7  ;;  %v3007_v16 = vunpack.c.h.s8.bf16 %v2952_v32  ;;  %v2918_v4 = vadd.f32 %v2893_v57, %v2868_v40  ;;  %v3012_v7 = vunpack.c.l.s8.bf16 %v2955_v63 }
 0x3a6   :  { %3266 = vmatprep.subr.bf16.mxu1 %v2990_v15  ;;  %v3031_v56 = vpack.c.bf16 %v2927_v53, %v2927_v53  ;;  %v2958_v53 = vld [vmem:[#allocation11 + $0xe0] sm:$0xff] }
 0x3a8   :  { %3245 = vmatpush3.bf16.msra.mxu0 %v2966_v20 }
 0x3a9   :  { %3267 = vmatpush3.bf16.msra.mxu1 %v2982_v22  ;;  %3246 = vmatprep.subr.bf16.mxu0 %v2973_v59  ;;  %v3006_v22 = vunpack.c.l.s8.bf16 %v2952_v32  ;;  %v2961_v59 = vld [vmem:[#allocation11 + $0xf8] sm:$0xff] }
 0x3aa   :  { %3268 = vmatprep.subr.bf16.mxu1 %v2989_v31  ;;  %v3025_v31 = vunpack.c.h.s8.bf16 %v2961_v59  ;;  %v3024_v9 = vunpack.c.l.s8.bf16 %v2961_v59 }
 0x3ac   :  { %3247 = vmatpush3.bf16.msra.mxu0 %v2965_v34  ;;  %v2960_v34 = vld [vmem:[#allocation11 + $0xf0] sm:$0xff] }
 0x3ad   :  { %3269 = vmatpush3.bf16.msra.mxu1 %v2981_v3  ;;  %3248 = vmatprep.subr.bf16.mxu0 %v2972_v44  ;;  %v3005_v3 = vunpack.c.h.s8.bf16 %v2951_v8  ;;  %v2947_v44 = vld [vmem:[#allocation11 + $0x88] sm:$0xff] }
 0x3ae   :  { %3270 = vmatprep.subr.bf16.mxu1 %v2988_v49  ;;  %v3023_v49 = vunpack.c.h.s8.bf16 %v2960_v34  ;;  %v2997_v30 = vunpack.c.h.s8.bf16 %v2947_v44 }
 0x3b0   :  { %3249 = vmatpush3.bf16.msra.mxu0 %v2964_v52  ;;  %v3004_v52 = vunpack.c.l.s8.bf16 %v2951_v8 }
 0x3b1   :  { %3271 = vmatpush3.bf16.msra.mxu1 %v2980_v61  ;;  %3250 = vmatprep.subr.bf16.mxu0 %v2971_v24  ;;  %v3022_v61 = vunpack.c.l.s8.bf16 %v2960_v34  ;;  %v2996_v24 = vunpack.c.l.s8.bf16 %v2947_v44 }
 0x3b2   :  { %3272 = vmatprep.subr.bf16.mxu1 %v2987_v58  ;;  %v2946_v58 = vld [vmem:[#allocation11 + $0x80] sm:$0xff] }
 0x3b3   :  { %v2995_v42 = vunpack.c.h.s8.bf16 %v2946_v58  ;;  %v2994_v36 = vunpack.c.l.s8.bf16 %v2946_v58 }
 0x3b4   :  { %3251 = vmatpush3.bf16.msra.mxu0 %v2963_v1  ;;  %v2926_v1 = vmax.f32 %v2918_v4, 0.0 }
 0x3b5   :  { %3273 = vmatpush3.bf16.msra.mxu1 %v2979_v28  ;;  %3252 = vmatprep.subr.bf16.mxu0 %v2970_v25  ;;  %v2959_v28 = vld [vmem:[#allocation11 + $0xe8] sm:$0xff] }
 0x3b6   :  { %3274 = vmatprep.subr.bf16.mxu1 %v2986_v47  ;;  %v3030_v29 = vpack.c.bf16 %v2926_v1, %v2926_v1  ;;  %v3021_v25 = vunpack.c.h.s8.bf16 %v2959_v28 }
 0x3b8   :  { %3253 = vmatpush3.bf16.msra.mxu0 %v2962_v37 }
 0x3b9   :  { %3275 = vmatpush3.bf16.msra.mxu1 %v2978_v48  ;;  %3282 = vmatprep.subr.bf16.mxu0 %v3009_v6  ;;  %v3020_v48 = vunpack.c.l.s8.bf16 %v2959_v28 }
 0x3ba   :  { %3304 = vmatprep.subr.bf16.mxu1 %v3025_v31 }
 0x3bb   :  { %3067 = vmatmul.mubr.bf16.vlgmr.msra.gmra.mxu0 %v3026_v46  ;;  %v2954_v46 = vld [vmem:[#allocation11 + $0xc0] sm:$0xff] }
 0x3bc   :  { %v3863_v39 = vpop.f32.mrf.mxu1  ;;  %3107 = vmatmul.mubr.bf16.vlgmr.msra.gmra.mxu1 %v3028_v50  ;;  %3283 = vmatpush3.bf16.msra.mxu0 %v3001_v0  ;;  %v3019_v0 = vunpack.c.h.s8.bf16 %v2958_v53  ;;  %v3018_v50 = vunpack.c.l.s8.bf16 %v2958_v53  ;;  %v3010_v32 = vunpack.c.l.s8.bf16 %v2954_v46 }
 0x3bd   :  { %3146 = vmatprep.mubr.bf16.mxu0 %v3031_v56  ;;  %3284 = vmatprep.subr.bf16.mxu0 %v3008_v35  ;;  %v3011_v35 = vunpack.c.h.s8.bf16 %v2954_v46 }
 0x3be   :  { %v3865_v15 = vpop.f32.mrf.mxu1  ;;  %3305 = vmatpush3.bf16.msra.mxu1 %v3017_v11 }
 0x3bf   :  { %3306 = vmatprep.subr.bf16.mxu1 %v3024_v9  ;;  %v2850_v9 = vsub.s32 6, %v3593_v27  ;;  %v2905_v27 = vrot.slane %v3839_v38, %v2854_v13 }
 0x3c0   :  { %v2573_v20 = vpop.f32.mrf.mxu1  ;;  %3285 = vmatpush3.bf16.msra.mxu0 %v3000_v14 }
 0x3c1   :  { %3286 = vmatprep.subr.bf16.mxu0 %v3007_v16  ;;  %v2851_v55 = vrot.slane %v3835_v17, %v2850_v9 }
 0x3c2   :  { %v2574_v2 = vpop.f32.mrf.mxu1  ;;  %3307 = vmatpush3.bf16.msra.mxu1 %v3016_v45 }
 0x3c3   :  { %3308 = vmatprep.subr.bf16.mxu1 %v3023_v49 }
 0x3c4   :  { %3287 = vmatpush3.bf16.msra.mxu0 %v2999_v21 }
 0x3c5   :  { %3288 = vmatprep.subr.bf16.mxu0 %v3006_v22 }
 0x3c6   :  { %3309 = vmatpush3.bf16.msra.mxu1 %v3015_v43 }
 0x3c7   :  { %3310 = vmatprep.subr.bf16.mxu1 %v3022_v61 }
 0x3c8   :  { %3289 = vmatpush3.bf16.msra.mxu0 %v2998_v18 }
 0x3c9   :  { %3290 = vmatprep.subr.bf16.mxu0 %v3005_v3 }
 0x3ca   :  { %3311 = vmatpush3.bf16.msra.mxu1 %v3014_v60 }
 0x3cb   :  { %3312 = vmatprep.subr.bf16.mxu1 %v3021_v25 }
 0x3cc   :  { %3291 = vmatpush3.bf16.msra.mxu0 %v2997_v30 }
 0x3cd   :  { %3292 = vmatprep.subr.bf16.mxu0 %v3004_v52  ;;  %v2901_v52 = vrot.slane %v3839_v38, %v2850_v9 }
 0x3ce   :  { %3313 = vmatpush3.bf16.msra.mxu1 %v3013_v33 }
 0x3cf   :  { %3314 = vmatprep.subr.bf16.mxu1 %v3020_v48 }
 0x3d0   :  { %3293 = vmatpush3.bf16.msra.mxu0 %v2996_v24 }
 0x3d1   :  { %3294 = vmatprep.subr.bf16.mxu0 %v3003_v41 }
 0x3d2   :  { %3315 = vmatpush3.bf16.msra.mxu1 %v3012_v7 }
 0x3d3   :  { %3316 = vmatprep.subr.bf16.mxu1 %v3019_v0 }
 0x3d4   :  { %3295 = vmatpush3.bf16.msra.mxu0 %v2995_v42 }
 0x3d5   :  { %3296 = vmatprep.subr.bf16.mxu0 %v3002_v62 }
 0x3d6   :  { %3317 = vmatpush3.bf16.msra.mxu1 %v3011_v35 }
 0x3d7   :  { %3318 = vmatprep.subr.bf16.mxu1 %v3018_v50 }
 0x3d8   :  { %3297 = vmatpush3.bf16.msra.mxu0 %v2994_v36 }
 0x3da   :  { %3319 = vmatpush3.bf16.msra.mxu1 %v3010_v32 }
 0x3db   :  { %v2610_v47 = vpop.f32.mrf.mxu0  ;;  %3147 = vmatmul.mubr.bf16.vlgmr.msra.gmra.mxu0 %v3030_v29 }
 0x3dc   :  { %v2611_v12 = vadd.f32 %v2610_v47, %v3863_v39 }
 0x3dd   :  { %v2612_v37 = vpop.f32.mrf.mxu0 }
 0x3de   :  { %v2613_v5 = vadd.f32 %v2612_v37, %v3865_v15 }
 0x3df   :  { %v2614_v6 = vpop.f32.mrf.mxu0 }
 0x3e1   :  { %v2615_v10 = vpop.f32.mrf.mxu0 }
 0x3fc   :  { %v2651_v39 = vpop.f32.mrf.mxu1 }
 0x3fd   :  { %v2652_v56 = vadd.f32 %v2651_v39, %v2611_v12  ;;  %v3236_v39 = vld [vmem:[#allocation12] ss:$0 sm:$0xff] }
 0x3fe   :  { %v2653_v14 = vpop.f32.mrf.mxu1 }
 0x3ff   :  { %v2654_v15 = vadd.f32 %v2653_v14, %v2613_v5 }
 0x400   :  { %v2655_v16 = vpop.f32.mrf.mxu1 }
 0x401   :  { %v3237_v16 = vld [vmem:[#allocation14] ss:$0 sm:$0xff] }
 0x402   :  { %v2656_v19 = vpop.f32.mrf.mxu1 }
 0x41b   :  { %v2692_v20 = vpop.f32.mrf.mxu0 }
 0x41c   :  { %v2693_v11 = vadd.f32 %v2692_v20, %v2652_v56 }
 0x41d   :  { %v2694_v21 = vpop.f32.mrf.mxu0 }
 0x41e   :  { %v2695_v34 = vadd.f32 %v2694_v21, %v2654_v15 }
 0x41f   :  { %v2696_v2 = vpop.f32.mrf.mxu0 }
 0x421   :  { %v2697_v22 = vpop.f32.mrf.mxu0 }
 0x43c   :  { %v2733_v59 = vpop.f32.mrf.mxu1 }
 0x43d   :  { %v2734_v18 = vadd.f32 %v2733_v59, %v2693_v11 }
 0x43e   :  { %v2735_v26 = vpop.f32.mrf.mxu1 }
 0x43f   :  { %v2736_v45 = vadd.f32 %v2735_v26, %v2695_v34 }
 0x440   :  { %v2737_v8 = vpop.f32.mrf.mxu1 }
 0x442   :  { %v2738_v31 = vpop.f32.mrf.mxu1 }
 0x45b   :  { %v2774_v3 = vpop.f32.mrf.mxu0 }
 0x45c   :  { %v2815_v44 = vpop.f32.mrf.mxu1  ;;  %v2775_v49 = vadd.f32 %v2774_v3, %v2734_v18 }
 0x45d   :  { %v2776_v30 = vpop.f32.mrf.mxu0 }
 0x45e   :  { %v2817_v51 = vpop.f32.mrf.mxu1  ;;  %v2816_v23 = vadd.f32 %v2815_v44, %v2775_v49  ;;  %v2777_v43 = vadd.f32 %v2776_v30, %v2736_v45 }
 0x45f   :  { %v2778_v61 = vpop.f32.mrf.mxu0 }
 0x460   :  { %v2819_v24 = vpop.f32.mrf.mxu1  ;;  %v2870_v40 = vmul.f32 %v2851_v55, %v2816_v23  ;;  %v2818_v57 = vadd.f32 %v2817_v51, %v2777_v43 }
 0x461   :  { %v2779_v41 = vpop.f32.mrf.mxu0 }
 0x462   :  { %v2820_v58 = vpop.f32.mrf.mxu1  ;;  %v2920_v60 = vadd.f32 %v2901_v52, %v2870_v40  ;;  %v2871_v42 = vmul.f32 %v2855_v54, %v2818_v57 }
 0x464   :  { %v2921_v4 = vadd.f32 %v2905_v27, %v2871_v42  ;;  %v2928_v62 = vmax.f32 %v2920_v60, 0.0 }
 0x466   :  { %v2929_v36 = vmax.f32 %v2921_v4, 0.0  ;;  %v3032_v29 = vpack.c.bf16 %v2928_v62, %v2928_v62 }
 0x468   :  { %v3033_v1 = vpack.c.bf16 %v2929_v36, %v2929_v36 }
 0x46a   :  { %3186 = vmatprep.mubr.bf16.mxu1 %v3033_v1 }
 0x46b   :  { %3187 = vmatmul.mubr.bf16.vlgmr.msra.gmra.mxu1 %v3032_v29 }
 0x47b   :  { %v3254_v28 = vpop.f32.mrf.mxu0 }
 0x47c   :  { %v3276_v25 = vpop.f32.mrf.mxu1 }
 0x47d   :  { %v3255_v17 = vpop.f32.mrf.mxu0 }
 0x47e   :  { %v3256_v63 = vadd.f32 %v3255_v17, %v3254_v28  ;;  %v3277_v47 = vpop.f32.mrf.mxu1 }
 0x47f   :  { %v3278_v33 = vadd.f32 %v3277_v47, %v3276_v25  ;;  %v3257_v12 = vpop.f32.mrf.mxu0 }
 0x480   :  { %v3279_v37 = vpop.f32.mrf.mxu1 }
 0x481   :  { %v3109_v38 = vadd.f32 %v3278_v33, %v3256_v63  ;;  %v3258_v5 = vpop.f32.mrf.mxu0 }
 0x482   :  { %v3280_v48 = vpop.f32.mrf.mxu1 }
 0x49b   :  { %v3298_v6 = vpop.f32.mrf.mxu0 }
 0x49d   :  { %v3299_v7 = vpop.f32.mrf.mxu0 }
 0x49e   :  { %v3300_v10 = vadd.f32 %v3299_v7, %v3298_v6 }
 0x49f   :  { %v3301_v53 = vpop.f32.mrf.mxu0 }
 0x4a0   :  { %v3149_v0 = vadd.f32 %v3300_v10, %v3109_v38 }
 0x4a1   :  { %v3302_v46 = vpop.f32.mrf.mxu0 }
 0x52b   :  { %v3320_v35 = vpop.f32.mrf.mxu1 }
 0x52d   :  { %v3321_v50 = vpop.f32.mrf.mxu1 }
 0x52e   :  { %v3322_v32 = vadd.f32 %v3321_v50, %v3320_v35 }
 0x52f   :  { %v3323_v56 = vpop.f32.mrf.mxu1 }
 0x530   :  { %v3189_v14 = vadd.f32 %v3322_v32, %v3149_v0 }
 0x531   :  { %v3324_v15 = vpop.f32.mrf.mxu1 }
 0x532   :  { %v3201_v19 = vmul.f32 %v3236_v39, %v3189_v14 }
 0x534   :  { %v3209_v20 = vadd.f32 %v3237_v16, %v3201_v19 }
 0x536   :  { %3210 = vst [vmem:[#allocation15] sm:$0x3] %v3209_v20 }
 0x537   :  { %3497 = shalt.err (!%p3494_p11)
}
 0x538   :  { %3220 = dma.vmem_to_hbm [thread:$0]  %s3218_s6, 32, %s3890_s7, [#allocation5]  }
 0x539   :  { %3514 = dma.done.wait [#allocation5], 32  }
 0x53a   :  { %3515 = vsyncadd [#allocation5], 4294967264 }
 0x53b   :  { %3224 = vsyncpa [#allocation4], 1 }
 0x53c   :  { %3225 = vsyncpa [#allocation7], 1 }
 0x53d   :  { %3226 = vsyncpa [#allocation10], 1 }
 0x53e   :  { %3227 = vsyncpa [#allocation13], 1 }
 0x53f   :  { %3228 = vsyncpa [#allocation5], 1 }

</bundles_post_ra>
